<compile_context>
chip_gen: v7x
topology: tpu7x:2x2x1
jax: 0.10.0
libtpu: 0.0.40
codegen_flags: <defaults>
</compile_context>

<pallas_src>
import functools

import numpy as np
import jax
import jax.numpy as jnp
from jax.experimental import pallas as pl
from jax.experimental.pallas import tpu as pltpu


# ---------------------------------------------------------------------------
# Fused kernel: conv1 -> pool -> conv2 -> conv3 -> pool -> MLP, one batch tile.
# Activation layout: stacked rows, one image = (H+2) rows (zero halo row,
# H data rows, zero halo row); columns are lane-dense (w * C + c).
# ---------------------------------------------------------------------------
def _nn2_kernel(x_ref,
                b1w_ref, b1b_ref, se1_ref, so1_ref, te1_ref, to1_ref,
                b2w_ref, b2b_ref, s2_ref,
                b3w_ref, b3b_ref, se3_ref, so3_ref, te3_ref, to3_ref,
                w1_ref, l1b_ref, w2_ref, l2b_ref, w3_ref, l3b_ref,
                out_ref):
    f32 = jnp.float32
    bf16 = jnp.bfloat16

    def conv3x3(P, B_ref, bias_ref):
        # P: (Mp, W*Cin) bf16, stacked row-padded input (zero halo rows).
        # 3 row-shifted bf16 MXU matmuls against block-banded weights; the
        # width halo is already folded into B (out-of-range taps dropped).
        Mp = P.shape[0]
        acc = jnp.dot(P[0:Mp - 2], B_ref[0], preferred_element_type=f32)
        acc = acc + jnp.dot(P[1:Mp - 1], B_ref[1], preferred_element_type=f32)
        acc = acc + jnp.dot(P[2:Mp], B_ref[2], preferred_element_type=f32)
        return jnp.maximum(acc + bias_ref[...], 0.0).astype(bf16)

    def pool(y, se_ref, so_ref, te_ref, to_ref):
        # 2x2/stride-2 maxpool as max of 0/1 bf16 selector matmuls.
        # The row selectors also re-pack rows into the next stage's layout
        # (emitting exact zero halo rows / dropping cross-image garbage rows).
        r = jnp.maximum(
            jnp.dot(se_ref[...], y, preferred_element_type=f32),
            jnp.dot(so_ref[...], y, preferred_element_type=f32)).astype(bf16)
        return jnp.maximum(
            jnp.dot(r, te_ref[...], preferred_element_type=f32),
            jnp.dot(r, to_ref[...], preferred_element_type=f32)).astype(bf16)

    # stage 1: conv1(1->4) + ReLU + pool        (TB*30, 28) -> (TB*16, 56)
    y1 = conv3x3(x_ref[...], b1w_ref, b1b_ref)              # (TB*30-2, 112)
    p2 = pool(y1, se1_ref, so1_ref, te1_ref, to1_ref)       # (TB*16, 56)

    # stage 2: conv2(4->16) + ReLU              (TB*16, 56) -> (TB*16, 224)
    y2 = conv3x3(p2, b2w_ref, b2b_ref)                      # (TB*16-2, 224)
    p3 = jnp.dot(s2_ref[...], y2,                            # re-pad rows
                 preferred_element_type=f32).astype(bf16)   # (TB*16, 224)

    # stage 3: conv3(16->32) + ReLU + pool      (TB*16, 224) -> (7*TB, 224)
    y3 = conv3x3(p3, b3w_ref, b3b_ref)                      # (TB*16-2, 448)
    f3 = pool(y3, se3_ref, so3_ref, te3_ref, to3_ref)       # (7*TB, 224)
    # f3 row t*TB + b = spatial row t of image b, lanes ordered (w, c).

    # MLP: relu(x@W1+b1) -> relu(@W2+b2) -> @W3+b3 (W3/b3 128-lane padded).
    TB = out_ref.shape[0]
    acc = jnp.zeros((TB, w1_ref.shape[1]), f32)
    for t in range(7):                                       # K split over the 7 rows
        acc = acc + jnp.dot(f3[t * TB:(t + 1) * TB, :],
                            w1_ref[t * 224:(t + 1) * 224, :],
                            preferred_element_type=f32)
    h = jnp.maximum(acc + l1b_ref[...], 0.0).astype(bf16)
    h = jnp.maximum(jnp.dot(h, w2_ref[...], preferred_element_type=f32)
                    + l2b_ref[...], 0.0).astype(bf16)
    out = jnp.dot(h, w3_ref[...], preferred_element_type=f32) + l3b_ref[...]
    out_ref[...] = out.astype(out_ref.dtype)


def nn2_pallas(xp, P, *, tb):
    """xp: (Npad*30, 28) bf16 stacked row-padded images; P: prepacked params."""
    rows = xp.shape[0]
    steps = rows // (tb * 30)
    NO = P["W3"].shape[1]

    weights = [P["B1"], P["b1"], P["Se1"], P["So1"], P["Te1"], P["To1"],
               P["B2"], P["b2"], P["S2"],
               P["B3"], P["b3"], P["Se3"], P["So3"], P["Te3"], P["To3"],
               P["W1"], P["bl1"], P["W2"], P["bl2"], P["W3"], P["bl3"]]

    const2 = lambda i: (0, 0)
    const3 = lambda i: (0, 0, 0)
    in_specs = [pl.BlockSpec((tb * 30, 28), lambda i: (i, 0))]   # one batch tile
    for w in weights:                                             # VMEM-resident weights
        in_specs.append(pl.BlockSpec(w.shape, const3 if w.ndim == 3 else const2))

    return pl.pallas_call(
        _nn2_kernel,
        out_shape=jax.ShapeDtypeStruct((steps * tb, NO), jnp.float32),
        grid=(steps,),
        in_specs=in_specs,
        out_specs=pl.BlockSpec((tb, NO), lambda i: (i, 0)),
        compiler_params=pltpu.CompilerParams(dimension_semantics=("parallel",)),
    )(xp, *weights)


# ------------------------- one-time host-side prepack ----------------------
def _pack_conv(w, b, W):
    """(Cout,Cin,3,3) conv weights -> 3 block-banded bf16 matrices B[dh] of
    shape (W*Cin, W*Cout) (width halo folded in: out-of-range taps dropped),
    plus a lane-tiled f32 bias row."""
    w = np.asarray(w, np.float32)
    b = np.asarray(b, np.float32)
    Cout, Cin = w.shape[0], w.shape[1]
    B = np.zeros((3, W * Cin, W * Cout), np.float32)
    wt = np.transpose(w, (2, 3, 1, 0))                # (dh, dw, Cin, Cout)
    for dh in range(3):
        for dw in range(3):
            for wc in range(W):
                ws = wc + dw - 1
                if 0 <= ws < W:
                    B[dh, ws * Cin:(ws + 1) * Cin,
                      wc * Cout:(wc + 1) * Cout] = wt[dh, dw]
    bias = np.tile(b, W).reshape(1, W * Cout)
    return jnp.asarray(B, jnp.bfloat16), jnp.asarray(bias, jnp.float32)


def _row_pool_pad_selectors(tb):
    """conv1 stacked output rows (tb*30-2) -> conv2 padded-input rows (tb*16),
    fusing the row-pair max selection with exact zero halo rows."""
    rin, rout = tb * 30 - 2, tb * 16
    Se = np.zeros((rout, rin), np.float32)
    So = np.zeros((rout, rin), np.float32)
    for b in range(tb):
        for t in range(14):
            Se[b * 16 + 1 + t, b * 30 + 2 * t] = 1.0
            So[b * 16 + 1 + t, b * 30 + 2 * t + 1] = 1.0
    return jnp.asarray(Se, jnp.bfloat16), jnp.asarray(So, jnp.bfloat16)


def _shift_pad_selector(tb):
    """conv2 stacked output rows (tb*16-2) -> conv3 padded-input rows (tb*16)."""
    rin, rout = tb * 16 - 2, tb * 16
    S = np.zeros((rout, rin), np.float32)
    for b in range(tb):
        for h in range(14):
            S[b * 16 + 1 + h, b * 16 + h] = 1.0
    return jnp.asarray(S, jnp.bfloat16)


def _row_pool_chunk_selectors(tb):
    """conv3 stacked output rows (tb*16-2) -> MLP chunk layout rows (7*tb):
    output row t*tb + b = pooled spatial row t of image b (row-pair max)."""
    rin, rout = tb * 16 - 2, 7 * tb
    Se = np.zeros((rout, rin), np.float32)
    So = np.zeros((rout, rin), np.float32)
    for b in range(tb):
        for t in range(7):
            Se[t * tb + b, b * 16 + 2 * t] = 1.0
            So[t * tb + b, b * 16 + 2 * t + 1] = 1.0
    return jnp.asarray(Se, jnp.bfloat16), jnp.asarray(So, jnp.bfloat16)


def _col_pool_selectors(W, Cout):
    """0/1 matrices for the column (w) pair max: out = max(y @ Te, y @ To)."""
    Wo = W // 2
    Te = np.zeros((W * Cout, Wo * Cout), np.float32)
    To = np.zeros((W * Cout, Wo * Cout), np.float32)
    eye = np.eye(Cout, dtype=np.float32)
    for u in range(Wo):
        Te[(2 * u) * Cout:(2 * u + 1) * Cout, u * Cout:(u + 1) * Cout] = eye
        To[(2 * u + 1) * Cout:(2 * u + 2) * Cout, u * Cout:(u + 1) * Cout] = eye
    return jnp.asarray(Te, jnp.bfloat16), jnp.asarray(To, jnp.bfloat16)


def prepack_params(params, H1, H2, D_out, *, tb):
    """One-time host-side re-layout of the PyTorch-layout parameters."""
    assert tb % 8 == 0, "batch tile must be a multiple of 8 (sublane alignment)"
    P = {}
    P["B1"], P["b1"] = _pack_conv(params["c1_w"], params["c1_b"], W=28)
    P["B2"], P["b2"] = _pack_conv(params["c2_w"], params["c2_b"], W=14)
    P["B3"], P["b3"] = _pack_conv(params["c3_w"], params["c3_b"], W=14)
    P["Se1"], P["So1"] = _row_pool_pad_selectors(tb)
    P["Te1"], P["To1"] = _col_pool_selectors(28, 4)
    P["S2"] = _shift_pad_selector(tb)
    P["Se3"], P["So3"] = _row_pool_chunk_selectors(tb)
    P["Te3"], P["To3"] = _col_pool_selectors(14, 32)
    # linear1: permute K from PyTorch's (c,h,w) flatten to the kernel's
    # (h, w, c) chunk layout, transpose to (K, H1).
    l1 = np.asarray(params["l1_w"], np.float32).reshape(H1, 32, 7, 7)
    l1 = l1.transpose(2, 3, 1, 0).reshape(7 * 7 * 32, H1)
    P["W1"] = jnp.asarray(l1, jnp.bfloat16)
    P["bl1"] = jnp.asarray(np.asarray(params["l1_b"], np.float32).reshape(1, H1))
    P["W2"] = jnp.asarray(np.asarray(params["l2_w"], np.float32).T, jnp.bfloat16)
    P["bl2"] = jnp.asarray(np.asarray(params["l2_b"], np.float32).reshape(1, H2))
    # linear3: pad the D_out-wide output to 128 lanes for a dense store.
    NO = 128
    w3 = np.zeros((H2, NO), np.float32)
    w3[:, :D_out] = np.asarray(params["l3_w"], np.float32).T
    b3 = np.zeros((1, NO), np.float32)
    b3[0, :D_out] = np.asarray(params["l3_b"], np.float32)
    P["W3"] = jnp.asarray(w3, jnp.bfloat16)
    P["bl3"] = jnp.asarray(b3)
    return P


# ------------------------------ NN2 forward --------------------------------
def nn2_forward(x, P, *, d_out, tb):
    """x: (N, 1, 28, 28) f32 NCHW; P: prepacked params (built with same tb)."""
    N = x.shape[0]
    npad = -(-N // tb) * tb
    xi = x.reshape(N, 28, 28).astype(jnp.bfloat16)
    if npad != N:                                    # pad batch to a tile multiple
        xi = jnp.concatenate([xi, jnp.zeros((npad - N, 28, 28), xi.dtype)], 0)
    # Row halo for conv1 only (a single tiny pad of the raw input); all other
    # padding / re-layout happens inside the fused kernel.
    xp = jnp.pad(xi, ((0, 0), (1, 1), (0, 0))).reshape(npad * 30, 28)
    logits = nn2_pallas(xp, P, tb=tb)                # (npad, 128) f32, lane-dense
    return logits[:N, :d_out]


# --------------------------- params & f32 reference ------------------------
def init_params(key, H1, H2, D_out):
    keys = jax.random.split(key, 12)

    def u(k, shape, fan_in):
        bound = 1.0 / np.sqrt(float(fan_in))
        return jax.random.uniform(k, shape, jnp.float32, -bound, bound)

    return {
        "c1_w": u(keys[0], (4, 1, 3, 3), 1 * 9),
        "c1_b": u(keys[1], (4,), 1 * 9),
        "c2_w": u(keys[2], (16, 4, 3, 3), 4 * 9),
        "c2_b": u(keys[3], (16,), 4 * 9),
        "c3_w": u(keys[4], (32, 16, 3, 3), 16 * 9),
        "c3_b": u(keys[5], (32,), 16 * 9),
        "l1_w": u(keys[6], (H1, 1568), 1568),
        "l1_b": u(keys[7], (H1,), 1568),
        "l2_w": u(keys[8], (H2, H1), H1),
        "l2_b": u(keys[9], (H2,), H1),
        "l3_w": u(keys[10], (D_out, H2), H2),
        "l3_b": u(keys[11], (D_out,), H2),
    }


def nn2_reference(x, params):
    """Pure-JAX f32 reference matching the PyTorch NN2 forward."""
    def conv(z, w, b):
        y = jax.lax.conv_general_dilated(
            z, w, window_strides=(1, 1), padding=((1, 1), (1, 1)),
            dimension_numbers=("NCHW", "OIHW", "NCHW"))
        return jax.nn.relu(y + b[None, :, None, None])

    def pool(z):
        return jnp.maximum(
            jnp.maximum(z[:, :, 0::2, 0::2], z[:, :, 0::2, 1::2]),
            jnp.maximum(z[:, :, 1::2, 0::2], z[:, :, 1::2, 1::2]))

    y = pool(conv(x, params["c1_w"], params["c1_b"]))
    y = conv(y, params["c2_w"], params["c2_b"])
    y = pool(conv(y, params["c3_w"], params["c3_b"]))
    y = y.reshape(y.shape[0], -1)                     # PyTorch (C,H,W) flatten
    y = jax.nn.relu(y @ params["l1_w"].T + params["l1_b"])
    y = jax.nn.relu(y @ params["l2_w"].T + params["l2_b"])
    return y @ params["l3_w"].T + params["l3_b"]


if __name__ == "__main__":
    # NN2(D_in=6272, H1=128, H2=64, D_out=10): int(D_in/4) == 1568 == 32*7*7,
    # so the input is (batch, 1, 28, 28).  Batch 16, batch-tile 8 => 2 parallel
    # grid steps (exercises the megacore split on v7x).
    D_in, H1, H2, D_out = 6272, 128, 64, 10
    TB, N = 8, 16

    key = jax.random.PRNGKey(0)
    k_x, k_p = jax.random.split(key)
    x = jax.random.normal(k_x, (N, 1, 28, 28), dtype=jnp.float32)
    params = init_params(k_p, H1, H2, D_out)

    packed = prepack_params(params, H1, H2, D_out, tb=TB)   # one-time host packing
    fwd = jax.jit(functools.partial(nn2_forward, d_out=D_out, tb=TB))
    out = fwd(x, packed)
    jax.block_until_ready(out)
    assert out.shape == (N, D_out), out.shape

    # Numerical check vs a pure-JAX f32 reference (bf16 MXU inputs -> loose tol).
    ref = jax.jit(nn2_reference)(x, params)
    err = float(jnp.max(jnp.abs(out - ref)))
    assert err < 0.15, f"max abs err vs reference: {err}"
    print("KERNEL_OK")
</pallas_src>

<mosaic_0001>
module attributes {stable_mosaic.version = 11 : i64} {
  func.func @_nn2_kernel(%arg0: i32, %arg1: memref<240x28xbf16, #tpu.memory_space<vmem>>, %arg2: memref<3x28x112xbf16, #tpu.memory_space<vmem>>, %arg3: memref<1x112xf32, #tpu.memory_space<vmem>>, %arg4: memref<128x238xbf16, #tpu.memory_space<vmem>>, %arg5: memref<128x238xbf16, #tpu.memory_space<vmem>>, %arg6: memref<112x56xbf16, #tpu.memory_space<vmem>>, %arg7: memref<112x56xbf16, #tpu.memory_space<vmem>>, %arg8: memref<3x56x224xbf16, #tpu.memory_space<vmem>>, %arg9: memref<1x224xf32, #tpu.memory_space<vmem>>, %arg10: memref<128x126xbf16, #tpu.memory_space<vmem>>, %arg11: memref<3x224x448xbf16, #tpu.memory_space<vmem>>, %arg12: memref<1x448xf32, #tpu.memory_space<vmem>>, %arg13: memref<56x126xbf16, #tpu.memory_space<vmem>>, %arg14: memref<56x126xbf16, #tpu.memory_space<vmem>>, %arg15: memref<448x224xbf16, #tpu.memory_space<vmem>>, %arg16: memref<448x224xbf16, #tpu.memory_space<vmem>>, %arg17: memref<1568x128xbf16, #tpu.memory_space<vmem>>, %arg18: memref<1x128xf32, #tpu.memory_space<vmem>>, %arg19: memref<128x64xbf16, #tpu.memory_space<vmem>>, %arg20: memref<1x64xf32, #tpu.memory_space<vmem>>, %arg21: memref<64x128xbf16, #tpu.memory_space<vmem>>, %arg22: memref<1x128xf32, #tpu.memory_space<vmem>>, %arg23: memref<8x128xf32, #tpu.memory_space<vmem>>) attributes {dimension_semantics = [#tpu.dimension_semantics<parallel>], iteration_bounds = array<i64: 2>, scalar_prefetch = 0 : i64, scratch_operands = 0 : i64, tpu.core_type = #tpu.core_type<tc>, window_params = [{transform_indices = @transform_0, window_bounds = array<i64: 240, 28>}, {pipeline_mode = #tpu.pipeline_mode<synchronous>, transform_indices = @transform_1, window_bounds = array<i64: 3, 28, 112>}, {pipeline_mode = #tpu.pipeline_mode<synchronous>, transform_indices = @transform_2, window_bounds = array<i64: 1, 112>}, {pipeline_mode = #tpu.pipeline_mode<synchronous>, transform_indices = @transform_3, window_bounds = array<i64: 128, 238>}, {pipeline_mode = #tpu.pipeline_mode<synchronous>, transform_indices = @transform_4, window_bounds = array<i64: 128, 238>}, {pipeline_mode = #tpu.pipeline_mode<synchronous>, transform_indices = @transform_5, window_bounds = array<i64: 112, 56>}, {pipeline_mode = #tpu.pipeline_mode<synchronous>, transform_indices = @transform_6, window_bounds = array<i64: 112, 56>}, {pipeline_mode = #tpu.pipeline_mode<synchronous>, transform_indices = @transform_7, window_bounds = array<i64: 3, 56, 224>}, {pipeline_mode = #tpu.pipeline_mode<synchronous>, transform_indices = @transform_8, window_bounds = array<i64: 1, 224>}, {pipeline_mode = #tpu.pipeline_mode<synchronous>, transform_indices = @transform_9, window_bounds = array<i64: 128, 126>}, {pipeline_mode = #tpu.pipeline_mode<synchronous>, transform_indices = @transform_10, window_bounds = array<i64: 3, 224, 448>}, {pipeline_mode = #tpu.pipeline_mode<synchronous>, transform_indices = @transform_11, window_bounds = array<i64: 1, 448>}, {pipeline_mode = #tpu.pipeline_mode<synchronous>, transform_indices = @transform_12, window_bounds = array<i64: 56, 126>}, {pipeline_mode = #tpu.pipeline_mode<synchronous>, transform_indices = @transform_13, window_bounds = array<i64: 56, 126>}, {pipeline_mode = #tpu.pipeline_mode<synchronous>, transform_indices = @transform_14, window_bounds = array<i64: 448, 224>}, {pipeline_mode = #tpu.pipeline_mode<synchronous>, transform_indices = @transform_15, window_bounds = array<i64: 448, 224>}, {pipeline_mode = #tpu.pipeline_mode<synchronous>, transform_indices = @transform_16, window_bounds = array<i64: 1568, 128>}, {pipeline_mode = #tpu.pipeline_mode<synchronous>, transform_indices = @transform_17, window_bounds = array<i64: 1, 128>}, {pipeline_mode = #tpu.pipeline_mode<synchronous>, transform_indices = @transform_18, window_bounds = array<i64: 128, 64>}, {pipeline_mode = #tpu.pipeline_mode<synchronous>, transform_indices = @transform_19, window_bounds = array<i64: 1, 64>}, {pipeline_mode = #tpu.pipeline_mode<synchronous>, transform_indices = @transform_20, window_bounds = array<i64: 64, 128>}, {pipeline_mode = #tpu.pipeline_mode<synchronous>, transform_indices = @transform_21, window_bounds = array<i64: 1, 128>}, {transform_indices = @transform_22, window_bounds = array<i64: 8, 128>}]} {
    %c0 = arith.constant 0 : index
    %c0_0 = arith.constant 0 : index
    %0 = vector.load %arg1[%c0, %c0_0] : memref<240x28xbf16, #tpu.memory_space<vmem>>, vector<240x28xbf16>
    %1 = vector.extract_strided_slice %0 {offsets = [0, 0], sizes = [238, 28], strides = [1, 1]} : vector<240x28xbf16> to vector<238x28xbf16>
    %c0_1 = arith.constant 0 : index
    %c0_2 = arith.constant 0 : index
    %c0_3 = arith.constant 0 : index
    %2 = vector.load %arg2[%c0_1, %c0_2, %c0_3] : memref<3x28x112xbf16, #tpu.memory_space<vmem>>, vector<1x28x112xbf16>
    %3 = vector.shape_cast %2 : vector<1x28x112xbf16> to vector<28x112xbf16>
    %cst = arith.constant dense<0.000000e+00> : vector<238x112xf32>
    %4 = tpu.matmul %1, %3, %cst {dimension_numbers = #tpu.dot_dimension_numbers<[1], [0], [0], [1], [0, 0, 1, 1], [], []>} : vector<238x28xbf16>, vector<28x112xbf16>, vector<238x112xf32> -> vector<238x112xf32>
    %5 = vector.extract_strided_slice %0 {offsets = [1, 0], sizes = [238, 28], strides = [1, 1]} : vector<240x28xbf16> to vector<238x28xbf16>
    %c1 = arith.constant 1 : index
    %c0_4 = arith.constant 0 : index
    %c0_5 = arith.constant 0 : index
    %6 = vector.load %arg2[%c1, %c0_4, %c0_5] : memref<3x28x112xbf16, #tpu.memory_space<vmem>>, vector<1x28x112xbf16>
    %7 = vector.shape_cast %6 : vector<1x28x112xbf16> to vector<28x112xbf16>
    %cst_6 = arith.constant dense<0.000000e+00> : vector<238x112xf32>
    %8 = tpu.matmul %5, %7, %cst_6 {dimension_numbers = #tpu.dot_dimension_numbers<[1], [0], [0], [1], [0, 0, 1, 1], [], []>} : vector<238x28xbf16>, vector<28x112xbf16>, vector<238x112xf32> -> vector<238x112xf32>
    %9 = arith.addf %4, %8 : vector<238x112xf32>
    %10 = vector.extract_strided_slice %0 {offsets = [2, 0], sizes = [238, 28], strides = [1, 1]} : vector<240x28xbf16> to vector<238x28xbf16>
    %c2 = arith.constant 2 : index
    %c0_7 = arith.constant 0 : index
    %c0_8 = arith.constant 0 : index
    %11 = vector.load %arg2[%c2, %c0_7, %c0_8] : memref<3x28x112xbf16, #tpu.memory_space<vmem>>, vector<1x28x112xbf16>
    %12 = vector.shape_cast %11 : vector<1x28x112xbf16> to vector<28x112xbf16>
    %cst_9 = arith.constant dense<0.000000e+00> : vector<238x112xf32>
    %13 = tpu.matmul %10, %12, %cst_9 {dimension_numbers = #tpu.dot_dimension_numbers<[1], [0], [0], [1], [0, 0, 1, 1], [], []>} : vector<238x28xbf16>, vector<28x112xbf16>, vector<238x112xf32> -> vector<238x112xf32>
    %14 = arith.addf %9, %13 : vector<238x112xf32>
    %c0_10 = arith.constant 0 : index
    %c0_11 = arith.constant 0 : index
    %15 = vector.load %arg3[%c0_10, %c0_11] : memref<1x112xf32, #tpu.memory_space<vmem>>, vector<1x112xf32>
    %16 = vector.broadcast %15 : vector<1x112xf32> to vector<238x112xf32>
    %17 = arith.addf %14, %16 : vector<238x112xf32>
    %cst_12 = arith.constant 0.000000e+00 : f32
    %18 = vector.broadcast %cst_12 : f32 to vector<238x112xf32>
    %19 = arith.maximumf %17, %18 : vector<238x112xf32>
    %20 = arith.truncf %19 : vector<238x112xf32> to vector<238x112xbf16>
    %c0_13 = arith.constant 0 : index
    %c0_14 = arith.constant 0 : index
    %21 = vector.load %arg4[%c0_13, %c0_14] : memref<128x238xbf16, #tpu.memory_space<vmem>>, vector<128x238xbf16>
    %cst_15 = arith.constant dense<0.000000e+00> : vector<128x112xf32>
    %22 = tpu.matmul %21, %20, %cst_15 {dimension_numbers = #tpu.dot_dimension_numbers<[1], [0], [0], [1], [0, 0, 1, 1], [], []>} : vector<128x238xbf16>, vector<238x112xbf16>, vector<128x112xf32> -> vector<128x112xf32>
    %c0_16 = arith.constant 0 : index
    %c0_17 = arith.constant 0 : index
    %23 = vector.load %arg5[%c0_16, %c0_17] : memref<128x238xbf16, #tpu.memory_space<vmem>>, vector<128x238xbf16>
    %cst_18 = arith.constant dense<0.000000e+00> : vector<128x112xf32>
    %24 = tpu.matmul %23, %20, %cst_18 {dimension_numbers = #tpu.dot_dimension_numbers<[1], [0], [0], [1], [0, 0, 1, 1], [], []>} : vector<128x238xbf16>, vector<238x112xbf16>, vector<128x112xf32> -> vector<128x112xf32>
    %25 = arith.maximumf %22, %24 : vector<128x112xf32>
    %26 = arith.truncf %25 : vector<128x112xf32> to vector<128x112xbf16>
    %c0_19 = arith.constant 0 : index
    %c0_20 = arith.constant 0 : index
    %27 = vector.load %arg6[%c0_19, %c0_20] : memref<112x56xbf16, #tpu.memory_space<vmem>>, vector<112x56xbf16>
    %cst_21 = arith.constant dense<0.000000e+00> : vector<128x56xf32>
    %28 = tpu.matmul %26, %27, %cst_21 {dimension_numbers = #tpu.dot_dimension_numbers<[1], [0], [0], [1], [0, 0, 1, 1], [], []>} : vector<128x112xbf16>, vector<112x56xbf16>, vector<128x56xf32> -> vector<128x56xf32>
    %c0_22 = arith.constant 0 : index
    %c0_23 = arith.constant 0 : index
    %29 = vector.load %arg7[%c0_22, %c0_23] : memref<112x56xbf16, #tpu.memory_space<vmem>>, vector<112x56xbf16>
    %cst_24 = arith.constant dense<0.000000e+00> : vector<128x56xf32>
    %30 = tpu.matmul %26, %29, %cst_24 {dimension_numbers = #tpu.dot_dimension_numbers<[1], [0], [0], [1], [0, 0, 1, 1], [], []>} : vector<128x112xbf16>, vector<112x56xbf16>, vector<128x56xf32> -> vector<128x56xf32>
    %31 = arith.maximumf %28, %30 : vector<128x56xf32>
    %32 = arith.truncf %31 : vector<128x56xf32> to vector<128x56xbf16>
    %33 = vector.extract_strided_slice %32 {offsets = [0, 0], sizes = [126, 56], strides = [1, 1]} : vector<128x56xbf16> to vector<126x56xbf16>
    %c0_25 = arith.constant 0 : index
    %c0_26 = arith.constant 0 : index
    %c0_27 = arith.constant 0 : index
    %34 = vector.load %arg8[%c0_25, %c0_26, %c0_27] : memref<3x56x224xbf16, #tpu.memory_space<vmem>>, vector<1x56x224xbf16>
    %35 = vector.shape_cast %34 : vector<1x56x224xbf16> to vector<56x224xbf16>
    %cst_28 = arith.constant dense<0.000000e+00> : vector<126x224xf32>
    %36 = tpu.matmul %33, %35, %cst_28 {dimension_numbers = #tpu.dot_dimension_numbers<[1], [0], [0], [1], [0, 0, 1, 1], [], []>} : vector<126x56xbf16>, vector<56x224xbf16>, vector<126x224xf32> -> vector<126x224xf32>
    %37 = vector.extract_strided_slice %32 {offsets = [1, 0], sizes = [126, 56], strides = [1, 1]} : vector<128x56xbf16> to vector<126x56xbf16>
    %c1_29 = arith.constant 1 : index
    %c0_30 = arith.constant 0 : index
    %c0_31 = arith.constant 0 : index
    %38 = vector.load %arg8[%c1_29, %c0_30, %c0_31] : memref<3x56x224xbf16, #tpu.memory_space<vmem>>, vector<1x56x224xbf16>
    %39 = vector.shape_cast %38 : vector<1x56x224xbf16> to vector<56x224xbf16>
    %cst_32 = arith.constant dense<0.000000e+00> : vector<126x224xf32>
    %40 = tpu.matmul %37, %39, %cst_32 {dimension_numbers = #tpu.dot_dimension_numbers<[1], [0], [0], [1], [0, 0, 1, 1], [], []>} : vector<126x56xbf16>, vector<56x224xbf16>, vector<126x224xf32> -> vector<126x224xf32>
    %41 = arith.addf %36, %40 : vector<126x224xf32>
    %42 = vector.extract_strided_slice %32 {offsets = [2, 0], sizes = [126, 56], strides = [1, 1]} : vector<128x56xbf16> to vector<126x56xbf16>
    %c2_33 = arith.constant 2 : index
    %c0_34 = arith.constant 0 : index
    %c0_35 = arith.constant 0 : index
    %43 = vector.load %arg8[%c2_33, %c0_34, %c0_35] : memref<3x56x224xbf16, #tpu.memory_space<vmem>>, vector<1x56x224xbf16>
    %44 = vector.shape_cast %43 : vector<1x56x224xbf16> to vector<56x224xbf16>
    %cst_36 = arith.constant dense<0.000000e+00> : vector<126x224xf32>
    %45 = tpu.matmul %42, %44, %cst_36 {dimension_numbers = #tpu.dot_dimension_numbers<[1], [0], [0], [1], [0, 0, 1, 1], [], []>} : vector<126x56xbf16>, vector<56x224xbf16>, vector<126x224xf32> -> vector<126x224xf32>
    %46 = arith.addf %41, %45 : vector<126x224xf32>
    %c0_37 = arith.constant 0 : index
    %c0_38 = arith.constant 0 : index
    %47 = vector.load %arg9[%c0_37, %c0_38] : memref<1x224xf32, #tpu.memory_space<vmem>>, vector<1x224xf32>
    %48 = vector.broadcast %47 : vector<1x224xf32> to vector<126x224xf32>
    %49 = arith.addf %46, %48 : vector<126x224xf32>
    %cst_39 = arith.constant 0.000000e+00 : f32
    %50 = vector.broadcast %cst_39 : f32 to vector<126x224xf32>
    %51 = arith.maximumf %49, %50 : vector<126x224xf32>
    %52 = arith.truncf %51 : vector<126x224xf32> to vector<126x224xbf16>
    %c0_40 = arith.constant 0 : index
    %c0_41 = arith.constant 0 : index
    %53 = vector.load %arg10[%c0_40, %c0_41] : memref<128x126xbf16, #tpu.memory_space<vmem>>, vector<128x126xbf16>
    %cst_42 = arith.constant dense<0.000000e+00> : vector<128x224xf32>
    %54 = tpu.matmul %53, %52, %cst_42 {dimension_numbers = #tpu.dot_dimension_numbers<[1], [0], [0], [1], [0, 0, 1, 1], [], []>} : vector<128x126xbf16>, vector<126x224xbf16>, vector<128x224xf32> -> vector<128x224xf32>
    %55 = arith.truncf %54 : vector<128x224xf32> to vector<128x224xbf16>
    %56 = vector.extract_strided_slice %55 {offsets = [0, 0], sizes = [126, 224], strides = [1, 1]} : vector<128x224xbf16> to vector<126x224xbf16>
    %c0_43 = arith.constant 0 : index
    %c0_44 = arith.constant 0 : index
    %c0_45 = arith.constant 0 : index
    %57 = vector.load %arg11[%c0_43, %c0_44, %c0_45] : memref<3x224x448xbf16, #tpu.memory_space<vmem>>, vector<1x224x448xbf16>
    %58 = vector.shape_cast %57 : vector<1x224x448xbf16> to vector<224x448xbf16>
    %cst_46 = arith.constant dense<0.000000e+00> : vector<126x448xf32>
    %59 = tpu.matmul %56, %58, %cst_46 {dimension_numbers = #tpu.dot_dimension_numbers<[1], [0], [0], [1], [0, 0, 1, 1], [], []>} : vector<126x224xbf16>, vector<224x448xbf16>, vector<126x448xf32> -> vector<126x448xf32>
    %60 = vector.extract_strided_slice %55 {offsets = [1, 0], sizes = [126, 224], strides = [1, 1]} : vector<128x224xbf16> to vector<126x224xbf16>
    %c1_47 = arith.constant 1 : index
    %c0_48 = arith.constant 0 : index
    %c0_49 = arith.constant 0 : index
    %61 = vector.load %arg11[%c1_47, %c0_48, %c0_49] : memref<3x224x448xbf16, #tpu.memory_space<vmem>>, vector<1x224x448xbf16>
    %62 = vector.shape_cast %61 : vector<1x224x448xbf16> to vector<224x448xbf16>
    %cst_50 = arith.constant dense<0.000000e+00> : vector<126x448xf32>
    %63 = tpu.matmul %60, %62, %cst_50 {dimension_numbers = #tpu.dot_dimension_numbers<[1], [0], [0], [1], [0, 0, 1, 1], [], []>} : vector<126x224xbf16>, vector<224x448xbf16>, vector<126x448xf32> -> vector<126x448xf32>
    %64 = arith.addf %59, %63 : vector<126x448xf32>
    %65 = vector.extract_strided_slice %55 {offsets = [2, 0], sizes = [126, 224], strides = [1, 1]} : vector<128x224xbf16> to vector<126x224xbf16>
    %c2_51 = arith.constant 2 : index
    %c0_52 = arith.constant 0 : index
    %c0_53 = arith.constant 0 : index
    %66 = vector.load %arg11[%c2_51, %c0_52, %c0_53] : memref<3x224x448xbf16, #tpu.memory_space<vmem>>, vector<1x224x448xbf16>
    %67 = vector.shape_cast %66 : vector<1x224x448xbf16> to vector<224x448xbf16>
    %cst_54 = arith.constant dense<0.000000e+00> : vector<126x448xf32>
    %68 = tpu.matmul %65, %67, %cst_54 {dimension_numbers = #tpu.dot_dimension_numbers<[1], [0], [0], [1], [0, 0, 1, 1], [], []>} : vector<126x224xbf16>, vector<224x448xbf16>, vector<126x448xf32> -> vector<126x448xf32>
    %69 = arith.addf %64, %68 : vector<126x448xf32>
    %c0_55 = arith.constant 0 : index
    %c0_56 = arith.constant 0 : index
    %70 = vector.load %arg12[%c0_55, %c0_56] : memref<1x448xf32, #tpu.memory_space<vmem>>, vector<1x448xf32>
    %71 = vector.broadcast %70 : vector<1x448xf32> to vector<126x448xf32>
    %72 = arith.addf %69, %71 : vector<126x448xf32>
    %cst_57 = arith.constant 0.000000e+00 : f32
    %73 = vector.broadcast %cst_57 : f32 to vector<126x448xf32>
    %74 = arith.maximumf %72, %73 : vector<126x448xf32>
    %75 = arith.truncf %74 : vector<126x448xf32> to vector<126x448xbf16>
    %c0_58 = arith.constant 0 : index
    %c0_59 = arith.constant 0 : index
    %76 = vector.load %arg13[%c0_58, %c0_59] : memref<56x126xbf16, #tpu.memory_space<vmem>>, vector<56x126xbf16>
    %cst_60 = arith.constant dense<0.000000e+00> : vector<56x448xf32>
    %77 = tpu.matmul %76, %75, %cst_60 {dimension_numbers = #tpu.dot_dimension_numbers<[1], [0], [0], [1], [0, 0, 1, 1], [], []>} : vector<56x126xbf16>, vector<126x448xbf16>, vector<56x448xf32> -> vector<56x448xf32>
    %c0_61 = arith.constant 0 : index
    %c0_62 = arith.constant 0 : index
    %78 = vector.load %arg14[%c0_61, %c0_62] : memref<56x126xbf16, #tpu.memory_space<vmem>>, vector<56x126xbf16>
    %cst_63 = arith.constant dense<0.000000e+00> : vector<56x448xf32>
    %79 = tpu.matmul %78, %75, %cst_63 {dimension_numbers = #tpu.dot_dimension_numbers<[1], [0], [0], [1], [0, 0, 1, 1], [], []>} : vector<56x126xbf16>, vector<126x448xbf16>, vector<56x448xf32> -> vector<56x448xf32>
    %80 = arith.maximumf %77, %79 : vector<56x448xf32>
    %81 = arith.truncf %80 : vector<56x448xf32> to vector<56x448xbf16>
    %c0_64 = arith.constant 0 : index
    %c0_65 = arith.constant 0 : index
    %82 = vector.load %arg15[%c0_64, %c0_65] : memref<448x224xbf16, #tpu.memory_space<vmem>>, vector<448x224xbf16>
    %cst_66 = arith.constant dense<0.000000e+00> : vector<56x224xf32>
    %83 = tpu.matmul %81, %82, %cst_66 {dimension_numbers = #tpu.dot_dimension_numbers<[1], [0], [0], [1], [0, 0, 1, 1], [], []>} : vector<56x448xbf16>, vector<448x224xbf16>, vector<56x224xf32> -> vector<56x224xf32>
    %c0_67 = arith.constant 0 : index
    %c0_68 = arith.constant 0 : index
    %84 = vector.load %arg16[%c0_67, %c0_68] : memref<448x224xbf16, #tpu.memory_space<vmem>>, vector<448x224xbf16>
    %cst_69 = arith.constant dense<0.000000e+00> : vector<56x224xf32>
    %85 = tpu.matmul %81, %84, %cst_69 {dimension_numbers = #tpu.dot_dimension_numbers<[1], [0], [0], [1], [0, 0, 1, 1], [], []>} : vector<56x448xbf16>, vector<448x224xbf16>, vector<56x224xf32> -> vector<56x224xf32>
    %86 = arith.maximumf %83, %85 : vector<56x224xf32>
    %87 = arith.truncf %86 : vector<56x224xf32> to vector<56x224xbf16>
    %cst_70 = arith.constant 0.000000e+00 : f32
    %88 = vector.broadcast %cst_70 : f32 to vector<8x128xf32>
    %89 = vector.extract_strided_slice %87 {offsets = [0, 0], sizes = [8, 224], strides = [1, 1]} : vector<56x224xbf16> to vector<8x224xbf16>
    %c0_71 = arith.constant 0 : index
    %c0_72 = arith.constant 0 : index
    %90 = vector.load %arg17[%c0_71, %c0_72] : memref<1568x128xbf16, #tpu.memory_space<vmem>>, vector<224x128xbf16>
    %cst_73 = arith.constant dense<0.000000e+00> : vector<8x128xf32>
    %91 = tpu.matmul %89, %90, %cst_73 {dimension_numbers = #tpu.dot_dimension_numbers<[1], [0], [0], [1], [0, 0, 1, 1], [], []>} : vector<8x224xbf16>, vector<224x128xbf16>, vector<8x128xf32> -> vector<8x128xf32>
    %92 = arith.addf %88, %91 : vector<8x128xf32>
    %93 = vector.extract_strided_slice %87 {offsets = [8, 0], sizes = [8, 224], strides = [1, 1]} : vector<56x224xbf16> to vector<8x224xbf16>
    %c224 = arith.constant 224 : index
    %c0_74 = arith.constant 0 : index
    %94 = vector.load %arg17[%c224, %c0_74] : memref<1568x128xbf16, #tpu.memory_space<vmem>>, vector<224x128xbf16>
    %cst_75 = arith.constant dense<0.000000e+00> : vector<8x128xf32>
    %95 = tpu.matmul %93, %94, %cst_75 {dimension_numbers = #tpu.dot_dimension_numbers<[1], [0], [0], [1], [0, 0, 1, 1], [], []>} : vector<8x224xbf16>, vector<224x128xbf16>, vector<8x128xf32> -> vector<8x128xf32>
    %96 = arith.addf %92, %95 : vector<8x128xf32>
    %97 = vector.extract_strided_slice %87 {offsets = [16, 0], sizes = [8, 224], strides = [1, 1]} : vector<56x224xbf16> to vector<8x224xbf16>
    %c448 = arith.constant 448 : index
    %c0_76 = arith.constant 0 : index
    %98 = vector.load %arg17[%c448, %c0_76] : memref<1568x128xbf16, #tpu.memory_space<vmem>>, vector<224x128xbf16>
    %cst_77 = arith.constant dense<0.000000e+00> : vector<8x128xf32>
    %99 = tpu.matmul %97, %98, %cst_77 {dimension_numbers = #tpu.dot_dimension_numbers<[1], [0], [0], [1], [0, 0, 1, 1], [], []>} : vector<8x224xbf16>, vector<224x128xbf16>, vector<8x128xf32> -> vector<8x128xf32>
    %100 = arith.addf %96, %99 : vector<8x128xf32>
    %101 = vector.extract_strided_slice %87 {offsets = [24, 0], sizes = [8, 224], strides = [1, 1]} : vector<56x224xbf16> to vector<8x224xbf16>
    %c672 = arith.constant 672 : index
    %c0_78 = arith.constant 0 : index
    %102 = vector.load %arg17[%c672, %c0_78] : memref<1568x128xbf16, #tpu.memory_space<vmem>>, vector<224x128xbf16>
    %cst_79 = arith.constant dense<0.000000e+00> : vector<8x128xf32>
    %103 = tpu.matmul %101, %102, %cst_79 {dimension_numbers = #tpu.dot_dimension_numbers<[1], [0], [0], [1], [0, 0, 1, 1], [], []>} : vector<8x224xbf16>, vector<224x128xbf16>, vector<8x128xf32> -> vector<8x128xf32>
    %104 = arith.addf %100, %103 : vector<8x128xf32>
    %105 = vector.extract_strided_slice %87 {offsets = [32, 0], sizes = [8, 224], strides = [1, 1]} : vector<56x224xbf16> to vector<8x224xbf16>
    %c896 = arith.constant 896 : index
    %c0_80 = arith.constant 0 : index
    %106 = vector.load %arg17[%c896, %c0_80] : memref<1568x128xbf16, #tpu.memory_space<vmem>>, vector<224x128xbf16>
    %cst_81 = arith.constant dense<0.000000e+00> : vector<8x128xf32>
    %107 = tpu.matmul %105, %106, %cst_81 {dimension_numbers = #tpu.dot_dimension_numbers<[1], [0], [0], [1], [0, 0, 1, 1], [], []>} : vector<8x224xbf16>, vector<224x128xbf16>, vector<8x128xf32> -> vector<8x128xf32>
    %108 = arith.addf %104, %107 : vector<8x128xf32>
    %109 = vector.extract_strided_slice %87 {offsets = [40, 0], sizes = [8, 224], strides = [1, 1]} : vector<56x224xbf16> to vector<8x224xbf16>
    %c1120 = arith.constant 1120 : index
    %c0_82 = arith.constant 0 : index
    %110 = vector.load %arg17[%c1120, %c0_82] : memref<1568x128xbf16, #tpu.memory_space<vmem>>, vector<224x128xbf16>
    %cst_83 = arith.constant dense<0.000000e+00> : vector<8x128xf32>
    %111 = tpu.matmul %109, %110, %cst_83 {dimension_numbers = #tpu.dot_dimension_numbers<[1], [0], [0], [1], [0, 0, 1, 1], [], []>} : vector<8x224xbf16>, vector<224x128xbf16>, vector<8x128xf32> -> vector<8x128xf32>
    %112 = arith.addf %108, %111 : vector<8x128xf32>
    %113 = vector.extract_strided_slice %87 {offsets = [48, 0], sizes = [8, 224], strides = [1, 1]} : vector<56x224xbf16> to vector<8x224xbf16>
    %c1344 = arith.constant 1344 : index
    %c0_84 = arith.constant 0 : index
    %114 = vector.load %arg17[%c1344, %c0_84] : memref<1568x128xbf16, #tpu.memory_space<vmem>>, vector<224x128xbf16>
    %cst_85 = arith.constant dense<0.000000e+00> : vector<8x128xf32>
    %115 = tpu.matmul %113, %114, %cst_85 {dimension_numbers = #tpu.dot_dimension_numbers<[1], [0], [0], [1], [0, 0, 1, 1], [], []>} : vector<8x224xbf16>, vector<224x128xbf16>, vector<8x128xf32> -> vector<8x128xf32>
    %116 = arith.addf %112, %115 : vector<8x128xf32>
    %c0_86 = arith.constant 0 : index
    %c0_87 = arith.constant 0 : index
    %117 = vector.load %arg18[%c0_86, %c0_87] : memref<1x128xf32, #tpu.memory_space<vmem>>, vector<1x128xf32>
    %118 = vector.broadcast %117 : vector<1x128xf32> to vector<8x128xf32>
    %119 = arith.addf %116, %118 : vector<8x128xf32>
    %cst_88 = arith.constant 0.000000e+00 : f32
    %120 = vector.broadcast %cst_88 : f32 to vector<8x128xf32>
    %121 = arith.maximumf %119, %120 : vector<8x128xf32>
    %122 = arith.truncf %121 : vector<8x128xf32> to vector<8x128xbf16>
    %c0_89 = arith.constant 0 : index
    %c0_90 = arith.constant 0 : index
    %123 = vector.load %arg19[%c0_89, %c0_90] : memref<128x64xbf16, #tpu.memory_space<vmem>>, vector<128x64xbf16>
    %cst_91 = arith.constant dense<0.000000e+00> : vector<8x64xf32>
    %124 = tpu.matmul %122, %123, %cst_91 {dimension_numbers = #tpu.dot_dimension_numbers<[1], [0], [0], [1], [0, 0, 1, 1], [], []>} : vector<8x128xbf16>, vector<128x64xbf16>, vector<8x64xf32> -> vector<8x64xf32>
    %c0_92 = arith.constant 0 : index
    %c0_93 = arith.constant 0 : index
    %125 = vector.load %arg20[%c0_92, %c0_93] : memref<1x64xf32, #tpu.memory_space<vmem>>, vector<1x64xf32>
    %126 = vector.broadcast %125 : vector<1x64xf32> to vector<8x64xf32>
    %127 = arith.addf %124, %126 : vector<8x64xf32>
    %cst_94 = arith.constant 0.000000e+00 : f32
    %128 = vector.broadcast %cst_94 : f32 to vector<8x64xf32>
    %129 = arith.maximumf %127, %128 : vector<8x64xf32>
    %130 = arith.truncf %129 : vector<8x64xf32> to vector<8x64xbf16>
    %c0_95 = arith.constant 0 : index
    %c0_96 = arith.constant 0 : index
    %131 = vector.load %arg21[%c0_95, %c0_96] : memref<64x128xbf16, #tpu.memory_space<vmem>>, vector<64x128xbf16>
    %cst_97 = arith.constant dense<0.000000e+00> : vector<8x128xf32>
    %132 = tpu.matmul %130, %131, %cst_97 {dimension_numbers = #tpu.dot_dimension_numbers<[1], [0], [0], [1], [0, 0, 1, 1], [], []>} : vector<8x64xbf16>, vector<64x128xbf16>, vector<8x128xf32> -> vector<8x128xf32>
    %c0_98 = arith.constant 0 : index
    %c0_99 = arith.constant 0 : index
    %133 = vector.load %arg22[%c0_98, %c0_99] : memref<1x128xf32, #tpu.memory_space<vmem>>, vector<1x128xf32>
    %134 = vector.broadcast %133 : vector<1x128xf32> to vector<8x128xf32>
    %135 = arith.addf %132, %134 : vector<8x128xf32>
    %c0_100 = arith.constant 0 : index
    %c0_101 = arith.constant 0 : index
    %136 = vector.load %arg23[%c0_100, %c0_101] : memref<8x128xf32, #tpu.memory_space<vmem>>, vector<8x128xf32>
    tpu.vector_store %arg23[%c0_100, %c0_101], %135 {strides = array<i32>} : memref<8x128xf32, #tpu.memory_space<vmem>>, vector<8x128xf32>,
    return
  }
  func.func @transform_0(%arg0: i32) -> (i32, i32) {
    %c0_i32 = arith.constant 0 : i32
    %c0_i32_0 = arith.constant 0 : i32
    return %arg0, %c0_i32 : i32, i32
  }
  func.func @transform_1(%arg0: i32) -> (i32, i32, i32) {
    %c0_i32 = arith.constant 0 : i32
    %c0_i32_0 = arith.constant 0 : i32
    %c0_i32_1 = arith.constant 0 : i32
    %c0_i32_2 = arith.constant 0 : i32
    return %c0_i32, %c0_i32_0, %c0_i32_1 : i32, i32, i32
  }
  func.func @transform_2(%arg0: i32) -> (i32, i32) {
    %c0_i32 = arith.constant 0 : i32
    %c0_i32_0 = arith.constant 0 : i32
    %c0_i32_1 = arith.constant 0 : i32
    return %c0_i32, %c0_i32_0 : i32, i32
  }
  func.func @transform_3(%arg0: i32) -> (i32, i32) {
    %c0_i32 = arith.constant 0 : i32
    %c0_i32_0 = arith.constant 0 : i32
    %c0_i32_1 = arith.constant 0 : i32
    return %c0_i32, %c0_i32_0 : i32, i32
  }
  func.func @transform_4(%arg0: i32) -> (i32, i32) {
    %c0_i32 = arith.constant 0 : i32
    %c0_i32_0 = arith.constant 0 : i32
    %c0_i32_1 = arith.constant 0 : i32
    return %c0_i32, %c0_i32_0 : i32, i32
  }
  func.func @transform_5(%arg0: i32) -> (i32, i32) {
    %c0_i32 = arith.constant 0 : i32
    %c0_i32_0 = arith.constant 0 : i32
    %c0_i32_1 = arith.constant 0 : i32
    return %c0_i32, %c0_i32_0 : i32, i32
  }
  func.func @transform_6(%arg0: i32) -> (i32, i32) {
    %c0_i32 = arith.constant 0 : i32
    %c0_i32_0 = arith.constant 0 : i32
    %c0_i32_1 = arith.constant 0 : i32
    return %c0_i32, %c0_i32_0 : i32, i32
  }
  func.func @transform_7(%arg0: i32) -> (i32, i32, i32) {
    %c0_i32 = arith.constant 0 : i32
    %c0_i32_0 = arith.constant 0 : i32
    %c0_i32_1 = arith.constant 0 : i32
    %c0_i32_2 = arith.constant 0 : i32
    return %c0_i32, %c0_i32_0, %c0_i32_1 : i32, i32, i32
  }
  func.func @transform_8(%arg0: i32) -> (i32, i32) {
    %c0_i32 = arith.constant 0 : i32
    %c0_i32_0 = arith.constant 0 : i32
    %c0_i32_1 = arith.constant 0 : i32
    return %c0_i32, %c0_i32_0 : i32, i32
  }
  func.func @transform_9(%arg0: i32) -> (i32, i32) {
    %c0_i32 = arith.constant 0 : i32
    %c0_i32_0 = arith.constant 0 : i32
    %c0_i32_1 = arith.constant 0 : i32
    return %c0_i32, %c0_i32_0 : i32, i32
  }
  func.func @transform_10(%arg0: i32) -> (i32, i32, i32) {
    %c0_i32 = arith.constant 0 : i32
    %c0_i32_0 = arith.constant 0 : i32
    %c0_i32_1 = arith.constant 0 : i32
    %c0_i32_2 = arith.constant 0 : i32
    return %c0_i32, %c0_i32_0, %c0_i32_1 : i32, i32, i32
  }
  func.func @transform_11(%arg0: i32) -> (i32, i32) {
    %c0_i32 = arith.constant 0 : i32
    %c0_i32_0 = arith.constant 0 : i32
    %c0_i32_1 = arith.constant 0 : i32
    return %c0_i32, %c0_i32_0 : i32, i32
  }
  func.func @transform_12(%arg0: i32) -> (i32, i32) {
    %c0_i32 = arith.constant 0 : i32
    %c0_i32_0 = arith.constant 0 : i32
    %c0_i32_1 = arith.constant 0 : i32
    return %c0_i32, %c0_i32_0 : i32, i32
  }
  func.func @transform_13(%arg0: i32) -> (i32, i32) {
    %c0_i32 = arith.constant 0 : i32
    %c0_i32_0 = arith.constant 0 : i32
    %c0_i32_1 = arith.constant 0 : i32
    return %c0_i32, %c0_i32_0 : i32, i32
  }
  func.func @transform_14(%arg0: i32) -> (i32, i32) {
    %c0_i32 = arith.constant 0 : i32
    %c0_i32_0 = arith.constant 0 : i32
    %c0_i32_1 = arith.constant 0 : i32
    return %c0_i32, %c0_i32_0 : i32, i32
  }
  func.func @transform_15(%arg0: i32) -> (i32, i32) {
    %c0_i32 = arith.constant 0 : i32
    %c0_i32_0 = arith.constant 0 : i32
    %c0_i32_1 = arith.constant 0 : i32
    return %c0_i32, %c0_i32_0 : i32, i32
  }
  func.func @transform_16(%arg0: i32) -> (i32, i32) {
    %c0_i32 = arith.constant 0 : i32
    %c0_i32_0 = arith.constant 0 : i32
    %c0_i32_1 = arith.constant 0 : i32
    return %c0_i32, %c0_i32_0 : i32, i32
  }
  func.func @transform_17(%arg0: i32) -> (i32, i32) {
    %c0_i32 = arith.constant 0 : i32
    %c0_i32_0 = arith.constant 0 : i32
    %c0_i32_1 = arith.constant 0 : i32
    return %c0_i32, %c0_i32_0 : i32, i32
  }
  func.func @transform_18(%arg0: i32) -> (i32, i32) {
    %c0_i32 = arith.constant 0 : i32
    %c0_i32_0 = arith.constant 0 : i32
    %c0_i32_1 = arith.constant 0 : i32
    return %c0_i32, %c0_i32_0 : i32, i32
  }
  func.func @transform_19(%arg0: i32) -> (i32, i32) {
    %c0_i32 = arith.constant 0 : i32
    %c0_i32_0 = arith.constant 0 : i32
    %c0_i32_1 = arith.constant 0 : i32
    return %c0_i32, %c0_i32_0 : i32, i32
  }
  func.func @transform_20(%arg0: i32) -> (i32, i32) {
    %c0_i32 = arith.constant 0 : i32
    %c0_i32_0 = arith.constant 0 : i32
    %c0_i32_1 = arith.constant 0 : i32
    return %c0_i32, %c0_i32_0 : i32, i32
  }
  func.func @transform_21(%arg0: i32) -> (i32, i32) {
    %c0_i32 = arith.constant 0 : i32
    %c0_i32_0 = arith.constant 0 : i32
    %c0_i32_1 = arith.constant 0 : i32
    return %c0_i32, %c0_i32_0 : i32, i32
  }
  func.func @transform_22(%arg0: i32) -> (i32, i32) {
    %c0_i32 = arith.constant 0 : i32
    %c0_i32_0 = arith.constant 0 : i32
    return %arg0, %c0_i32 : i32, i32
  }
}

</mosaic_0001>

<bundles_post_ra>
// kernel: nn2_forward.1
= control target key start
LH: loop header
LB: loop body
LE: loop exit
PB: predicated region body
PF: predicated region fallthrough
CT: control target
= control target key end

     0   :  { %s14069_s0 = inlined_call_operand.vmem [shape: bf16[480,28], index: 0, kind: input, shape index: {}]   ;;  %s14070_s1 = inlined_call_operand.hbm [shape: bf16[3,28,112], index: 1, kind: input, shape index: {}]   ;;  %s14071_s2 = inlined_call_operand.vmem [shape: f32[1,112], index: 2, kind: input, shape index: {}]   ;;  %s14072_s3 = inlined_call_operand.vmem [shape: bf16[128,238], index: 3, kind: input, shape index: {}]   ;;  %s14073_s4 = inlined_call_operand.vmem [shape: bf16[128,238], index: 4, kind: input, shape index: {}]   ;;  %s14074_s5 = inlined_call_operand.vmem [shape: bf16[112,56], index: 5, kind: input, shape index: {}]   ;;  %s14075_s6 = inlined_call_operand.vmem [shape: bf16[112,56], index: 6, kind: input, shape index: {}]   ;;  %s14076_s7 = inlined_call_operand.vmem [shape: bf16[3,56,224], index: 7, kind: input, shape index: {}]   ;;  %s14077_s8 = inlined_call_operand.vmem [shape: f32[1,224], index: 8, kind: input, shape index: {}]   ;;  %s14078_s9 = inlined_call_operand.vmem [shape: bf16[128,126], index: 9, kind: input, shape index: {}]   ;;  %s14079_s10 = inlined_call_operand.vmem [shape: bf16[3,224,448], index: 10, kind: input, shape index: {}]   ;;  %s14080_s11 = inlined_call_operand.vmem [shape: f32[1,448], index: 11, kind: input, shape index: {}]   ;;  %s14081_s12 = inlined_call_operand.hbm [shape: bf16[56,126], index: 12, kind: input, shape index: {}]   ;;  %s14082_s13 = inlined_call_operand.hbm [shape: bf16[56,126], index: 13, kind: input, shape index: {}]   ;;  %s14083_s14 = inlined_call_operand.vmem [shape: bf16[448,224], index: 14, kind: input, shape index: {}]   ;;  %s14084_s15 = inlined_call_operand.hbm [shape: bf16[448,224], index: 15, kind: input, shape index: {}]   ;;  %s14085_s16 = inlined_call_operand.vmem [shape: bf16[1568,128], index: 16, kind: input, shape index: {}]   ;;  %s14086_s17 = inlined_call_operand.vmem [shape: f32[1,128], index: 17, kind: input, shape index: {}]   ;;  %s14087_s18 = inlined_call_operand.vmem [shape: bf16[128,64], index: 18, kind: input, shape index: {}]   ;;  %s14088_s19 = inlined_call_operand.vmem [shape: f32[1,64], index: 19, kind: input, shape index: {}]   ;;  %s14089_s20 = inlined_call_operand.hbm [shape: bf16[64,128], index: 20, kind: input, shape index: {}]   ;;  %s14090_s21 = inlined_call_operand.vmem [shape: f32[1,128], index: 21, kind: input, shape index: {}]   ;;  %s14091_s22 = inlined_call_operand.hbm [shape: f32[16,128], index: 22, kind: output, shape index: {}]  }
   0x1   :  { %14114 = sst [smem:[#allocation24_spill]] %s14069_s0 }
   0x2   :  { %14115 = sst [smem:[#allocation25_spill]] %s14070_s1 }
   0x3   :  { %14116 = sst [smem:[#allocation26_spill]] %s14071_s2 }
   0x4   :  { %14117 = sst [smem:[#allocation27_spill]] %s14072_s3 }
   0x5   :  { %14118 = sst [smem:[#allocation28_spill]] %s14073_s4 }
   0x6   :  { %14119 = sst [smem:[#allocation29_spill]] %s14074_s5 }
   0x7   :  { %14120 = sst [smem:[#allocation30_spill]] %s14075_s6 }
   0x8   :  { %14121 = sst [smem:[#allocation31_spill]] %s14081_s12 }
   0x9   :  { %14122 = sst [smem:[#allocation32_spill]] %s14086_s17 }
   0xa   :  { %14123 = sst [smem:[#allocation33_spill]] %s14088_s19 }
   0xb   :  { %14124 = sst [smem:[#allocation34_spill]] %s14090_s21 }
   0xc   :  { %14125 = sst [smem:[#allocation35_spill]] %s14091_s22 }
   0xd   :  { %27 = vsyncpa [#allocation3], 0 }
   0xe   :  { %28 = vsyncpa [#allocation6], 0 }
   0xf   :  { %29 = vsyncpa [#allocation9], 0 }
  0x10   :  { %30 = vsyncpa [#allocation4], 0 }
  0x11   :  { %32 = vsyncpa [#allocation4 + $0x1], 0  ;;  %s11117_s3 = smov 0   ;;  %s11119_s28 = smov 0  }
  0x12   :  { %s11121_s29 = smov 0   ;;  %s11123_s30 = smov 0  }
  0x13 LB: > { %14126 = sst [smem:[#allocation16_spill]] %s10975_s3  ;;  %s11138_s4 = sadd.s32 4294967295, %s10987_s30   ;;  %s10987_s30 = sphi %s11123_s30, %s14168_s30   ;;  %s10983_s29 = sphi %s11121_s29, %s14171_s29   ;;  %s10979_s28 = sphi %s11119_s28, %s14170_s28   ;;  %s10975_s3 = sphi %s11117_s3, %s14169_s3  }
  0x14   : > { %14127 = sst [smem:[#allocation17_spill]] %s10979_s28  ;;  %s8567_s0 = sadd.s32 4294967294, %s10987_s30  }
  0x15   : > { %14128 = sst [smem:[#allocation18_spill]] %s10983_s29  ;;  %s11142_s23 = sadd.s32 1, %s10987_s30  }
  0x16   : > { %14129 = sst [smem:[#allocation19_spill]] %s10987_s30  ;;  %s512_s1 = sadd.s32 1, %s10983_s29 }
  0x17   : > { %14130 = sst [smem:[#allocation20_spill]] %s11142_s23  ;;  %s509_s5 = ssub.s32 %s10987_s30, %s11142_s23 }
  0x18   : > { %p522_p0 = scmp.ne.s32.totalorder %s10983_s29, %s10979_s28  ;;  %p510_p1 = scmp.eq.s32.totalorder %s509_s5, 0 }
  0x19   : > { %p523_p2 = scmp.eq.s32.totalorder %s11138_s4, 1  ;;  %p528_p3 = scmp.ne.s32.totalorder %s10979_s28, %s10975_s3 }
  0x1a   : > { %p529_p4 = scmp.eq.s32.totalorder %s8567_s0, 1  ;;  %p8568_p7 = scmp.ge.s32.totalorder %s10987_s30, 1 }
  0x1b   : > { %s11153_s24 = scalar_select %p510_p1, %s10983_s29, %s512_s1  }
  0x1c   : > { %p11155_p5 = por %p523_p2, %p522_p0  ;;  %p11159_p6 = por %p529_p4, %p528_p3 }
  0x1d   : > { %14131 = sst [smem:[#allocation21_spill]] %s11153_s24  ;;  %p536_p8 = scmp.lt.s32.totalorder %s10987_s30, 3 }
  0x1e   : > { %s14132_s6 = scalar_select %p11155_p5, 1, 0 }
  0x1f   : > { %s14134_s25 = scalar_select %p11159_p6, 1, 0 }
  0x20   : > { %14133 = sst [smem:[#allocation22_spill]] %s14132_s6  ;;  %p14103_p9 = scmp.eq.s32.totalorder %s11138_s4, 0 }
  0x21   : > { %14135 = sst [smem:[#allocation23_spill]] %s14134_s25  ;;  %p11166_p10 = pnand %p8568_p7, %p536_p8 }
  0x22   : > { %s10989_s2 = smov [#allocation5]   ;;  %s10990_s1 = smov [#allocation8]  }
  0x23   : > { %s14136_s26 = scalar_select %p11166_p10, 1, 0 }
  0x24   : > { %p10036_p11 = pneg %p11166_p10  ;;  %s591_s27 = sshll.u32 %s10989_s2, 4  ;;  %s592_s27 = int_to_ptr.vmem [resolvable:$true] %s591_s27 }
  0x25   : > { %s620_s5 = sshll.u32 %s10990_s1, 4  ;;  %s14138_s12 = sld [smem:[#allocation31_spill]]  ;;  %s11178_s5 = int_to_ptr.vmem [resolvable:$true] %s620_s5 }
  0x26   : > { %p11174_p12 = pnand %p14103_p9, %p10036_p11 }
  0x28   : > { %p11188_p0 = pneg %p11174_p12 }
  0x2b   : > { %s10773_s23 = scalar_lea.hbm %s14138_s12, 448 }
  0x2c   : > { %p10774_p13 = scmp.ne.s32.totalorder %s14138_s12, %s10773_s23  ;;  %p10780_p3 = scmp.lt.u32.totalorder %s10773_s23, %s14138_s12 }
  0x2e   : > { %p10776_p1 = pnand %p11188_p0, %p10774_p13 }
  0x30   : > { %p10777_p2 = pneg %p10776_p1 }
  0x32   : > { %p10782_p4 = pnand %p10780_p3, %p10777_p2 }
  0x34   : > { %10785 = shalt.err (!%p10782_p4)
}
  0x35   : > { %s10786_s29 = scalar_lea.vmem %s592_s27, 448  ;;  %p10794_p9 = scmp.lt.s32.totalorder %s592_s27, %s592_s27 }
  0x36   : > { %p10787_p7 = scmp.ne.s32.totalorder %s592_s27, %s10786_s29  ;;  %p10795_p6 = scmp.lt.s32.totalorder %s10786_s29, %s10786_s29 }
  0x38   : > { %p10789_p8 = pnand %p10787_p7, %p11188_p0  ;;  %p10796_p5 = por %p10795_p6, %p10794_p9 }
  0x3a   : > { %p10790_p11 = pneg %p10789_p8 }
  0x3c   : > { %p10797_p10 = pnand %p10796_p5, %p10790_p11 }
  0x3e   : > { %10800 = shalt.err (!%p10797_p10)
}
  0x3f   : > { %s14109_s3 = smov 64   ;;  %s14111_s24 = smov 4  }
  0x40   : > { %10042 = dma.hbm_to_vmem [thread:$0]  (!%p11174_p12), %s14138_s12, 448, %s592_s27, [#allocation6], %s14109_s3, %s14109_s3, %s14111_s24  }
  0x41   : > { %s10801_s22 = scalar_lea.hbm %s14084_s15, 7168 }
  0x42   : > { %p10802_p5 = scmp.ne.s32.totalorder %s14084_s15, %s10801_s22  ;;  %p10808_p10 = scmp.lt.u32.totalorder %s10801_s22, %s14084_s15 }
  0x44   : > { %p10804_p6 = pnand %p10802_p5, %p11188_p0 }
  0x46   : > { %p10805_p9 = pneg %p10804_p6 }
  0x48   : > { %p10810_p13 = pnand %p10808_p10, %p10805_p9 }
  0x4a   : > { %10813 = shalt.err (!%p10810_p13)
}
  0x4b   : > { %s10814_s27 = scalar_lea.vmem %s11178_s5, 7168  ;;  %p10822_p4 = scmp.lt.s32.totalorder %s11178_s5, %s11178_s5 }
  0x4c   : > { %p10815_p1 = scmp.ne.s32.totalorder %s11178_s5, %s10814_s27  ;;  %p10823_p7 = scmp.lt.s32.totalorder %s10814_s27, %s10814_s27 }
  0x4e   : > { %p10817_p2 = pnand %p10815_p1, %p11188_p0  ;;  %p10824_p8 = por %p10823_p7, %p10822_p4 }
  0x50   : > { %p10818_p3 = pneg %p10817_p2 }
  0x52   : > { %p10825_p11 = pnand %p10824_p8, %p10818_p3 }
  0x54   : > { %10828 = shalt.err (!%p10825_p11)
}
  0x55   : > { %s10993_s6 = smov 128   ;;  %s10994_s19 = smov 8  }
  0x56   : > { %10048 = dma.hbm_to_vmem [thread:$0]  (!%p11174_p12), %s14084_s15, 7168, %s11178_s5, [#allocation9], %s10993_s6, %s10993_s6, %s10994_s19  }
  0x57   : > { %s10995_s30 = smov [#allocation2]   ;;  %s10996_s25 = smov [#allocation7]  }
  0x58   : > { %s548_s23 = sshll.u32 %s10995_s30, 4  ;;  %s604_s1 = sshll.u32 %s10996_s25, 4  ;;  %s549_s23 = int_to_ptr.vmem [resolvable:$true] %s548_s23  ;;  %s11230_s1 = int_to_ptr.vmem [resolvable:$true] %s604_s1 }
  0x59   : > { %s14140_s3 = sld [smem:[#allocation25_spill]] }
  0x5f   : > { %s14141_s24 = smov %s14140_s3  ;;  %s10829_s12 = scalar_lea.hbm %s14140_s3, 768 }
  0x60   : > { %p10830_p5 = scmp.ne.s32.totalorder %s14141_s24, %s10829_s12  ;;  %p10836_p10 = scmp.lt.u32.totalorder %s10829_s12, %s14141_s24 }
  0x62   : > { %p10832_p6 = pnand %p10830_p5, %p11188_p0 }
  0x64   : > { %p10833_p9 = pneg %p10832_p6 }
  0x66   : > { %p10838_p13 = pnand %p10836_p10, %p10833_p9 }
  0x68   : > { %10841 = shalt.err (!%p10838_p13)
}
  0x69   : > { %s10842_s6 = scalar_lea.vmem %s549_s23, 768  ;;  %p10850_p4 = scmp.lt.s32.totalorder %s549_s23, %s549_s23 }
  0x6a   : > { %p10843_p1 = scmp.ne.s32.totalorder %s549_s23, %s10842_s6  ;;  %p10851_p7 = scmp.lt.s32.totalorder %s10842_s6, %s10842_s6 }
  0x6c   : > { %p10845_p2 = pnand %p10843_p1, %p11188_p0  ;;  %p10852_p8 = por %p10851_p7, %p10850_p4 }
  0x6e   : > { %p10846_p3 = pneg %p10845_p2 }
  0x70   : > { %p10853_p11 = pnand %p10852_p8, %p10846_p3 }
  0x72   : > { %10856 = shalt.err (!%p10853_p11)
}
  0x73   : > { %s14142_s17 = smov 4   ;;  %s14143_s28 = smov 64  }
  0x74   : > { %10039 = dma.hbm_to_vmem [thread:$0]  (!%p11174_p12), %s14141_s24, 768, %s549_s23, [#allocation3], %s14143_s28, %s14143_s28, %s14142_s17  }
  0x75   : > { %s10857_s30 = scalar_lea.hbm %s14082_s13, 448 }
  0x76   : > { %p10858_p5 = scmp.ne.s32.totalorder %s14082_s13, %s10857_s30  ;;  %p10864_p10 = scmp.lt.u32.totalorder %s10857_s30, %s14082_s13 }
  0x78   : > { %p10860_p6 = pnand %p10858_p5, %p11188_p0 }
  0x7a   : > { %p10861_p9 = pneg %p10860_p6 }
  0x7c   : > { %p10866_p13 = pnand %p10864_p10, %p10861_p9 }
  0x7e   : > { %10869 = shalt.err (!%p10866_p13)
}
  0x7f   : > { %s10870_s23 = scalar_lea.vmem %s11230_s1, 448  ;;  %p10878_p4 = scmp.lt.s32.totalorder %s11230_s1, %s11230_s1 }
  0x80   : > { %p10871_p1 = scmp.ne.s32.totalorder %s11230_s1, %s10870_s23  ;;  %p10879_p7 = scmp.lt.s32.totalorder %s10870_s23, %s10870_s23 }
  0x82   : > { %p10873_p2 = pnand %p10871_p1, %p11188_p0  ;;  %p10880_p8 = por %p10879_p7, %p10878_p4 }
  0x84   : > { %p10874_p3 = pneg %p10873_p2 }
  0x86   : > { %p10881_p11 = pnand %p10880_p8, %p10874_p3 }
  0x88   : > { %10884 = shalt.err (!%p10881_p11)
}
  0x89   : > { %10045 = dma.hbm_to_vmem [thread:$0]  (!%p11174_p12), %s14082_s13, 448, %s11230_s1, [#allocation6], %s14143_s28, %s14143_s28, %s14142_s17  }
  0x8a   : > { %s10997_s3 = smov [#allocation10]   ;;  %s10885_s30 = scalar_lea.hbm %s14089_s20, 512 }
  0x8b   : > { %s645_s12 = sshll.u32 %s10997_s3, 4  ;;  %p10886_p5 = scmp.ne.s32.totalorder %s14089_s20, %s10885_s30  ;;  %s646_s12 = int_to_ptr.vmem [resolvable:$true] %s645_s12 }
  0x8c   : > { %p10892_p10 = scmp.lt.u32.totalorder %s10885_s30, %s14089_s20 }
  0x8d   : > { %p10888_p6 = pnand %p10886_p5, %p11188_p0 }
  0x8f   : > { %p10889_p9 = pneg %p10888_p6 }
  0x91   : > { %p10894_p13 = pnand %p10892_p10, %p10889_p9 }
  0x93   : > { %10897 = shalt.err (!%p10894_p13)
}
  0x94   : > { %s10898_s1 = scalar_lea.vmem %s646_s12, 512  ;;  %p10906_p4 = scmp.lt.s32.totalorder %s646_s12, %s646_s12 }
  0x95   : > { %p10899_p1 = scmp.ne.s32.totalorder %s646_s12, %s10898_s1  ;;  %p10907_p7 = scmp.lt.s32.totalorder %s10898_s1, %s10898_s1 }
  0x97   : > { %p10901_p2 = pnand %p10899_p1, %p11188_p0  ;;  %p10908_p8 = por %p10907_p7, %p10906_p4 }
  0x99   : > { %p10902_p3 = pneg %p10901_p2 }
  0x9b   : > { %p10909_p11 = pnand %p10908_p8, %p10902_p3 }
  0x9d   : > { %10912 = shalt.err (!%p10909_p11)
}
  0x9e   : > { %10051 = dma.hbm_to_vmem [thread:$0]  (!%p11174_p12), %s14089_s20, 512, %s646_s12, [#allocation9], %s14143_s28, %s14143_s28, %s14142_s17  }
  0x9f   : > { %p14144_p5 = scmp.ne.s32.totalorder %s14136_s26, 0 }
  0xa0   : > { %p14145_p0 = scmp.eq.s32.totalorder (!%p14144_p5), %s11138_s4, 0 }
  0xa1   : > { %673 = sbr.rel (%p14144_p5) target bundleno = 3770 (0xeba), region = 108 }
  0xa8   : > { %10958 = dma.done.wait (%p14145_p0), [#allocation3], 768   ;;  %p14146_p6 = pmov %p14145_p0 }
  0xa9   : > { %p14147_p9 = pmov %p14145_p0 }
  0xaa   : > { %10960 = vsyncadd (%p14146_p6), [#allocation3], 4294966528 }
  0xab   : > { %10962 = dma.done.wait (%p14147_p9), [#allocation6], 896   ;;  %p14148_p10 = pmov %p14145_p0 }
  0xac   : > { %p14149_p13 = pmov %p14145_p0 }
  0xad   : > { %10964 = vsyncadd (%p14148_p10), [#allocation6], 4294966400 }
  0xae   : > { %10966 = dma.done.wait (%p14149_p13), [#allocation9], 7680   ;;  %p14150_p12 = pmov %p14145_p0 }
  0xaf   : > { %s751_s26 = smul.u32 30, %s11138_s4  ;;  %v10998_v0 = vmov 0.0   ;;  %vm10999_vm0 = vmmov 0   ;;  %v10111_v1 = vld [vmem:[#allocation2 + $0x10] sm:$0xff]   ;;  %v10112_v2 = vld [vmem:[#allocation2] sm:$0xff]   ;;  %vm1049_vm1 = vcmask 1045504  }
  0xb0   : > { %10968 = vsyncadd (%p14150_p12), [#allocation9], 4294959616  ;;  %9506 = vmatprep.subr.bf16.mxu0 %v10998_v0  ;;  %9570 = vmatprep.subr.bf16.mxu1 %v10998_v0  ;;  %s14151_s28 = sld [smem:[#allocation24_spill]]  ;;  %v10113_v3 = vld [vmem:[#allocation2 + $0x18] sm:$0x3f]   ;;  %vm1003_vm2 = vcmask 228352  }
  0xb1   : > { %9510 = vmatprep.mubr.msk.bf16.mxu0 %vm10999_vm0, %v10998_v0  ;;  %9574 = vmatprep.mubr.msk.bf16.mxu1 %vm10999_vm0, %v10998_v0  ;;  %p752_p1 = scmp.lt.s32.totalorder %s751_s26, 59  ;;  %v10114_v4 = vld [vmem:[#allocation2 + $0x8] sm:$0x3f]   ;;  %v1051_v5 = vsel %vm1049_vm1, %v10113_v3, 0  ;;  %vm872_vm3 = vsmask.f32 7424 }
  0xb2   : > { %9507 = vmatpush3.bf16.msra.mxu0 %v10111_v1  ;;  %9571 = vmatpush3.bf16.msra.mxu1 %v10112_v2  ;;  %v1248_v7 = vsel %vm1049_vm1, %v10114_v4, 0  ;;  %v10117_v16 = vld [vmem:[#allocation2 + $0x20] sm:$0xff]   ;;  %v10126_v26 = vld [vmem:[#allocation2 + $0x28] sm:$0x3f]   ;;  %vm1408_vm4 = vcmask 1046528   ;;  %s14152_s19 = sld [smem:[#allocation27_spill]] }
  0xb3   : > { %s14173_s26 = smov (!%p752_p1, %s751_s26), 59  ;;  %9508 = vmatprep.subr.bf16.mxu0 %v10998_v0  ;;  %9572 = vmatprep.subr.bf16.mxu1 %v10998_v0  ;;  %v1495_v27 = vsel %vm1049_vm1, %v10126_v26, 0  ;;  %vm1850_vm5 = vcmask 900096   ;;  %s14153_s25 = sld [smem:[#allocation26_spill]]  ;;  %vm2265_vm6 = vcmask 916480   ;;  %vm2702_vm7 = vcmask 1043456  }
  0xb4   : > { %s8582_s0 = sshll.u32 %s14173_s26, 2  ;;  %s14154_s21 = sld [smem:[#allocation29_spill]]  ;;  %vm2677_vm8 = vcmask 457728   ;;  %vm3381_vm9 = vcmask 1031168   ;;  %vm4068_vm10 = vcmask 785408   ;;  %vm6478_vm11 = vcmask 523264  }
  0xb5   : > { %s14155_s5 = sld [smem:[#allocation28_spill]]  ;;  %s14156_s26 = sld [smem:[#allocation30_spill]] }
  0xb6   : > { %s11324_s6 = scalar_lea.vmem %s14151_s28, %s8582_s0  ;;  %9509 = vmatpush3.bf16.msra.mxu0 %v1051_v5  ;;  %9573 = vmatpush3.bf16.msra.mxu1 %v1248_v7  ;;  %s14157_s12 = sld [smem:[#allocation32_spill]] }
  0xb7   : > { %v10115_v6 = vld [vmem:[%s11324_s6] sm:$0xff]   ;;  %v10116_v8 = vld [vmem:[%s11324_s6 + $0x8] sm:$0xff]   ;;  %9634 = vmatprep.subr.bf16.mxu0 %v10998_v0  ;;  %v10118_v13 = vld [vmem:[%s11324_s6 + $0x10] sm:$0xff]   ;;  %s14158_s22 = sld [smem:[#allocation17_spill]]  ;;  %s14159_s29 = sld [smem:[#allocation33_spill]] }
  0xb8   : > { %v874_v9 = vshrl.u32 %v10115_v6, 16  ;;  %v876_v10 = vshll.u32 %v10115_v6, 16  ;;  %v881_v11 = vshll.u32 %v10116_v8, 16  ;;  %v885_v17 = vshrl.u32 %v10116_v8, 16  ;;  %v10119_v22 = vld [vmem:[%s11324_s6 + $0x18] sm:$0xff]   ;;  %v10120_v30 = vld [vmem:[%s11324_s6 + $0x20] sm:$0xff]  }
  0xb9   : > { %9575 = vmatmul.mubr.msk.bf16.vlgmr.msra.gmra.mrb[0].mxu1 %vm1003_vm2, %v10115_v6  ;;  %v889_v18 = vshll.u32 %v10118_v13, 16  ;;  %v893_v24 = vshrl.u32 %v10118_v13, 16  ;;  %v897_v25 = vshll.u32 %v10119_v22, 16  ;;  %v10121_v31 = vld [vmem:[%s11324_s6 + $0x28] sm:$0xff]   ;;  %v901_v33 = vshrl.u32 %v10119_v22, 16  ;;  %v10122_v38 = vld [vmem:[%s11324_s6 + $0x30] sm:$0xff]  }
  0xba   : > { %v878_v12 = vrot.slane %v876_v10, 1  ;;  %v883_v14 = vrot.slane %v881_v11, 1  ;;  %9578 = vmatprep.mubr.msk.bf16.mxu1 %vm10999_vm0, %v10998_v0  ;;  %v905_v34 = vshll.u32 %v10120_v30, 16  ;;  %v1409_v35 = vrot.slane %v10115_v6, 1  ;;  %v10123_v58 = vld [vmem:[%s11324_s6 + $0x38] sm:$0xff]   ;;  %v10124_v4 = vld [vmem:[%s11324_s6 + $0x40] sm:$0xff]  }
  0xbb   : > { %v891_v21 = vrot.slane %v889_v18, 1  ;;  %v899_v29 = vrot.slane %v897_v25, 1  ;;  %v1410_v36 = vrot.slane %v10116_v8, 1  ;;  %v1412_v37 = vrot.slane %v10118_v13, 1  ;;  %v11442_v26 = vld [vmem:[%s11324_s6 + $0x58] sm:$0xff]   ;;  %s14160_s2 = sld [smem:[#allocation34_spill]] }
  0xbc   : > { %v879_v15 = vor.u32 %v878_v12, %v874_v9  ;;  %v887_v20 = vor.u32 %v885_v17, %v883_v14  ;;  %v1414_v40 = vrot.slane %v10119_v22, 1  ;;  %v1416_v41 = vrot.slane %v10120_v30, 1  ;;  %v11411_v12 = vld [vmem:[%s11324_s6 + $0x48] sm:$0xff]   ;;  %s14161_s17 = sld [smem:[#allocation22_spill]]  ;;  %s9408_s28 = sshll.u32 %s11138_s4, 7 }
  0xbd   : > { %v895_v28 = vor.u32 %v893_v24, %v891_v21  ;;  %v11360_v39 = vsel %vm1408_vm4, %v1409_v35, %v1410_v36  ;;  %v903_v42 = vor.u32 %v901_v33, %v899_v29  ;;  %v907_v43 = vrot.slane %v905_v34, 1  ;;  %s748_s27 = sand.u32 1, %s14158_s22  }
  0xbe   : > { %v884_v19 = vsel %vm872_vm3, %v879_v15, %v883_v14  ;;  %v892_v23 = vsel %vm872_vm3, %v887_v20, %v891_v21  ;;  %v11365_v44 = vsel %vm1408_vm4, %v1410_v36, %v1412_v37  ;;  %v1418_v45 = vrot.slane %v10121_v31, 1  ;;  %v11430_v20 = vld [vmem:[%s11324_s6 + $0x50] sm:$0xff]   ;;  %s8581_s1 = sshll.u32 %s748_s27, 3  ;;  %s8445_s22 = scalar_lea.sflag [#allocation4], %s748_s27 }
  0xbf   : > { %9511 = vmatmul.mubr.msk.bf16.vlgmr.msra.gmra.mrb[0].mxu0 %vm1003_vm2, %v884_v19  ;;  %v900_v32 = vsel %vm872_vm3, %v895_v28, %v899_v29  ;;  %v913_v46 = vshll.u32 %v10121_v31, 16  ;;  %v11368_v47 = vsel %vm1408_vm4, %v1412_v37, %v1414_v40  ;;  %v11371_v48 = vsel %vm1408_vm4, %v1414_v40, %v1416_v41 }
  0xc0   : > { %9635 = vmatpush3.bf16.msra.mxu0 %v10117_v16  ;;  %9514 = vmatprep.mubr.msk.bf16.mxu0 %vm10999_vm0, %v10998_v0  ;;  %v11374_v49 = vsel %vm1408_vm4, %v1416_v41, %v1418_v45  ;;  %v908_v50 = vsel %vm872_vm3, %v903_v42, %v907_v43  ;;  %v909_v51 = vshrl.u32 %v10120_v30, 16  ;;  %v917_v53 = vshrl.u32 %v10121_v31, 16 }
  0xc1   : > { %9636 = vmatprep.subr.bf16.mxu0 %v10998_v0  ;;  %9579 = vmatmul.mubr.msk.bf16.gmra.mrb[4].mxu1 %vm1003_vm2, %v10116_v8  ;;  %v915_v52 = vrot.slane %v913_v46, 1  ;;  %v921_v54 = vshll.u32 %v10122_v38, 16  ;;  %v1420_v56 = vrot.slane %v10122_v38, 1  ;;  %v1422_v62 = vrot.slane %v10123_v58, 1  ;;  %v11481_v46 = vld [vmem:[%s11324_s6 + $0x70] sm:$0xff]  }
  0xc2   : > { %9582 = vmatprep.mubr.msk.bf16.mxu1 %vm10999_vm0, %v10998_v0  ;;  %v911_v55 = vor.u32 %v909_v51, %v907_v43  ;;  %v929_v63 = vshll.u32 %v10123_v58, 16  ;;  %v925_v3 = vshrl.u32 %v10122_v38, 16  ;;  %v1424_v7 = vrot.slane %v10124_v4, 1  ;;  %p14163_p3 = scmp.ne.s32.totalorder %s14161_s17, 0 }
  0xc3   : > { %v11384_v57 = vsel %vm1408_vm4, %v1418_v45, %v1420_v56  ;;  %v919_v60 = vor.u32 %v917_v53, %v915_v52  ;;  %v923_v61 = vrot.slane %v921_v54, 1  ;;  %v11395_v1 = vsel %vm1408_vm4, %v1420_v56, %v1422_v62 }
  0xc4   : > { %9637 = vmatpush3.bf16.msra.mxu0 %v1495_v27  ;;  %v916_v59 = vsel %vm872_vm3, %v911_v55, %v915_v52  ;;  %v931_v5 = vrot.slane %v929_v63, 1  ;;  %v11406_v8 = vsel %vm1408_vm4, %v1422_v62, %v1424_v7  ;;  %v933_v10 = vshrl.u32 %v10123_v58, 16 }
  0xc5   : > { %v924_v2 = vsel %vm872_vm3, %v919_v60, %v923_v61  ;;  %v927_v6 = vor.u32 %v925_v3, %v923_v61  ;;  %v937_v11 = vshll.u32 %v10124_v4, 16  ;;  %v1426_v15 = vrot.slane %v11411_v12, 1 }
  0xc6   : > { %v941_v18 = vshrl.u32 %v10124_v4, 16  ;;  %v945_v19 = vshll.u32 %v11411_v12, 16  ;;  %v949_v24 = vshrl.u32 %v11411_v12, 16  ;;  %v953_v25 = vshll.u32 %v11430_v20, 16 }
  0xc7   : > { %9515 = vmatmul.mubr.msk.bf16.gmra.mrb[4].mxu0 %vm1003_vm2, %v892_v23  ;;  %v932_v9 = vsel %vm872_vm3, %v927_v6, %v931_v5  ;;  %v939_v14 = vrot.slane %v937_v11, 1  ;;  %v11422_v16 = vsel %vm1408_vm4, %v1424_v7, %v1426_v15  ;;  %v965_v36 = vshrl.u32 %v11442_v26, 16 }
  0xc8   : > { %9518 = vmatprep.mubr.msk.bf16.mxu0 %vm10999_vm0, %v10998_v0  ;;  %v955_v28 = vrot.slane %v953_v25, 1  ;;  %v985_v54 = vshll.u32 %v11481_v46, 16  ;;  %v1428_v61 = vrot.slane %v11430_v20, 1  ;;  %v1430_v62 = vrot.slane %v11442_v26, 1 }
  0xc9   : > { %9583 = vmatmul.mubr.msk.bf16.gmra.mrb[8].mxu1 %vm1003_vm2, %v10118_v13  ;;  %v935_v13 = vor.u32 %v933_v10, %v931_v5  ;;  %v943_v21 = vor.u32 %v941_v18, %v939_v14 }
  0xca   : > { %9586 = vmatprep.mubr.msk.bf16.mxu1 %vm10999_vm0, %v10998_v0  ;;  %v987_v56 = vrot.slane %v985_v54, 1 }
  0xcb   : > { %v940_v17 = vsel %vm872_vm3, %v935_v13, %v939_v14  ;;  %v1436_v13 = vrot.slane %v11481_v46, 1 }
  0xcf   : > { %9519 = vmatmul.mubr.msk.bf16.gmra.mrb[8].mxu0 %vm1003_vm2, %v900_v32  ;;  %v11455_v32 = vld [vmem:[%s11324_s6 + $0x60] sm:$0xff]  }
  0xd0   : > { %9522 = vmatprep.mubr.msk.bf16.mxu0 %vm10999_vm0, %v10998_v0  ;;  %v969_v37 = vshll.u32 %v11455_v32, 16  ;;  %v973_v43 = vshrl.u32 %v11455_v32, 16 }
  0xd1   : > { %9587 = vmatmul.mubr.msk.bf16.gmra.mrb[12].mxu1 %vm1003_vm2, %v10119_v22  ;;  %v947_v22 = vrot.slane %v945_v19, 1 }
  0xd2   : > { %9590 = vmatprep.mubr.msk.bf16.mxu1 %vm10999_vm0, %v10998_v0  ;;  %v971_v41 = vrot.slane %v969_v37, 1 }
  0xd3   : > { %v948_v23 = vsel %vm872_vm3, %v943_v21, %v947_v22  ;;  %v951_v27 = vor.u32 %v949_v24, %v947_v22 }
  0xd5   : > { %v956_v29 = vsel %vm872_vm3, %v951_v27, %v955_v28 }
  0xd7   : > { %9523 = vmatmul.mubr.msk.bf16.gmra.mrb[12].mxu0 %vm1003_vm2, %v908_v50  ;;  %v975_v50 = vor.u32 %v973_v43, %v971_v41 }
  0xd8   : > { %9526 = vmatprep.mubr.msk.bf16.mxu0 %vm10999_vm0, %v10998_v0 }
  0xd9   : > { %9591 = vmatmul.mubr.msk.bf16.gmra.mrb[16].mxu1 %vm1003_vm2, %v10120_v30  ;;  %v957_v30 = vshrl.u32 %v11430_v20, 16 }
  0xda   : > { %9594 = vmatprep.mubr.msk.bf16.mxu1 %vm10999_vm0, %v10998_v0 }
  0xdb   : > { %v959_v33 = vor.u32 %v957_v30, %v955_v28 }
  0xdf   : > { %9527 = vmatmul.mubr.msk.bf16.gmra.mrb[16].mxu0 %vm1003_vm2, %v916_v59  ;;  %v989_v59 = vshrl.u32 %v11481_v46, 16 }
  0xe0   : > { %9530 = vmatprep.mubr.msk.bf16.mxu0 %vm10999_vm0, %v10998_v0 }
  0xe1   : > { %9595 = vmatmul.mubr.msk.bf16.gmra.mrb[20].mxu1 %vm1003_vm2, %v10121_v31  ;;  %v961_v31 = vshll.u32 %v11442_v26, 16  ;;  %v991_v60 = vor.u32 %v989_v59, %v987_v56 }
  0xe2   : > { %9598 = vmatprep.mubr.msk.bf16.mxu1 %vm10999_vm0, %v10998_v0 }
  0xe3   : > { %v963_v34 = vrot.slane %v961_v31, 1 }
  0xe5   : > { %v964_v35 = vsel %vm872_vm3, %v959_v33, %v963_v34  ;;  %v967_v40 = vor.u32 %v965_v36, %v963_v34 }
  0xe7   : > { %9531 = vmatmul.mubr.msk.bf16.gmra.mrb[20].mxu0 %vm1003_vm2, %v924_v2  ;;  %v972_v42 = vsel %vm872_vm3, %v967_v40, %v971_v41 }
  0xe8   : > { %9534 = vmatprep.mubr.msk.bf16.mxu0 %vm10999_vm0, %v10998_v0 }
  0xe9   : > { %9599 = vmatmul.mubr.msk.bf16.gmra.mrb[24].mxu1 %vm1003_vm2, %v10122_v38  ;;  %v11468_v38 = vld [vmem:[%s11324_s6 + $0x68] sm:$0xff]   ;;  %s750_s6 = scalar_lea.vmem [#allocation11], %s8581_s1  ;;  %s11001_s1 = smov [#allocation11]  }
  0xea   : > { %9602 = vmatprep.mubr.msk.bf16.mxu1 %vm10999_vm0, %v10998_v0  ;;  %v977_v45 = vshll.u32 %v11468_v38, 16  ;;  %v981_v53 = vshrl.u32 %v11468_v38, 16  ;;  %v1434_v63 = vrot.slane %v11468_v38, 1  ;;  %s8458_s3 = sshll.u32 %s750_s6, 4  ;;  %s10917_s23 = sshll.u32 %s11001_s1, 4  ;;  %s14029_s3 = int_to_ptr.vmem [resolvable:$true] %s8458_s3  ;;  %s10918_s23 = int_to_ptr.vmem [resolvable:$false] %s10917_s23 }
  0xeb   : > { %s10913_s4 = scalar_lea.vmem %s14029_s3, 128  ;;  %s10919_s0 = scalar_lea.vmem %s10918_s23, 256 }
  0xec   : > { %v979_v51 = vrot.slane %v977_v45, 1  ;;  %p10914_p2 = scmp.ne.s32.totalorder %s14029_s3, %s10913_s4  ;;  %p10920_p8 = scmp.lt.s32.totalorder %s14029_s3, %s10918_s23 }
  0xed   : > { %p10921_p11 = scmp.lt.s32.totalorder %s10919_s0, %s10913_s4 }
  0xee   : > { %v980_v52 = vsel %vm872_vm3, %v975_v50, %v979_v51  ;;  %v983_v55 = vor.u32 %v981_v53, %v979_v51  ;;  %p10915_p4 = pnand %p10914_p2, %p14163_p3 }
  0xef   : > { %9535 = vmatmul.mubr.msk.bf16.gmra.mrb[24].mxu0 %vm1003_vm2, %v932_v9  ;;  %p10922_p5 = por %p10921_p11, %p10920_p8 }
  0xf0   : > { %9538 = vmatprep.mubr.msk.bf16.mxu0 %vm10999_vm0, %v10998_v0  ;;  %p10916_p7 = pneg %p10915_p4 }
  0xf1   : > { %9603 = vmatmul.mubr.msk.bf16.gmra.mrb[28].mxu1 %vm1003_vm2, %v10123_v58  ;;  %v988_v58 = vsel %vm872_vm3, %v983_v55, %v987_v56 }
  0xf2   : > { %9606 = vmatprep.mubr.msk.bf16.mxu1 %vm10999_vm0, %v10998_v0  ;;  %p10923_p0 = pnand %p10922_p5, %p10916_p7 }
  0xf7   : > { %9539 = vmatmul.mubr.msk.bf16.gmra.mrb[28].mxu0 %vm1003_vm2, %v940_v17 }
  0xf8   : > { %9542 = vmatprep.mubr.msk.bf16.mxu0 %vm10999_vm0, %v10998_v0 }
  0xf9   : > { %9607 = vmatmul.mubr.msk.bf16.gmra.mrb[32].mxu1 %vm1003_vm2, %v10124_v4 }
  0xfa   : > { %9610 = vmatprep.mubr.msk.bf16.mxu1 %vm10999_vm0, %v10998_v0 }
  0xff   : > { %9543 = vmatmul.mubr.msk.bf16.gmra.mrb[32].mxu0 %vm1003_vm2, %v948_v23 }
 0x100   : > { %9546 = vmatprep.mubr.msk.bf16.mxu0 %vm10999_vm0, %v10998_v0 }
 0x101   : > { %9611 = vmatmul.mubr.msk.bf16.gmra.mrb[36].mxu1 %vm1003_vm2, %v11411_v12 }
 0x102   : > { %9614 = vmatprep.mubr.msk.bf16.mxu1 %vm10999_vm0, %v10998_v0 }
 0x107   : > { %9547 = vmatmul.mubr.msk.bf16.gmra.mrb[36].mxu0 %vm1003_vm2, %v956_v29 }
 0x108   : > { %9550 = vmatprep.mubr.msk.bf16.mxu0 %vm10999_vm0, %v10998_v0 }
 0x109   : > { %9615 = vmatmul.mubr.msk.bf16.gmra.mrb[40].mxu1 %vm1003_vm2, %v11430_v20  ;;  %v1437_v20 = vsel %vm1408_vm4, %v1434_v63, %v1436_v13 }
 0x10a   : > { %9618 = vmatprep.mubr.msk.bf16.mxu1 %vm10999_vm0, %v10998_v0 }
 0x10f   : > { %9551 = vmatmul.mubr.msk.bf16.gmra.mrb[40].mxu0 %vm1003_vm2, %v964_v35 }
 0x110   : > { %9554 = vmatprep.mubr.msk.bf16.mxu0 %vm10999_vm0, %v10998_v0 }
 0x111   : > { %9619 = vmatmul.mubr.msk.bf16.gmra.mrb[44].mxu1 %vm1003_vm2, %v11442_v26 }
 0x112   : > { %9622 = vmatprep.mubr.msk.bf16.mxu1 %vm10999_vm0, %v10998_v0 }
 0x117   : > { %9555 = vmatmul.mubr.msk.bf16.gmra.mrb[44].mxu0 %vm1003_vm2, %v972_v42 }
 0x118   : > { %9558 = vmatprep.mubr.msk.bf16.mxu0 %vm10999_vm0, %v10998_v0 }
 0x119   : > { %9623 = vmatmul.mubr.msk.bf16.gmra.mrb[48].mxu1 %vm1003_vm2, %v11455_v32 }
 0x11a   : > { %9626 = vmatprep.mubr.msk.bf16.mxu1 %vm10999_vm0, %v10998_v0 }
 0x11f   : > { %9559 = vmatmul.mubr.msk.bf16.gmra.mrb[48].mxu0 %vm1003_vm2, %v980_v52 }
 0x120   : > { %9562 = vmatprep.mubr.msk.bf16.mxu0 %vm10999_vm0, %v10998_v0 }
 0x121   : > { %9627 = vmatmul.mubr.msk.bf16.gmra.mrb[52].mxu1 %vm1003_vm2, %v11468_v38 }
 0x122   : > { %9630 = vmatprep.mubr.msk.bf16.mxu1 %vm10999_vm0, %v10998_v0 }
 0x127   : > { %9563 = vmatmul.mubr.msk.bf16.gmra.mrb[52].mxu0 %vm1003_vm2, %v988_v58 }
 0x128   : > { %9566 = vmatprep.mubr.msk.bf16.mxu0 %vm10999_vm0, %v10998_v0 }
 0x129   : > { %9631 = vmatmul.mubr.msk.bf16.gmra.mrb[56].mxu1 %vm1003_vm2, %v11481_v46 }
 0x12f   : > { %9567 = vmatmul.mubr.msk.bf16.gmra.mrb[56].mxu0 %vm1003_vm2, %v991_v60 }
 0x130   : > { %9638 = vmatprep.mubr.msk.bf16.mxu0 %vm10999_vm0, %v10998_v0 }
 0x137   : > { %9639 = vmatmul.mubr.msk.bf16.vlgmr.msra.gmra.mrb[60].mxu0 %vm1003_vm2, %v11360_v39  ;;  %v1432_v39 = vrot.slane %v11455_v32, 1 }
 0x138   : > { %9642 = vmatprep.mubr.msk.bf16.mxu0 %vm10999_vm0, %v10998_v0 }
 0x139   : > { %v1435_v7 = vsel %vm1408_vm4, %v1432_v39, %v1434_v63 }
 0x13f   : > { %9643 = vmatmul.mubr.msk.bf16.gmra.mrb[64].mxu0 %vm1003_vm2, %v11365_v44  ;;  %v1429_v44 = vsel %vm1408_vm4, %v1426_v15, %v1428_v61 }
 0x140   : > { %9646 = vmatprep.mubr.msk.bf16.mxu0 %vm10999_vm0, %v10998_v0 }
 0x147   : > { %9647 = vmatmul.mubr.msk.bf16.gmra.mrb[68].mxu0 %vm1003_vm2, %v11368_v47  ;;  %v1431_v47 = vsel %vm1408_vm4, %v1428_v61, %v1430_v62 }
 0x148   : > { %9650 = vmatprep.mubr.msk.bf16.mxu0 %vm10999_vm0, %v10998_v0 }
 0x14f   : > { %9651 = vmatmul.mubr.msk.bf16.gmra.mrb[72].mxu0 %vm1003_vm2, %v11371_v48  ;;  %v1433_v48 = vsel %vm1408_vm4, %v1430_v62, %v1432_v39 }
 0x150   : > { %9654 = vmatprep.mubr.msk.bf16.mxu0 %vm10999_vm0, %v10998_v0 }
 0x157   : > { %9655 = vmatmul.mubr.msk.bf16.gmra.mrb[76].mxu0 %vm1003_vm2, %v11374_v49 }
 0x158   : > { %9658 = vmatprep.mubr.msk.bf16.mxu0 %vm10999_vm0, %v10998_v0 }
 0x15f   : > { %9659 = vmatmul.mubr.msk.bf16.gmra.mrb[80].mxu0 %vm1003_vm2, %v11384_v57 }
 0x160   : > { %9662 = vmatprep.mubr.msk.bf16.mxu0 %vm10999_vm0, %v10998_v0 }
 0x167   : > { %9663 = vmatmul.mubr.msk.bf16.gmra.mrb[84].mxu0 %vm1003_vm2, %v11395_v1 }
 0x168   : > { %9666 = vmatprep.mubr.msk.bf16.mxu0 %vm10999_vm0, %v10998_v0 }
 0x16f   : > { %9667 = vmatmul.mubr.msk.bf16.gmra.mrb[88].mxu0 %vm1003_vm2, %v11406_v8  ;;  %v11000_v8 = vmov 0  }
 0x170   : > { %9670 = vmatprep.mubr.msk.bf16.mxu0 %vm10999_vm0, %v10998_v0  ;;  %1879 = vmatprep.subr.bf16.mxu1 %v11000_v8 }
 0x177   : > { %9671 = vmatmul.mubr.msk.bf16.gmra.mrb[92].mxu0 %vm1003_vm2, %v11422_v16 }
 0x178   : > { %9674 = vmatprep.mubr.msk.bf16.mxu0 %vm10999_vm0, %v10998_v0 }
 0x17f   : > { %9675 = vmatmul.mubr.msk.bf16.gmra.mrb[96].mxu0 %vm1003_vm2, %v1429_v44 }
 0x180   : > { %9678 = vmatprep.mubr.msk.bf16.mxu0 %vm10999_vm0, %v10998_v0 }
 0x187   : > { %9679 = vmatmul.mubr.msk.bf16.gmra.mrb[100].mxu0 %vm1003_vm2, %v1431_v47 }
 0x188   : > { %9682 = vmatprep.mubr.msk.bf16.mxu0 %vm10999_vm0, %v10998_v0 }
 0x18c   : > { %v1284_v49 = vpop.f32.mrb[0].mxu1 }
 0x18d   : > { %v9576_v57 = vpop.f32.mrb[1].mxu1 }
 0x18e   : > { %v1287_v1 = vpop.f32.mrb[2].mxu1 }
 0x18f   : > { %9683 = vmatmul.mubr.msk.bf16.gmra.mrb[104].mxu0 %vm1003_vm2, %v1433_v48  ;;  %v9577_v3 = vpop.f32.mrb[3].mxu1 }
 0x190   : > { %9686 = vmatprep.mubr.msk.bf16.mxu0 %vm10999_vm0, %v10998_v0 }
 0x192   : > { %v1087_v2 = vpop.f32.mrb[0].mxu0 }
 0x193   : > { %v9512_v4 = vpop.f32.mrb[1].mxu0  ;;  %v11564_v5 = vadd.f32 %v1284_v49, %v1087_v2 }
 0x194   : > { %v1090_v6 = vpop.f32.mrb[2].mxu0  ;;  %v1292_v11 = vpop.f32.mrb[4].mxu1 }
 0x195   : > { %v9513_v9 = vpop.f32.mrb[3].mxu0  ;;  %v11568_v10 = vadd.f32 %v1287_v1, %v1090_v6  ;;  %v9580_v12 = vpop.f32.mrb[5].mxu1 }
 0x196   : > { %v1295_v14 = vpop.f32.mrb[6].mxu1 }
 0x197   : > { %9687 = vmatmul.mubr.msk.bf16.gmra.mrb[108].mxu0 %vm1003_vm2, %v1435_v7  ;;  %v9581_v16 = vpop.f32.mrb[7].mxu1 }
 0x198   : > { %9690 = vmatprep.mubr.msk.bf16.mxu0 %vm10999_vm0, %v10998_v0 }
 0x19a   : > { %v1095_v15 = vpop.f32.mrb[4].mxu0 }
 0x19b   : > { %v9516_v17 = vpop.f32.mrb[5].mxu0  ;;  %v11574_v18 = vadd.f32 %v1292_v11, %v1095_v15 }
 0x19c   : > { %v1098_v19 = vpop.f32.mrb[6].mxu0  ;;  %v1300_v23 = vpop.f32.mrb[8].mxu1 }
 0x19d   : > { %v9517_v21 = vpop.f32.mrb[7].mxu0  ;;  %v11577_v22 = vadd.f32 %v1295_v14, %v1098_v19  ;;  %v9584_v24 = vpop.f32.mrb[9].mxu1 }
 0x19e   : > { %v1303_v25 = vpop.f32.mrb[10].mxu1 }
 0x19f   : > { %9691 = vmatmul.mubr.msk.bf16.gmra.mrb[112].mxu0 %vm1003_vm2, %v1437_v20  ;;  %v9585_v27 = vpop.f32.mrb[11].mxu1 }
 0x1a0   : > { %9694 = vmatprep.mubr.msk.bf16.mxu0 %vm10999_vm0, %v10998_v0 }
 0x1a2   : > { %v1103_v26 = vpop.f32.mrb[8].mxu0 }
 0x1a3   : > { %v11582_v28 = vadd.f32 %v1300_v23, %v1103_v26  ;;  %v9520_v29 = vpop.f32.mrb[9].mxu0 }
 0x1a4   : > { %v1106_v30 = vpop.f32.mrb[10].mxu0  ;;  %v1308_v33 = vpop.f32.mrb[12].mxu1 }
 0x1a5   : > { %v11584_v31 = vadd.f32 %v1303_v25, %v1106_v30  ;;  %v9521_v32 = vpop.f32.mrb[11].mxu0  ;;  %v9588_v34 = vpop.f32.mrb[13].mxu1 }
 0x1a6   : > { %v1311_v35 = vpop.f32.mrb[14].mxu1 }
 0x1a7   : > { %9695 = vmatmul.mubr.msk.bf16.gmra.mrb[116].mxu0 %vm1003_vm2, %v1436_v13  ;;  %v9589_v37 = vpop.f32.mrb[15].mxu1 }
 0x1aa   : > { %v1111_v36 = vpop.f32.mrb[12].mxu0 }
 0x1ab   : > { %v11587_v38 = vadd.f32 %v1308_v33, %v1111_v36  ;;  %v9524_v40 = vpop.f32.mrb[13].mxu0 }
 0x1ac   : > { %v1114_v41 = vpop.f32.mrb[14].mxu0  ;;  %v1316_v45 = vpop.f32.mrb[16].mxu1 }
 0x1ad   : > { %v11589_v42 = vadd.f32 %v1311_v35, %v1114_v41  ;;  %v9525_v43 = vpop.f32.mrb[15].mxu0  ;;  %v9592_v46 = vpop.f32.mrb[17].mxu1 }
 0x1ae   : > { %v1319_v50 = vpop.f32.mrb[18].mxu1 }
 0x1af   : > { %v9593_v52 = vpop.f32.mrb[19].mxu1 }
 0x1b2   : > { %v1119_v51 = vpop.f32.mrb[16].mxu0 }
 0x1b3   : > { %v11591_v53 = vadd.f32 %v1316_v45, %v1119_v51  ;;  %v9528_v54 = vpop.f32.mrb[17].mxu0 }
 0x1b4   : > { %v1122_v55 = vpop.f32.mrb[18].mxu0  ;;  %v1324_v59 = vpop.f32.mrb[20].mxu1 }
 0x1b5   : > { %v11593_v56 = vadd.f32 %v1319_v50, %v1122_v55  ;;  %v9529_v58 = vpop.f32.mrb[19].mxu0  ;;  %v9596_v60 = vpop.f32.mrb[21].mxu1 }
 0x1b6   : > { %v1327_v61 = vpop.f32.mrb[22].mxu1 }
 0x1b7   : > { %v9597_v39 = vpop.f32.mrb[23].mxu1 }
 0x1ba   : > { %v1127_v62 = vpop.f32.mrb[20].mxu0 }
 0x1bb   : > { %v11595_v44 = vadd.f32 %v1324_v59, %v1127_v62  ;;  %v9532_v47 = vpop.f32.mrb[21].mxu0 }
 0x1bc   : > { %v1130_v48 = vpop.f32.mrb[22].mxu0  ;;  %v1332_v63 = vpop.f32.mrb[24].mxu1 }
 0x1bd   : > { %v11597_v49 = vadd.f32 %v1327_v61, %v1130_v48  ;;  %v9533_v57 = vpop.f32.mrb[23].mxu0  ;;  %v9600_v1 = vpop.f32.mrb[25].mxu1 }
 0x1be   : > { %v1335_v2 = vpop.f32.mrb[26].mxu1 }
 0x1bf   : > { %v9601_v4 = vpop.f32.mrb[27].mxu1 }
 0x1c2   : > { %v1135_v3 = vpop.f32.mrb[24].mxu0 }
 0x1c3   : > { %v11599_v6 = vadd.f32 %v1332_v63, %v1135_v3  ;;  %v9536_v7 = vpop.f32.mrb[25].mxu0 }
 0x1c4   : > { %v1138_v9 = vpop.f32.mrb[26].mxu0  ;;  %v1340_v13 = vpop.f32.mrb[28].mxu1 }
 0x1c5   : > { %v11601_v11 = vadd.f32 %v1335_v2, %v1138_v9  ;;  %v9537_v12 = vpop.f32.mrb[27].mxu0  ;;  %v9604_v14 = vpop.f32.mrb[29].mxu1 }
 0x1c6   : > { %v1343_v15 = vpop.f32.mrb[30].mxu1 }
 0x1c7   : > { %v9605_v17 = vpop.f32.mrb[31].mxu1 }
 0x1ca   : > { %v1143_v16 = vpop.f32.mrb[28].mxu0 }
 0x1cb   : > { %v11603_v19 = vadd.f32 %v1340_v13, %v1143_v16  ;;  %v9540_v20 = vpop.f32.mrb[29].mxu0 }
 0x1cc   : > { %v1146_v21 = vpop.f32.mrb[30].mxu0  ;;  %v1348_v25 = vpop.f32.mrb[32].mxu1 }
 0x1cd   : > { %v11605_v23 = vadd.f32 %v1343_v15, %v1146_v21  ;;  %v9541_v24 = vpop.f32.mrb[31].mxu0  ;;  %v9608_v26 = vpop.f32.mrb[33].mxu1 }
 0x1ce   : > { %v1351_v27 = vpop.f32.mrb[34].mxu1 }
 0x1cf   : > { %v9609_v30 = vpop.f32.mrb[35].mxu1 }
 0x1d2   : > { %v1151_v29 = vpop.f32.mrb[32].mxu0 }
 0x1d3   : > { %v11607_v32 = vadd.f32 %v1348_v25, %v1151_v29  ;;  %v9544_v33 = vpop.f32.mrb[33].mxu0 }
 0x1d4   : > { %v1154_v34 = vpop.f32.mrb[34].mxu0  ;;  %v1356_v37 = vpop.f32.mrb[36].mxu1 }
 0x1d5   : > { %v11609_v35 = vadd.f32 %v1351_v27, %v1154_v34  ;;  %v9545_v36 = vpop.f32.mrb[35].mxu0  ;;  %v9612_v40 = vpop.f32.mrb[37].mxu1 }
 0x1d6   : > { %v1359_v41 = vpop.f32.mrb[38].mxu1 }
 0x1d7   : > { %v9613_v45 = vpop.f32.mrb[39].mxu1 }
 0x1da   : > { %v1159_v43 = vpop.f32.mrb[36].mxu0 }
 0x1db   : > { %v11611_v46 = vadd.f32 %v1356_v37, %v1159_v43  ;;  %v9548_v50 = vpop.f32.mrb[37].mxu0 }
 0x1dc   : > { %v1162_v51 = vpop.f32.mrb[38].mxu0  ;;  %v1364_v55 = vpop.f32.mrb[40].mxu1 }
 0x1dd   : > { %v11613_v52 = vadd.f32 %v1359_v41, %v1162_v51  ;;  %v9549_v54 = vpop.f32.mrb[39].mxu0  ;;  %v9616_v58 = vpop.f32.mrb[41].mxu1 }
 0x1de   : > { %v1367_v59 = vpop.f32.mrb[42].mxu1 }
 0x1df   : > { %v9617_v61 = vpop.f32.mrb[43].mxu1 }
 0x1e2   : > { %v1167_v60 = vpop.f32.mrb[40].mxu0 }
 0x1e3   : > { %v11615_v62 = vadd.f32 %v1364_v55, %v1167_v60  ;;  %v9552_v39 = vpop.f32.mrb[41].mxu0 }
 0x1e4   : > { %v1170_v47 = vpop.f32.mrb[42].mxu0  ;;  %v1372_v63 = vpop.f32.mrb[44].mxu1 }
 0x1e5   : > { %v11617_v48 = vadd.f32 %v1367_v59, %v1170_v47  ;;  %v9553_v57 = vpop.f32.mrb[43].mxu0  ;;  %v9620_v1 = vpop.f32.mrb[45].mxu1 }
 0x1e6   : > { %v1375_v2 = vpop.f32.mrb[46].mxu1 }
 0x1e7   : > { %v9621_v4 = vpop.f32.mrb[47].mxu1 }
 0x1ea   : > { %v1175_v3 = vpop.f32.mrb[44].mxu0 }
 0x1eb   : > { %v11619_v7 = vadd.f32 %v1372_v63, %v1175_v3  ;;  %v9556_v9 = vpop.f32.mrb[45].mxu0  ;;  %v10134_v63 = vld [vmem:[%s14152_s19 + $0x4] ss:$8 sps:$4 sm:$0xff]  }
 0x1ec   : > { %v1178_v12 = vpop.f32.mrb[46].mxu0  ;;  %v1380_v15 = vpop.f32.mrb[48].mxu1  ;;  %8666 = vmatprep.mubr.msk.bf16.mxu1 %vm1850_vm5, %v10134_v63 }
 0x1ed   : > { %v11621_v13 = vadd.f32 %v1375_v2, %v1178_v12  ;;  %v9557_v14 = vpop.f32.mrb[47].mxu0  ;;  %v9624_v16 = vpop.f32.mrb[49].mxu1  ;;  %v11642_v2 = vld [vmem:[%s14153_s25] ss:$0 sm:$0xff]  ;;  %s14162_s25 = sld [smem:[#allocation35_spill]] }
 0x1ee   : > { %v1383_v17 = vpop.f32.mrb[50].mxu1 }
 0x1ef   : > { %v9625_v21 = vpop.f32.mrb[51].mxu1 }
 0x1f2   : > { %v1183_v20 = vpop.f32.mrb[48].mxu0 }
 0x1f3   : > { %v11623_v24 = vadd.f32 %v1380_v15, %v1183_v20  ;;  %v9560_v25 = vpop.f32.mrb[49].mxu0 }
 0x1f4   : > { %v1186_v26 = vpop.f32.mrb[50].mxu0  ;;  %v1388_v30 = vpop.f32.mrb[52].mxu1 }
 0x1f5   : > { %v11625_v27 = vadd.f32 %v1383_v17, %v1186_v26  ;;  %v9561_v29 = vpop.f32.mrb[51].mxu0  ;;  %v9628_v33 = vpop.f32.mrb[53].mxu1 }
 0x1f6   : > { %v1391_v34 = vpop.f32.mrb[54].mxu1 }
 0x1f7   : > { %v9629_v37 = vpop.f32.mrb[55].mxu1 }
 0x1fa   : > { %v1191_v36 = vpop.f32.mrb[52].mxu0 }
 0x1fb   : > { %v11627_v40 = vadd.f32 %v1388_v30, %v1191_v36  ;;  %v9564_v41 = vpop.f32.mrb[53].mxu0 }
 0x1fc   : > { %v1194_v43 = vpop.f32.mrb[54].mxu0  ;;  %v1396_v51 = vpop.f32.mrb[56].mxu1 }
 0x1fd   : > { %v11629_v45 = vadd.f32 %v1391_v34, %v1194_v43  ;;  %v9565_v50 = vpop.f32.mrb[55].mxu0  ;;  %v9632_v54 = vpop.f32.mrb[57].mxu1 }
 0x1fe   : > { %v1399_v55 = vpop.f32.mrb[58].mxu1 }
 0x1ff   : > { %v9633_v59 = vpop.f32.mrb[59].mxu1 }
 0x202   : > { %v1199_v58 = vpop.f32.mrb[56].mxu0 }
 0x203   : > { %v11631_v60 = vadd.f32 %v1396_v51, %v1199_v58  ;;  %v9568_v61 = vpop.f32.mrb[57].mxu0 }
 0x204   : > { %v1202_v39 = vpop.f32.mrb[58].mxu0 }
 0x205   : > { %v11633_v47 = vadd.f32 %v1399_v55, %v1202_v39  ;;  %v9569_v57 = vpop.f32.mrb[59].mxu0 }
 0x20a   : > { %v1531_v1 = vpop.f32.mrb[60].mxu0 }
 0x20b   : > { %v1650_v3 = vadd.f32 %v1531_v1, %v11564_v5  ;;  %v9640_v4 = vpop.f32.mrb[61].mxu0 }
 0x20c   : > { %v1534_v9 = vpop.f32.mrb[62].mxu0 }
 0x20d   : > { %v1687_v12 = vadd.f32 %v11642_v2, %v1650_v3  ;;  %v1651_v14 = vadd.f32 %v1534_v9, %v11568_v10  ;;  %v9641_v15 = vpop.f32.mrb[63].mxu0 }
 0x20f   : > { %v1688_v16 = vadd.f32 %v11642_v2, %v1651_v14  ;;  %v1717_v17 = vmax.f32 %v1687_v12, 0.0 }
 0x211   : > { %v1718_v20 = vmax.f32 %v1688_v16, 0.0 }
 0x212   : > { %v1539_v21 = vpop.f32.mrb[64].mxu0 }
 0x213   : > { %v11648_v25 = vpack.c.bf16 %v1718_v20, %v1717_v17  ;;  %v1652_v26 = vadd.f32 %v1539_v21, %v11574_v18  ;;  %v9644_v29 = vpop.f32.mrb[65].mxu0 }
 0x214   : > { %v1542_v30 = vpop.f32.mrb[66].mxu0 }
 0x215   : > { %v1689_v5 = vadd.f32 %v11642_v2, %v1652_v26  ;;  %v1653_v33 = vadd.f32 %v1542_v30, %v11577_v22  ;;  %v9645_v34 = vpop.f32.mrb[67].mxu0  ;;  %1880 = vmatpush1.bf16.msra.mxu1 %v11648_v25 }
 0x216   : > { %1881 = vmatprep.subr.bf16.mxu1 %v11000_v8 }
 0x217   : > { %v1690_v10 = vadd.f32 %v11642_v2, %v1653_v33  ;;  %v1719_v36 = vmax.f32 %v1689_v5, 0.0 }
 0x219   : > { %v1720_v37 = vmax.f32 %v1690_v10, 0.0 }
 0x21a   : > { %v1547_v41 = vpop.f32.mrb[68].mxu0 }
 0x21b   : > { %v11656_v43 = vpack.c.bf16 %v1720_v37, %v1719_v36  ;;  %v1654_v18 = vadd.f32 %v1547_v41, %v11582_v28  ;;  %v9648_v50 = vpop.f32.mrb[69].mxu0 }
 0x21c   : > { %v1550_v51 = vpop.f32.mrb[70].mxu0 }
 0x21d   : > { %v1691_v54 = vadd.f32 %v11642_v2, %v1654_v18  ;;  %v1655_v22 = vadd.f32 %v1550_v51, %v11584_v31  ;;  %v9649_v55 = vpop.f32.mrb[71].mxu0  ;;  %1882 = vmatpush1.bf16.msra.mxu1 %v11656_v43 }
 0x21e   : > { %1883 = vmatprep.subr.bf16.mxu1 %v11000_v8 }
 0x21f   : > { %v1692_v58 = vadd.f32 %v11642_v2, %v1655_v22  ;;  %v1721_v59 = vmax.f32 %v1691_v54, 0.0 }
 0x221   : > { %v1722_v61 = vmax.f32 %v1692_v58, 0.0 }
 0x222   : > { %v1555_v39 = vpop.f32.mrb[72].mxu0 }
 0x223   : > { %v11664_v57 = vpack.c.bf16 %v1722_v61, %v1721_v59  ;;  %v1656_v28 = vadd.f32 %v1555_v39, %v11587_v38  ;;  %v9652_v63 = vpop.f32.mrb[73].mxu0 }
 0x224   : > { %v1558_v1 = vpop.f32.mrb[74].mxu0 }
 0x225   : > { %v1693_v3 = vadd.f32 %v11642_v2, %v1656_v28  ;;  %v1657_v31 = vadd.f32 %v1558_v1, %v11589_v42  ;;  %v9653_v4 = vpop.f32.mrb[75].mxu0  ;;  %1884 = vmatpush1.bf16.msra.mxu1 %v11664_v57 }
 0x226   : > { %1885 = vmatprep.subr.bf16.mxu1 %v11000_v8 }
 0x227   : > { %v1694_v9 = vadd.f32 %v11642_v2, %v1657_v31  ;;  %v1723_v12 = vmax.f32 %v1693_v3, 0.0 }
 0x229   : > { %v1724_v14 = vmax.f32 %v1694_v9, 0.0 }
 0x22a   : > { %v1563_v15 = vpop.f32.mrb[76].mxu0 }
 0x22b   : > { %v11672_v16 = vpack.c.bf16 %v1724_v14, %v1723_v12  ;;  %v1658_v38 = vadd.f32 %v1563_v15, %v11591_v53  ;;  %v9656_v17 = vpop.f32.mrb[77].mxu0 }
 0x22c   : > { %v1566_v20 = vpop.f32.mrb[78].mxu0 }
 0x22d   : > { %v1695_v21 = vadd.f32 %v11642_v2, %v1658_v38  ;;  %v1659_v42 = vadd.f32 %v1566_v20, %v11593_v56  ;;  %v9657_v26 = vpop.f32.mrb[79].mxu0  ;;  %1886 = vmatpush1.bf16.msra.mxu1 %v11672_v16 }
 0x22e   : > { %1887 = vmatprep.subr.bf16.mxu1 %v11000_v8 }
 0x22f   : > { %v1696_v29 = vadd.f32 %v11642_v2, %v1659_v42  ;;  %v1725_v30 = vmax.f32 %v1695_v21, 0.0 }
 0x231   : > { %v1726_v5 = vmax.f32 %v1696_v29, 0.0 }
 0x232   : > { %v1571_v33 = vpop.f32.mrb[80].mxu0 }
 0x233   : > { %v11680_v34 = vpack.c.bf16 %v1726_v5, %v1725_v30  ;;  %v1660_v53 = vadd.f32 %v1571_v33, %v11595_v44  ;;  %v9660_v10 = vpop.f32.mrb[81].mxu0 }
 0x234   : > { %v1574_v36 = vpop.f32.mrb[82].mxu0 }
 0x235   : > { %v1697_v37 = vadd.f32 %v11642_v2, %v1660_v53  ;;  %v1661_v56 = vadd.f32 %v1574_v36, %v11597_v49  ;;  %v9661_v41 = vpop.f32.mrb[83].mxu0  ;;  %1888 = vmatpush1.bf16.msra.mxu1 %v11680_v34 }
 0x236   : > { %1889 = vmatprep.subr.bf16.mxu1 %v11000_v8 }
 0x237   : > { %v1698_v18 = vadd.f32 %v11642_v2, %v1661_v56  ;;  %v1727_v50 = vmax.f32 %v1697_v37, 0.0 }
 0x239   : > { %v1728_v51 = vmax.f32 %v1698_v18, 0.0 }
 0x23a   : > { %v1579_v54 = vpop.f32.mrb[84].mxu0 }
 0x23b   : > { %v11688_v22 = vpack.c.bf16 %v1728_v51, %v1727_v50  ;;  %v1662_v44 = vadd.f32 %v1579_v54, %v11599_v6  ;;  %v9664_v55 = vpop.f32.mrb[85].mxu0 }
 0x23c   : > { %v1582_v58 = vpop.f32.mrb[86].mxu0 }
 0x23d   : > { %v1699_v59 = vadd.f32 %v11642_v2, %v1662_v44  ;;  %v1663_v49 = vadd.f32 %v1582_v58, %v11601_v11  ;;  %v9665_v61 = vpop.f32.mrb[87].mxu0  ;;  %1890 = vmatpush1.bf16.msra.mxu1 %v11688_v22 }
 0x23e   : > { %1891 = vmatprep.subr.bf16.mxu1 %v11000_v8 }
 0x23f   : > { %v1700_v39 = vadd.f32 %v11642_v2, %v1663_v49  ;;  %v1729_v28 = vmax.f32 %v1699_v59, 0.0 }
 0x241   : > { %v1730_v63 = vmax.f32 %v1700_v39, 0.0 }
 0x242   : > { %v1587_v1 = vpop.f32.mrb[88].mxu0 }
 0x243   : > { %v11696_v3 = vpack.c.bf16 %v1730_v63, %v1729_v28  ;;  %v1664_v6 = vadd.f32 %v1587_v1, %v11603_v19  ;;  %v9668_v31 = vpop.f32.mrb[89].mxu0 }
 0x244   : > { %v1590_v4 = vpop.f32.mrb[90].mxu0 }
 0x245   : > { %v1701_v9 = vadd.f32 %v11642_v2, %v1664_v6  ;;  %v1665_v11 = vadd.f32 %v1590_v4, %v11605_v23  ;;  %v9669_v12 = vpop.f32.mrb[91].mxu0  ;;  %1892 = vmatpush1.bf16.msra.mxu1 %v11696_v3 }
 0x246   : > { %1893 = vmatprep.subr.bf16.mxu1 %v11000_v8 }
 0x247   : > { %v1702_v14 = vadd.f32 %v11642_v2, %v1665_v11  ;;  %v1731_v15 = vmax.f32 %v1701_v9, 0.0 }
 0x249   : > { %v1732_v38 = vmax.f32 %v1702_v14, 0.0 }
 0x24a   : > { %v1595_v17 = vpop.f32.mrb[92].mxu0 }
 0x24b   : > { %v11704_v20 = vpack.c.bf16 %v1732_v38, %v1731_v15  ;;  %v1666_v19 = vadd.f32 %v1595_v17, %v11607_v32  ;;  %v9672_v21 = vpop.f32.mrb[93].mxu0 }
 0x24c   : > { %v1598_v42 = vpop.f32.mrb[94].mxu0 }
 0x24d   : > { %v1703_v26 = vadd.f32 %v11642_v2, %v1666_v19  ;;  %v1667_v23 = vadd.f32 %v1598_v42, %v11609_v35  ;;  %v9673_v29 = vpop.f32.mrb[95].mxu0  ;;  %1894 = vmatpush1.bf16.msra.mxu1 %v11704_v20 }
 0x24e   : > { %1895 = vmatprep.subr.bf16.mxu1 %v11000_v8 }
 0x24f   : > { %v1704_v30 = vadd.f32 %v11642_v2, %v1667_v23  ;;  %v1733_v5 = vmax.f32 %v1703_v26, 0.0 }
 0x251   : > { %v1734_v33 = vmax.f32 %v1704_v30, 0.0 }
 0x252   : > { %v1603_v53 = vpop.f32.mrb[96].mxu0 }
 0x253   : > { %v11712_v10 = vpack.c.bf16 %v1734_v33, %v1733_v5  ;;  %v1668_v32 = vadd.f32 %v1603_v53, %v11611_v46  ;;  %v9676_v36 = vpop.f32.mrb[97].mxu0 }
 0x254   : > { %v1606_v37 = vpop.f32.mrb[98].mxu0 }
 0x255   : > { %v1705_v56 = vadd.f32 %v11642_v2, %v1668_v32  ;;  %v1669_v35 = vadd.f32 %v1606_v37, %v11613_v52  ;;  %v9677_v41 = vpop.f32.mrb[99].mxu0  ;;  %1896 = vmatpush1.bf16.msra.mxu1 %v11712_v10 }
 0x256   : > { %1897 = vmatprep.subr.bf16.mxu1 %v11000_v8 }
 0x257   : > { %v1706_v18 = vadd.f32 %v11642_v2, %v1669_v35  ;;  %v1735_v50 = vmax.f32 %v1705_v56, 0.0 }
 0x259   : > { %v1736_v51 = vmax.f32 %v1706_v18, 0.0 }
 0x25a   : > { %v1611_v54 = vpop.f32.mrb[100].mxu0 }
 0x25b   : > { %v11720_v44 = vpack.c.bf16 %v1736_v51, %v1735_v50  ;;  %v1670_v46 = vadd.f32 %v1611_v54, %v11615_v62  ;;  %v9680_v55 = vpop.f32.mrb[101].mxu0 }
 0x25c   : > { %v1614_v58 = vpop.f32.mrb[102].mxu0 }
 0x25d   : > { %v1707_v59 = vadd.f32 %v11642_v2, %v1670_v46  ;;  %v1671_v52 = vadd.f32 %v1614_v58, %v11617_v48  ;;  %v9681_v49 = vpop.f32.mrb[103].mxu0  ;;  %1898 = vmatpush1.bf16.msra.mxu1 %v11720_v44 }
 0x25e   : > { %1899 = vmatprep.subr.bf16.mxu1 %v11000_v8 }
 0x25f   : > { %v1708_v61 = vadd.f32 %v11642_v2, %v1671_v52  ;;  %v1737_v39 = vmax.f32 %v1707_v59, 0.0  ;;  %v10180_v52 = vld [vmem:[%s14154_s21] sm:$0xff]  }
 0x260   : > { %9698 = vmatprep.subr.bf16.mxu0 %v10180_v52 }
 0x261   : > { %v1738_v28 = vmax.f32 %v1708_v61, 0.0  ;;  %9699 = vmatpush3.bf16.msra.mxu0 %v10180_v52  ;;  %v10135_v61 = vld [vmem:[%s14152_s19 + $0x14] ss:$8 sps:$4 sm:$0xff]  }
 0x262   : > { %v1619_v63 = vpop.f32.mrb[104].mxu0 }
 0x263   : > { %v11728_v1 = vpack.c.bf16 %v1738_v28, %v1737_v39  ;;  %v1672_v62 = vadd.f32 %v1619_v63, %v11619_v7  ;;  %v9684_v6 = vpop.f32.mrb[105].mxu0  ;;  %v10137_v39 = vld [vmem:[%s14152_s19 + $0x10] ss:$8 sps:$4 sm:$0xff]   ;;  %v10138_v28 = vld [vmem:[%s14152_s19 + $0x24] ss:$8 sps:$4 sm:$0xff]  }
 0x264   : > { %v1622_v31 = vpop.f32.mrb[106].mxu0  ;;  %v10155_v63 = vld [vmem:[%s14152_s19 + $0x70] ss:$8 sps:$4 sm:$0xff]   ;;  %v10159_v6 = vld [vmem:[%s14155_s5 + $0x14] ss:$8 sps:$4 sm:$0xff]  }
 0x265   : > { %v1709_v4 = vadd.f32 %v11642_v2, %v1672_v62  ;;  %v1673_v48 = vadd.f32 %v1622_v31, %v11621_v13  ;;  %v9685_v9 = vpop.f32.mrb[107].mxu0  ;;  %1900 = vmatpush1.bf16.msra.mxu1 %v11728_v1  ;;  %v10156_v62 = vld [vmem:[%s14155_s5] ss:$8 sps:$4 sm:$0xff]   ;;  %v10161_v31 = vld [vmem:[%s14155_s5 + $0x10] ss:$8 sps:$4 sm:$0xff]  }
 0x266   : > { %1901 = vmatprep.subr.bf16.mxu1 %v11000_v8  ;;  %v10165_v9 = vld [vmem:[%s14155_s5 + $0x34] ss:$8 sps:$4 sm:$0xff]  }
 0x267   : > { %v1710_v11 = vadd.f32 %v11642_v2, %v1673_v48  ;;  %v1739_v12 = vmax.f32 %v1709_v4, 0.0  ;;  %v10162_v4 = vld [vmem:[%s14155_s5 + $0x24] ss:$8 sps:$4 sm:$0xff]   ;;  %v10164_v48 = vld [vmem:[%s14155_s5 + $0x20] ss:$8 sps:$4 sm:$0xff]  }
 0x269   : > { %v1740_v14 = vmax.f32 %v1710_v11, 0.0  ;;  %v10167_v11 = vld [vmem:[%s14155_s5 + $0x30] ss:$8 sps:$4 sm:$0xff]  }
 0x26a   : > { %v1627_v15 = vpop.f32.mrb[108].mxu0 }
 0x26b   : > { %v11736_v38 = vpack.c.bf16 %v1740_v14, %v1739_v12  ;;  %v1674_v7 = vadd.f32 %v1627_v15, %v11623_v24  ;;  %v9688_v17 = vpop.f32.mrb[109].mxu0  ;;  %v10168_v12 = vld [vmem:[%s14155_s5 + $0x44] ss:$8 sps:$4 sm:$0xff]   ;;  %v10182_v14 = vld [vmem:[%s14154_s21 + $0x10] sm:$0xff]   ;;  %v10170_v15 = vld [vmem:[%s14155_s5 + $0x40] ss:$8 sps:$4 sm:$0xff]  }
 0x26c   : > { %v1630_v19 = vpop.f32.mrb[110].mxu0  ;;  %v10174_v17 = vld [vmem:[%s14155_s5 + $0x64] ss:$8 sps:$4 sm:$0xff]  }
 0x26d   : > { %v1711_v21 = vadd.f32 %v11642_v2, %v1674_v7  ;;  %v1675_v13 = vadd.f32 %v1630_v19, %v11625_v27  ;;  %v9689_v42 = vpop.f32.mrb[111].mxu0  ;;  %1902 = vmatpush1.bf16.msra.mxu1 %v11736_v38  ;;  %v10173_v7 = vld [vmem:[%s14155_s5 + $0x50] ss:$8 sps:$4 sm:$0xff]  }
 0x26e   : > { %1903 = vmatprep.subr.bf16.mxu1 %v11000_v8  ;;  %v10183_v19 = vld [vmem:[%s14154_s21 + $0x18] sm:$0xff]  }
 0x26f   : > { %v1712_v26 = vadd.f32 %v11642_v2, %v1675_v13  ;;  %v1741_v23 = vmax.f32 %v1711_v21, 0.0  ;;  %v10184_v21 = vld [vmem:[%s14156_s26] sm:$0xff]   ;;  %v10177_v42 = vld [vmem:[%s14155_s5 + $0x74] ss:$8 sps:$4 sm:$0xff]  }
 0x270   : > { %v10176_v13 = vld [vmem:[%s14155_s5 + $0x60] ss:$8 sps:$4 sm:$0xff]  }
 0x271   : > { %v1742_v29 = vmax.f32 %v1712_v26, 0.0  ;;  %v10179_v26 = vld [vmem:[%s14155_s5 + $0x70] ss:$8 sps:$4 sm:$0xff]  }
 0x272   : > { %v1635_v30 = vpop.f32.mrb[112].mxu0 }
 0x273   : > { %v11744_v5 = vpack.c.bf16 %v1742_v29, %v1741_v23  ;;  %v1676_v24 = vadd.f32 %v1635_v30, %v11627_v40  ;;  %v9692_v33 = vpop.f32.mrb[113].mxu0  ;;  %v10185_v23 = vld [vmem:[%s14156_s26 + $0x8] sm:$0xff]   ;;  %v10186_v29 = vld [vmem:[%s14154_s21 + $0x20] sm:$0xff]   ;;  %v10187_v30 = vld [vmem:[%s14156_s26 + $0x10] sm:$0xff]  }
 0x274   : > { %v1638_v53 = vpop.f32.mrb[114].mxu0  ;;  %v10190_v33 = vld [vmem:[%s14156_s26 + $0x20] sm:$0xff]  }
 0x275   : > { %v1713_v32 = vadd.f32 %v11642_v2, %v1676_v24  ;;  %v1677_v27 = vadd.f32 %v1638_v53, %v11629_v45  ;;  %v9693_v36 = vpop.f32.mrb[115].mxu0  ;;  %1904 = vmatpush1.bf16.msra.mxu1 %v11744_v5  ;;  %v10189_v24 = vld [vmem:[%s14154_s21 + $0x28] sm:$0xff]  }
 0x276   : > { %1905 = vmatprep.subr.bf16.mxu1 %v11000_v8  ;;  %v10191_v53 = vld [vmem:[%s14156_s26 + $0x28] sm:$0xff]   ;;  %v10196_v36 = vld [vmem:[%s14076_s7 + $0x3c] ss:$8 sps:$4 sm:$0xff]  }
 0x277   : > { %v1714_v37 = vadd.f32 %v11642_v2, %v1677_v27  ;;  %v1743_v56 = vmax.f32 %v1713_v32, 0.0  ;;  %v10192_v32 = vld [vmem:[%s14154_s21 + $0x30] sm:$0xff]  }
 0x278   : > { %v10193_v27 = vld [vmem:[%s14156_s26 + $0x30] sm:$0xff]  }
 0x279   : > { %v1744_v35 = vmax.f32 %v1714_v37, 0.0 }
 0x27a   : > { %v1643_v41 = vpop.f32.mrb[116].mxu0 }
 0x27b   : > { %v11752_v18 = vpack.c.bf16 %v1744_v35, %v1743_v56  ;;  %v1678_v40 = vadd.f32 %v1643_v41, %v11631_v60  ;;  %v9696_v50 = vpop.f32.mrb[117].mxu0  ;;  %v10181_v60 = vld [vmem:[%s14154_s21 + $0x8] sm:$0xff]  }
 0x27c   : > { %v1646_v51 = vpop.f32.mrb[118].mxu0  ;;  %9700 = vmatprep.subr.bf16.mxu0 %v10181_v60 }
 0x27d   : > { %v1715_v54 = vadd.f32 %v11642_v2, %v1678_v40  ;;  %v1679_v45 = vadd.f32 %v1646_v51, %v11633_v47  ;;  %v9697_v46 = vpop.f32.mrb[119].mxu0  ;;  %1906 = vmatpush1.bf16.msra.mxu1 %v11752_v18  ;;  %9701 = vmatpush3.bf16.msra.mxu0 %v10181_v60 }
 0x27e   : > { %1907 = vmatprep.subr.bf16.mxu1 %v11000_v8  ;;  %9702 = vmatprep.subr.bf16.mxu0 %v10182_v14 }
 0x27f   : > { %v1716_v55 = vadd.f32 %v11642_v2, %v1679_v45  ;;  %v1745_v58 = vmax.f32 %v1715_v54, 0.0  ;;  %v10132_v2 = vld [vmem:[%s14152_s19] ss:$8 sps:$4 sm:$0xff]  }
 0x281   : > { %v1746_v59 = vmax.f32 %v1716_v55, 0.0  ;;  %9703 = vmatpush3.bf16.msra.mxu0 %v10182_v14 }
 0x282   : > { %9704 = vmatprep.subr.bf16.mxu0 %v10183_v19 }
 0x283   : > { %v1761_v49 = vpack.c.bf16 %v1746_v59, %v1745_v58 }
 0x285   : > { %v11767_v47 = vsel %vm1408_vm4, %v1761_v49, 0  ;;  %9705 = vmatpush3.bf16.msra.mxu0 %v10183_v19 }
 0x286   : > { %1908 = vmatpush1.bf16.msra.mxu1 %v11767_v47  ;;  %9706 = vmatprep.subr.bf16.mxu0 %v10186_v29 }
 0x287   : > { %2088 = vmatprep.subr.bf16.mxu1 %v11000_v8 }
 0x289   : > { %1912 = vmatmul.mubr.bf16.vlgmr.msra.gmra.mrb[60].mxu1 %v10132_v2  ;;  %9707 = vmatpush3.bf16.msra.mxu0 %v10186_v29 }
 0x28a   : > { %2089 = vmatpush1.bf16.msra.mxu1 %v11648_v25  ;;  %8667 = vmatprep.mubr.msk.bf16.mxu1 %vm1850_vm5, %v10135_v61  ;;  %v10140_v25 = vld [vmem:[%s14152_s19 + $0x20] ss:$8 sps:$4 sm:$0xff]  }
 0x28b   : > { %2090 = vmatprep.subr.bf16.mxu1 %v11000_v8  ;;  %9708 = vmatprep.subr.bf16.mxu0 %v10189_v24 }
 0x28d   : > { %9709 = vmatpush3.bf16.msra.mxu0 %v10189_v24 }
 0x28e   : > { %2091 = vmatpush1.bf16.msra.mxu1 %v11656_v43  ;;  %v10141_v43 = vld [vmem:[%s14152_s19 + $0x34] ss:$8 sps:$4 sm:$0xff]   ;;  %9710 = vmatprep.subr.bf16.mxu0 %v10192_v32 }
 0x28f   : > { %2092 = vmatprep.subr.bf16.mxu1 %v11000_v8 }
 0x291   : > { %1920 = vmatmul.mubr.bf16.gmra.mrb[64].mxu1 %v10137_v39  ;;  %9711 = vmatpush3.bf16.msra.mxu0 %v10192_v32 }
 0x292   : > { %2093 = vmatpush1.bf16.msra.mxu1 %v11664_v57  ;;  %8668 = vmatprep.mubr.msk.bf16.mxu1 %vm1850_vm5, %v10138_v28  ;;  %v10143_v57 = vld [vmem:[%s14152_s19 + $0x30] ss:$8 sps:$4 sm:$0xff]  }
 0x293   : > { %2094 = vmatprep.subr.bf16.mxu1 %v11000_v8  ;;  %2709 = vmatprep.subr.bf16.mxu0 %v10196_v36 }
 0x296   : > { %2095 = vmatpush1.bf16.msra.mxu1 %v11672_v16  ;;  %v10144_v16 = vld [vmem:[%s14152_s19 + $0x44] ss:$8 sps:$4 sm:$0xff]  }
 0x297   : > { %2096 = vmatprep.subr.bf16.mxu1 %v11000_v8 }
 0x299   : > { %1928 = vmatmul.mubr.bf16.gmra.mrb[68].mxu1 %v10140_v25 }
 0x29a   : > { %2097 = vmatpush1.bf16.msra.mxu1 %v11680_v34  ;;  %8669 = vmatprep.mubr.msk.bf16.mxu1 %vm1850_vm5, %v10141_v43  ;;  %v10146_v34 = vld [vmem:[%s14152_s19 + $0x40] ss:$8 sps:$4 sm:$0xff]  }
 0x29b   : > { %2098 = vmatprep.subr.bf16.mxu1 %v11000_v8 }
 0x29e   : > { %2099 = vmatpush1.bf16.msra.mxu1 %v11688_v22  ;;  %v10147_v22 = vld [vmem:[%s14152_s19 + $0x54] ss:$8 sps:$4 sm:$0xff]  }
 0x29f   : > { %2100 = vmatprep.subr.bf16.mxu1 %v11000_v8 }
 0x2a1   : > { %1936 = vmatmul.mubr.bf16.gmra.mrb[72].mxu1 %v10143_v57 }
 0x2a2   : > { %2101 = vmatpush1.bf16.msra.mxu1 %v11696_v3  ;;  %8670 = vmatprep.mubr.msk.bf16.mxu1 %vm1850_vm5, %v10144_v16  ;;  %v10149_v3 = vld [vmem:[%s14152_s19 + $0x50] ss:$8 sps:$4 sm:$0xff]  }
 0x2a3   : > { %2102 = vmatprep.subr.bf16.mxu1 %v11000_v8 }
 0x2a6   : > { %2103 = vmatpush1.bf16.msra.mxu1 %v11704_v20  ;;  %v10150_v20 = vld [vmem:[%s14152_s19 + $0x64] ss:$8 sps:$4 sm:$0xff]  }
 0x2a7   : > { %2104 = vmatprep.subr.bf16.mxu1 %v11000_v8 }
 0x2a9   : > { %1944 = vmatmul.mubr.bf16.gmra.mrb[76].mxu1 %v10146_v34 }
 0x2aa   : > { %2105 = vmatpush1.bf16.msra.mxu1 %v11712_v10  ;;  %8671 = vmatprep.mubr.msk.bf16.mxu1 %vm1850_vm5, %v10147_v22  ;;  %v10152_v10 = vld [vmem:[%s14152_s19 + $0x60] ss:$8 sps:$4 sm:$0xff]  }
 0x2ab   : > { %2106 = vmatprep.subr.bf16.mxu1 %v11000_v8 }
 0x2ae   : > { %2107 = vmatpush1.bf16.msra.mxu1 %v11720_v44  ;;  %v10153_v44 = vld [vmem:[%s14152_s19 + $0x74] ss:$8 sps:$4 sm:$0xff]  }
 0x2af   : > { %2108 = vmatprep.subr.bf16.mxu1 %v11000_v8 }
 0x2b1   : > { %1952 = vmatmul.mubr.bf16.gmra.mrb[80].mxu1 %v10149_v3 }
 0x2b2   : > { %2109 = vmatpush1.bf16.msra.mxu1 %v11728_v1  ;;  %8672 = vmatprep.mubr.msk.bf16.mxu1 %vm1850_vm5, %v10150_v20  ;;  %v10158_v1 = vld [vmem:[%s14155_s5 + $0x4] ss:$8 sps:$4 sm:$0xff]  }
 0x2b3   : > { %2110 = vmatprep.subr.bf16.mxu1 %v11000_v8 }
 0x2b6   : > { %2111 = vmatpush1.bf16.msra.mxu1 %v11736_v38  ;;  %v10171_v38 = vld [vmem:[%s14155_s5 + $0x54] ss:$8 sps:$4 sm:$0xff]  }
 0x2b7   : > { %2112 = vmatprep.subr.bf16.mxu1 %v11000_v8 }
 0x2b9   : > { %1960 = vmatmul.mubr.bf16.gmra.mrb[84].mxu1 %v10152_v10 }
 0x2ba   : > { %2113 = vmatpush1.bf16.msra.mxu1 %v11744_v5  ;;  %8673 = vmatprep.mubr.msk.bf16.mxu1 %vm1850_vm5, %v10153_v44  ;;  %v10188_v5 = vld [vmem:[%s14156_s26 + $0x18] sm:$0xff]  }
 0x2bb   : > { %2114 = vmatprep.subr.bf16.mxu1 %v11000_v8 }
 0x2be   : > { %2115 = vmatpush1.bf16.msra.mxu1 %v11752_v18 }
 0x2bf   : > { %2116 = vmatprep.subr.bf16.mxu1 %v11000_v8 }
 0x2c1   : > { %1968 = vmatmul.mubr.bf16.gmra.mrb[88].mxu1 %v10155_v63 }
 0x2c2   : > { %2117 = vmatpush1.bf16.msra.mxu1 %v11767_v47  ;;  %8690 = vmatprep.mubr.msk.bf16.mxu1 %vm1850_vm5, %v10158_v1 }
 0x2c3   : > { %9728 = vmatprep.subr.bf16.mxu1 %v10184_v21 }
 0x2c9   : > { %2121 = vmatmul.mubr.bf16.vlgmr.msra.gmra.mrb[92].mxu1 %v10156_v62 }
 0x2ca   : > { %8691 = vmatprep.mubr.msk.bf16.mxu1 %vm1850_vm5, %v10159_v6  ;;  %9729 = vmatpush3.bf16.msra.mxu1 %v10184_v21 }
 0x2cb   : > { %9730 = vmatprep.subr.bf16.mxu1 %v10185_v23 }
 0x2ce   : > { %9731 = vmatpush3.bf16.msra.mxu1 %v10185_v23 }
 0x2cf   : > { %9732 = vmatprep.subr.bf16.mxu1 %v10187_v30 }
 0x2d1   : > { %2129 = vmatmul.mubr.bf16.gmra.mrb[96].mxu1 %v10161_v31 }
 0x2d2   : > { %8692 = vmatprep.mubr.msk.bf16.mxu1 %vm1850_vm5, %v10162_v4  ;;  %9733 = vmatpush3.bf16.msra.mxu1 %v10187_v30 }
 0x2d3   : > { %9734 = vmatprep.subr.bf16.mxu1 %v10188_v5 }
 0x2d6   : > { %9735 = vmatpush3.bf16.msra.mxu1 %v10188_v5 }
 0x2d7   : > { %9736 = vmatprep.subr.bf16.mxu1 %v10190_v33 }
 0x2d9   : > { %2137 = vmatmul.mubr.bf16.gmra.mrb[100].mxu1 %v10164_v48 }
 0x2da   : > { %8693 = vmatprep.mubr.msk.bf16.mxu1 %vm1850_vm5, %v10165_v9  ;;  %9737 = vmatpush3.bf16.msra.mxu1 %v10190_v33 }
 0x2db   : > { %9738 = vmatprep.subr.bf16.mxu1 %v10191_v53 }
 0x2de   : > { %9739 = vmatpush3.bf16.msra.mxu1 %v10191_v53 }
 0x2df   : > { %9740 = vmatprep.subr.bf16.mxu1 %v10193_v27 }
 0x2e1   : > { %2145 = vmatmul.mubr.bf16.gmra.mrb[104].mxu1 %v10167_v11 }
 0x2e2   : > { %8694 = vmatprep.mubr.msk.bf16.mxu1 %vm1850_vm5, %v10168_v12  ;;  %9741 = vmatpush3.bf16.msra.mxu1 %v10193_v27 }
 0x2e9   : > { %2153 = vmatmul.mubr.bf16.gmra.mrb[108].mxu1 %v10170_v15 }
 0x2ea   : > { %8695 = vmatprep.mubr.msk.bf16.mxu1 %vm1850_vm5, %v10171_v38 }
 0x2f1   : > { %2161 = vmatmul.mubr.bf16.gmra.mrb[112].mxu1 %v10173_v7  ;;  %v10194_v7 = vld [vmem:[%s14076_s7 + $0x38] ss:$8 sps:$4 sm:$0xff]  }
 0x2f2   : > { %8696 = vmatprep.mubr.msk.bf16.mxu1 %vm1850_vm5, %v10174_v17 }
 0x2f9   : > { %2169 = vmatmul.mubr.bf16.gmra.mrb[116].mxu1 %v10176_v13 }
 0x2fa   : > { %8697 = vmatprep.mubr.msk.bf16.mxu1 %vm1850_vm5, %v10177_v42 }
 0x301   : > { %2177 = vmatmul.mubr.bf16.gmra.mrb[120].mxu1 %v10179_v26 }
 0x35c   : > { %v1913_v37 = vpop.f32.mrb[60].mxu1 }
 0x35d   : > { %v1915_v56 = vpop.f32.mrb[61].mxu1 }
 0x35e   : > { %v1916_v35 = vpop.f32.mrb[62].mxu1 }
 0x35f   : > { %v1918_v41 = vpop.f32.mrb[63].mxu1 }
 0x364   : > { %v1921_v18 = vpop.f32.mrb[64].mxu1 }
 0x365   : > { %v1923_v40 = vpop.f32.mrb[65].mxu1 }
 0x366   : > { %v1924_v50 = vpop.f32.mrb[66].mxu1 }
 0x367   : > { %v1926_v51 = vpop.f32.mrb[67].mxu1 }
 0x36c   : > { %v1929_v54 = vpop.f32.mrb[68].mxu1 }
 0x36d   : > { %v1931_v45 = vpop.f32.mrb[69].mxu1 }
 0x36e   : > { %v1932_v46 = vpop.f32.mrb[70].mxu1 }
 0x36f   : > { %v1934_v55 = vpop.f32.mrb[71].mxu1 }
 0x374   : > { %v1937_v58 = vpop.f32.mrb[72].mxu1 }
 0x375   : > { %v1939_v59 = vpop.f32.mrb[73].mxu1 }
 0x376   : > { %v1940_v52 = vpop.f32.mrb[74].mxu1 }
 0x377   : > { %v1942_v60 = vpop.f32.mrb[75].mxu1 }
 0x37c   : > { %v1945_v49 = vpop.f32.mrb[76].mxu1 }
 0x37d   : > { %v1947_v47 = vpop.f32.mrb[77].mxu1 }
 0x37e   : > { %v1948_v2 = vpop.f32.mrb[78].mxu1 }
 0x37f   : > { %v1950_v61 = vpop.f32.mrb[79].mxu1 }
 0x384   : > { %v11947_v39 = vpop.f32.mrb[80].mxu1 }
 0x385   : > { %v1955_v28 = vpop.f32.mrb[81].mxu1 }
 0x386   : > { %v11949_v25 = vpop.f32.mrb[82].mxu1 }
 0x387   : > { %v1958_v43 = vpop.f32.mrb[83].mxu1 }
 0x38c   : > { %v11951_v57 = vpop.f32.mrb[84].mxu1 }
 0x38d   : > { %v1963_v16 = vpop.f32.mrb[85].mxu1 }
 0x38e   : > { %v11953_v34 = vpop.f32.mrb[86].mxu1 }
 0x38f   : > { %v1966_v22 = vpop.f32.mrb[87].mxu1 }
 0x394   : > { %v11955_v3 = vpop.f32.mrb[88].mxu1 }
 0x395   : > { %v1971_v20 = vpop.f32.mrb[89].mxu1 }
 0x396   : > { %v11957_v10 = vpop.f32.mrb[90].mxu1 }
 0x397   : > { %v1974_v44 = vpop.f32.mrb[91].mxu1 }
 0x398   : > { %v8734_v44 = vld [vmem:[%s14076_s7 + $0x68] sm:$0xff] }
 0x39c   : > { %v2122_v63 = vpop.f32.mrb[92].mxu1 }
 0x39d   : > { %v2185_v1 = vmax.f32 %v1913_v37, %v2122_v63  ;;  %v2124_v62 = vpop.f32.mrb[93].mxu1  ;;  %v8742_v63 = vcombine.high %v8734_v44, %v8734_v44 }
 0x39e   : > { %v2125_v6 = vpop.f32.mrb[94].mxu1 }
 0x39f   : > { %v2186_v31 = vmax.f32 %v1916_v35, %v2125_v6  ;;  %v2127_v4 = vpop.f32.mrb[95].mxu1  ;;  %v10207_v6 = vld [vmem:[%s14076_s7 + $0x4] ss:$8 sps:$4 sm:$0xff]  }
 0x3a1   : > { %v2201_v48 = vpack.c.bf16 %v2186_v31, %v2185_v1  ;;  %v8741_v1 = vcombine.low %v8734_v44, %v8734_v44 }
 0x3a3   : > { %9712 = vmatprep.mubr.msk.bf16.mxu0 %vm2265_vm6, %v2201_v48  ;;  %9742 = vmatprep.mubr.msk.bf16.mxu1 %vm2265_vm6, %v2201_v48  ;;  %v2704_v62 = vsel %vm2702_vm7, %v8741_v1, 0 }
 0x3a4   : > { %v2130_v9 = vpop.f32.mrb[96].mxu1 }
 0x3a5   : > { %v2187_v11 = vmax.f32 %v1921_v18, %v2130_v9  ;;  %v2132_v12 = vpop.f32.mrb[97].mxu1 }
 0x3a6   : > { %v2133_v14 = vpop.f32.mrb[98].mxu1 }
 0x3a7   : > { %v2188_v15 = vmax.f32 %v1924_v50, %v2133_v14  ;;  %v2135_v38 = vpop.f32.mrb[99].mxu1 }
 0x3a9   : > { %v2202_v17 = vpack.c.bf16 %v2188_v15, %v2187_v11 }
 0x3ab   : > { %9713 = vmatmul.mubr.msk.bf16.vlgmr.msra.gmra.mrb[120].mxu0 %vm2265_vm6, %v2202_v17  ;;  %9743 = vmatmul.mubr.msk.bf16.vlgmr.msra.gmra.mrb[124].mxu1 %vm2265_vm6, %v2202_v17 }
 0x3ac   : > { %v2138_v19 = vpop.f32.mrb[100].mxu1  ;;  %2710 = vmatpush1.bf16.msra.mxu0 %v10194_v7 }
 0x3ad   : > { %v2189_v21 = vmax.f32 %v1929_v54, %v2138_v19  ;;  %v2140_v13 = vpop.f32.mrb[101].mxu1 }
 0x3ae   : > { %v2141_v42 = vpop.f32.mrb[102].mxu1 }
 0x3af   : > { %v2190_v26 = vmax.f32 %v1932_v46, %v2141_v42  ;;  %v2143_v23 = vpop.f32.mrb[103].mxu1 }
 0x3b1   : > { %v2203_v29 = vpack.c.bf16 %v2190_v26, %v2189_v21 }
 0x3b3   : > { %9716 = vmatprep.mubr.msk.bf16.mxu0 %vm2265_vm6, %v2203_v29  ;;  %9746 = vmatprep.mubr.msk.bf16.mxu1 %vm2265_vm6, %v2203_v29 }
 0x3b4   : > { %v2146_v30 = vpop.f32.mrb[104].mxu1 }
 0x3b5   : > { %v2191_v5 = vmax.f32 %v1937_v58, %v2146_v30  ;;  %v2148_v24 = vpop.f32.mrb[105].mxu1 }
 0x3b6   : > { %v2149_v33 = vpop.f32.mrb[106].mxu1  ;;  %v10205_v24 = vld [vmem:[%s14076_s7] ss:$8 sps:$4 sm:$0xff]  }
 0x3b7   : > { %v2192_v53 = vmax.f32 %v1940_v52, %v2149_v33  ;;  %v2151_v32 = vpop.f32.mrb[107].mxu1  ;;  %v10210_v33 = vld [vmem:[%s14076_s7 + $0x14] ss:$8 sps:$4 sm:$0xff]  }
 0x3b9   : > { %v2204_v27 = vpack.c.bf16 %v2192_v53, %v2191_v5 }
 0x3bb   : > { %9717 = vmatmul.mubr.msk.bf16.gmra.mrb[124].mxu0 %vm2265_vm6, %v2204_v27  ;;  %9747 = vmatmul.mubr.msk.bf16.gmra.mrb[128].mxu1 %vm2265_vm6, %v2204_v27 }
 0x3bc   : > { %v2154_v36 = vpop.f32.mrb[108].mxu1 }
 0x3bd   : > { %v2193_v37 = vmax.f32 %v1945_v49, %v2154_v36  ;;  %v2156_v56 = vpop.f32.mrb[109].mxu1  ;;  %v10208_v36 = vld [vmem:[%s14076_s7 + $0x10] ss:$8 sps:$4 sm:$0xff]  }
 0x3be   : > { %v2157_v35 = vpop.f32.mrb[110].mxu1 }
 0x3bf   : > { %v2194_v41 = vmax.f32 %v1948_v2, %v2157_v35  ;;  %v2159_v18 = vpop.f32.mrb[111].mxu1 }
 0x3c1   : > { %v2205_v40 = vpack.c.bf16 %v2194_v41, %v2193_v37  ;;  %v10213_v41 = vld [vmem:[%s14076_s7 + $0x24] ss:$8 sps:$4 sm:$0xff]  }
 0x3c3   : > { %9720 = vmatprep.mubr.msk.bf16.mxu0 %vm2265_vm6, %v2205_v40  ;;  %9750 = vmatprep.mubr.msk.bf16.mxu1 %vm2265_vm6, %v2205_v40 }
 0x3c4   : > { %v2162_v50 = vpop.f32.mrb[112].mxu1 }
 0x3c5   : > { %v2195_v51 = vmax.f32 %v11947_v39, %v2162_v50  ;;  %v2164_v54 = vpop.f32.mrb[113].mxu1 }
 0x3c6   : > { %v2165_v45 = vpop.f32.mrb[114].mxu1 }
 0x3c7   : > { %v2196_v46 = vmax.f32 %v11949_v25, %v2165_v45  ;;  %v2167_v55 = vpop.f32.mrb[115].mxu1 }
 0x3c9   : > { %v2206_v58 = vpack.c.bf16 %v2196_v46, %v2195_v51  ;;  %v2570_v51 = vld [vmem:[%s14076_s7 + $0x30] sm:$0xff] }
 0x3cb   : > { %9721 = vmatmul.mubr.msk.bf16.gmra.mrb[128].mxu0 %vm2265_vm6, %v2206_v58  ;;  %9751 = vmatmul.mubr.msk.bf16.gmra.mrb[132].mxu1 %vm2265_vm6, %v2206_v58  ;;  %v10211_v58 = vld [vmem:[%s14076_s7 + $0x20] ss:$8 sps:$4 sm:$0xff]  }
 0x3cc   : > { %v2170_v59 = vpop.f32.mrb[116].mxu1 }
 0x3cd   : > { %v2197_v52 = vmax.f32 %v11951_v57, %v2170_v59  ;;  %v2172_v60 = vpop.f32.mrb[117].mxu1  ;;  %v10199_v57 = vld [vmem:[%s14076_s7 + $0x4c] ss:$8 sps:$4 sm:$0xff]  }
 0x3ce   : > { %v2173_v49 = vpop.f32.mrb[118].mxu1  ;;  %2711 = vmatprep.subr.bf16.mxu0 %v10199_v57  ;;  %v8758_v60 = vcombine.low %v2570_v51, %v2570_v51 }
 0x3cf   : > { %v2198_v47 = vmax.f32 %v11953_v34, %v2173_v49  ;;  %v2175_v2 = vpop.f32.mrb[119].mxu1  ;;  %v10197_v34 = vld [vmem:[%s14076_s7 + $0x48] ss:$8 sps:$4 sm:$0xff]  }
 0x3d0   : > { %2712 = vmatpush1.bf16.msra.mxu0 %v10197_v34 }
 0x3d1   : > { %v2207_v61 = vpack.c.bf16 %v2198_v47, %v2197_v52  ;;  %v8759_v52 = vcombine.high %v2570_v51, %v2570_v51 }
 0x3d3   : > { %9724 = vmatprep.mubr.msk.bf16.mxu0 %vm2265_vm6, %v2207_v61  ;;  %9754 = vmatprep.mubr.msk.bf16.mxu1 %vm2265_vm6, %v2207_v61  ;;  %v2874_v61 = vsel %vm2702_vm7, %v8758_v60, 0 }
 0x3d4   : > { %v2178_v39 = vpop.f32.mrb[120].mxu1 }
 0x3d5   : > { %v2199_v28 = vmax.f32 %v11955_v3, %v2178_v39  ;;  %v2180_v25 = vpop.f32.mrb[121].mxu1  ;;  %v10202_v3 = vld [vmem:[%s14076_s7 + $0x5c] ss:$8 sps:$4 sm:$0xff]  }
 0x3d6   : > { %v2181_v43 = vpop.f32.mrb[122].mxu1  ;;  %2713 = vmatprep.subr.bf16.mxu0 %v10202_v3  ;;  %v10218_v39 = vld [vmem:[%s14076_s7 + $0x74] ss:$8 sps:$4 sm:$0xff]  }
 0x3d7   : > { %v2200_v16 = vmax.f32 %v11957_v10, %v2181_v43  ;;  %v2183_v22 = vpop.f32.mrb[123].mxu1  ;;  %v10200_v10 = vld [vmem:[%s14076_s7 + $0x58] ss:$8 sps:$4 sm:$0xff]  }
 0x3d8   : > { %2714 = vmatpush1.bf16.msra.mxu0 %v10200_v10 }
 0x3d9   : > { %v2208_v20 = vpack.c.bf16 %v2200_v16, %v2199_v28  ;;  %8743 = vmatprep.subr.msk.bf16.mxu0 %vm2702_vm7, %v8742_v63 }
 0x3db   : > { %9725 = vmatmul.mubr.msk.bf16.gmra.mrb[132].mxu0 %vm2265_vm6, %v2208_v20  ;;  %9755 = vmatmul.mubr.msk.bf16.gmra.mrb[136].mxu1 %vm2265_vm6, %v2208_v20 }
 0x3dc   : > { %2741 = vmatprep.mubr.bf16.mxu0 %v11000_v8  ;;  %3444 = vmatprep.mubr.bf16.mxu1 %v11000_v8 }
 0x3dd   : > { %2716 = vmatpush1.bf16.msra.mxu0 %v2704_v62 }
 0x3de   : > { %2879 = vmatprep.subr.bf16.mxu0 %v10207_v6 }
 0x47e   : > { %v9714_v31 = vpop.f32.mrb[120].mxu0  ;;  %v9744_v4 = vpop.f32.mrb[124].mxu1 }
 0x47f   : > { %v2542_v48 = vmax.f32 %v9714_v31, %v9744_v4  ;;  %v2324_v9 = vpop.f32.mrb[121].mxu0  ;;  %v2477_v11 = vpop.f32.mrb[125].mxu1 }
 0x480   : > { %v2540_v12 = vmax.f32 %v2324_v9, %v2477_v11  ;;  %v9715_v14 = vpop.f32.mrb[122].mxu0  ;;  %v9745_v15 = vpop.f32.mrb[126].mxu1 }
 0x481   : > { %v2543_v38 = vmax.f32 %v9715_v14, %v9745_v15  ;;  %v2327_v7 = vpop.f32.mrb[123].mxu0  ;;  %v2480_v17 = vpop.f32.mrb[127].mxu1 }
 0x482   : > { %v2541_v19 = vmax.f32 %v2327_v7, %v2480_v17 }
 0x483   : > { %v12006_v21 = vpack.c.bf16 %v2543_v38, %v2542_v48 }
 0x484   : > { %v12008_v13 = vpack.c.bf16 %v2541_v19, %v2540_v12 }
 0x485   : > { %v2587_v42 = vshll.u32 %v12006_v21, 16  ;;  %v2591_v47 = vshrl.u32 %v12006_v21, 16 }
 0x486   : > { %v2582_v26 = vshll.u32 %v12008_v13, 16  ;;  %v2580_v23 = vshrl.u32 %v12008_v13, 16 }
 0x487   : > { %v2589_v30 = vrot.slane %v2587_v42, 1 }
 0x488   : > { %v2584_v29 = vrot.slane %v2582_v26, 1 }
 0x489   : > { %v2593_v28 = vor.u32 %v2591_v47, %v2589_v30 }
 0x48a   : > { %v2585_v5 = vor.u32 %v2584_v29, %v2580_v23 }
 0x48c   : > { %v2590_v53 = vsel %vm872_vm3, %v2585_v5, %v2589_v30 }
 0x48d   : > { %8744 = vmatmul.mubr.msk.bf16.vlgmr.msra.gmra.mrb[136].mxu0 %vm2677_vm8, %v2590_v53 }
 0x48e   : > { %v9718_v32 = vpop.f32.mrb[124].mxu0  ;;  %v9748_v27 = vpop.f32.mrb[128].mxu1  ;;  %2880 = vmatpush1.bf16.msra.mxu0 %v10205_v24  ;;  %2751 = vmatprep.mubr.bf16.mxu0 %v11000_v8 }
 0x48f   : > { %v2546_v37 = vmax.f32 %v9718_v32, %v9748_v27  ;;  %v2340_v56 = vpop.f32.mrb[125].mxu0  ;;  %v2493_v35 = vpop.f32.mrb[129].mxu1  ;;  %2881 = vmatprep.subr.bf16.mxu0 %v10210_v33 }
 0x490   : > { %v2544_v18 = vmax.f32 %v2340_v56, %v2493_v35  ;;  %v9719_v40 = vpop.f32.mrb[126].mxu0  ;;  %v9749_v50 = vpop.f32.mrb[130].mxu1 }
 0x491   : > { %v2547_v54 = vmax.f32 %v9719_v40, %v9749_v50  ;;  %v2343_v45 = vpop.f32.mrb[127].mxu0  ;;  %v2496_v46 = vpop.f32.mrb[131].mxu1 }
 0x492   : > { %v2545_v55 = vmax.f32 %v2343_v45, %v2496_v46  ;;  %2882 = vmatpush1.bf16.msra.mxu0 %v10208_v36 }
 0x493   : > { %v12034_v59 = vpack.c.bf16 %v2547_v54, %v2546_v37  ;;  %2883 = vmatprep.subr.bf16.mxu0 %v10213_v41 }
 0x494   : > { %v12036_v49 = vpack.c.bf16 %v2545_v55, %v2544_v18 }
 0x495   : > { %v2603_v22 = vshll.u32 %v12034_v59, 16  ;;  %v2607_v15 = vshrl.u32 %v12034_v59, 16 }
 0x496   : > { %v2595_v2 = vshll.u32 %v12036_v49, 16  ;;  %2884 = vmatpush1.bf16.msra.mxu0 %v10211_v58  ;;  %v2599_v16 = vshrl.u32 %v12036_v49, 16 }
 0x497   : > { %8760 = vmatprep.subr.msk.bf16.mxu0 %vm2702_vm7, %v8759_v52  ;;  %v2605_v6 = vrot.slane %v2603_v22, 1  ;;  %v8775_v22 = vld [vmem:[%s14076_s7 + $0xa0] sm:$0xff] }
 0x498   : > { %v2597_v25 = vrot.slane %v2595_v2, 1 }
 0x499   : > { %v2609_v7 = vor.u32 %v2607_v15, %v2605_v6 }
 0x49a   : > { %v2598_v43 = vsel %vm872_vm3, %v2593_v28, %v2597_v25  ;;  %2886 = vmatpush1.bf16.msra.mxu0 %v2874_v61  ;;  %v2601_v34 = vor.u32 %v2599_v16, %v2597_v25  ;;  %v10216_v28 = vld [vmem:[%s14076_s7 + $0x70] ss:$8 sps:$4 sm:$0xff]   ;;  %v10221_v25 = vld [vmem:[%s14076_s7 + $0x84] ss:$8 sps:$4 sm:$0xff]   ;;  %v10224_v16 = vld [vmem:[%s14076_s7 + $0x94] ss:$8 sps:$4 sm:$0xff]  }
 0x49b   : > { %8745 = vmatmul.mubr.msk.bf16.gmra.mrb[140].mxu0 %vm2677_vm8, %v2598_v43  ;;  %3088 = vmatprep.subr.bf16.mxu0 %v10218_v39  ;;  %v10219_v43 = vld [vmem:[%s14076_s7 + $0x80] ss:$8 sps:$4 sm:$0xff]  }
 0x49c   : > { %2761 = vmatprep.mubr.bf16.mxu0 %v11000_v8  ;;  %v2606_v11 = vsel %vm872_vm3, %v2601_v34, %v2605_v6  ;;  %v8782_v34 = vcombine.low %v8775_v22, %v8775_v22  ;;  %v3013_v6 = vrot.slane %v12034_v59, 1 }
 0x49e   : > { %v9722_v20 = vpop.f32.mrb[128].mxu0  ;;  %v9752_v57 = vpop.f32.mrb[132].mxu1 }
 0x49f   : > { %v2550_v3 = vmax.f32 %v9722_v20, %v9752_v57  ;;  %v2356_v10 = vpop.f32.mrb[129].mxu0  ;;  %v2509_v44 = vpop.f32.mrb[133].mxu1  ;;  %v10222_v20 = vld [vmem:[%s14076_s7 + $0x90] ss:$8 sps:$4 sm:$0xff]   ;;  %v8783_v57 = vcombine.high %v8775_v22, %v8775_v22 }
 0x4a0   : > { %v2548_v63 = vmax.f32 %v2356_v10, %v2509_v44  ;;  %v9723_v1 = vpop.f32.mrb[130].mxu0  ;;  %v9753_v62 = vpop.f32.mrb[134].mxu1  ;;  %v3009_v10 = vrot.slane %v12006_v21, 1  ;;  %v3008_v44 = vrot.slane %v12008_v13, 1 }
 0x4a1   : > { %v2551_v31 = vmax.f32 %v9723_v1, %v9753_v62  ;;  %v2359_v4 = vpop.f32.mrb[131].mxu0  ;;  %v2512_v48 = vpop.f32.mrb[135].mxu1  ;;  %v3011_v1 = vrot.slane %v12036_v49, 1 }
 0x4a2   : > { %v2549_v9 = vmax.f32 %v2359_v4, %v2512_v48 }
 0x4a3   : > { %v12051_v12 = vpack.c.bf16 %v2551_v31, %v2550_v3  ;;  %8746 = vmatmul.mubr.msk.bf16.gmra.mrb[144].mxu0 %vm2677_vm8, %v2606_v11  ;;  %v3083_v3 = vsel %vm2702_vm7, %v8782_v34, 0  ;;  %v3012_v62 = vsel %vm1408_vm4, %v3009_v10, %v3011_v1 }
 0x4a4   : > { %v12054_v14 = vpack.c.bf16 %v2549_v9, %v2548_v63  ;;  %2771 = vmatprep.mubr.bf16.mxu0 %v11000_v8  ;;  %v3010_v63 = vsel %vm1408_vm4, %v3008_v44, %v3009_v10 }
 0x4a5   : > { %v2619_v26 = vshll.u32 %v12051_v12, 16  ;;  %v2623_v51 = vshrl.u32 %v12051_v12, 16 }
 0x4a6   : > { %v2611_v38 = vshll.u32 %v12054_v14, 16  ;;  %v2615_v42 = vshrl.u32 %v12054_v14, 16 }
 0x4a7   : > { %v2621_v36 = vrot.slane %v2619_v26, 1 }
 0x4a8   : > { %v2613_v17 = vrot.slane %v2611_v38, 1  ;;  %v3233_v38 = vld [vmem:[%s14077_s8] sm:$0x3] }
 0x4a9   : > { %v2625_v45 = vor.u32 %v2623_v51, %v2621_v36 }
 0x4aa   : > { %v2614_v19 = vsel %vm872_vm3, %v2609_v7, %v2613_v17  ;;  %v2617_v30 = vor.u32 %v2615_v42, %v2613_v17 }
 0x4ab   : > { %8747 = vmatmul.mubr.msk.bf16.gmra.mrb[148].mxu0 %vm2677_vm8, %v2614_v19 }
 0x4ac   : > { %2781 = vmatprep.mubr.bf16.mxu0 %v11000_v8  ;;  %v2622_v18 = vsel %vm872_vm3, %v2617_v30, %v2621_v36 }
 0x4ae   : > { %v9726_v23 = vpop.f32.mrb[132].mxu0  ;;  %v9756_v29 = vpop.f32.mrb[136].mxu1 }
 0x4af   : > { %v2554_v5 = vmax.f32 %v9726_v23, %v9756_v29  ;;  %v2372_v24 = vpop.f32.mrb[133].mxu0  ;;  %v2525_v33 = vpop.f32.mrb[137].mxu1 }
 0x4b0   : > { %v2552_v53 = vmax.f32 %v2372_v24, %v2525_v33  ;;  %v9727_v32 = vpop.f32.mrb[134].mxu0  ;;  %v9757_v27 = vpop.f32.mrb[138].mxu1 }
 0x4b1   : > { %v2555_v37 = vmax.f32 %v9727_v32, %v9757_v27  ;;  %v2375_v56 = vpop.f32.mrb[135].mxu0  ;;  %v2528_v35 = vpop.f32.mrb[139].mxu1 }
 0x4b2   : > { %v2553_v41 = vmax.f32 %v2375_v56, %v2528_v35 }
 0x4b3   : > { %v12065_v40 = vpack.c.bf16 %v2555_v37, %v2554_v5  ;;  %8748 = vmatmul.mubr.msk.bf16.gmra.mrb[152].mxu0 %vm2677_vm8, %v2622_v18 }
 0x4b4   : > { %v12068_v50 = vpack.c.bf16 %v2553_v41, %v2552_v53  ;;  %2791 = vmatprep.mubr.bf16.mxu0 %v11000_v8 }
 0x4b5   : > { %v2635_v52 = vshll.u32 %v12065_v40, 16  ;;  %v2639_v61 = vshrl.u32 %v12065_v40, 16  ;;  %v3021_v9 = vrot.slane %v12065_v40, 1 }
 0x4b6   : > { %v2627_v54 = vshll.u32 %v12068_v50, 16  ;;  %v2631_v58 = vshrl.u32 %v12068_v50, 16 }
 0x4b7   : > { %v2637_v47 = vrot.slane %v2635_v52, 1 }
 0x4b8   : > { %v2629_v46 = vrot.slane %v2627_v54, 1 }
 0x4b9   : > { %v2641_v39 = vor.u32 %v2639_v61, %v2637_v47 }
 0x4ba   : > { %v2630_v55 = vsel %vm872_vm3, %v2625_v45, %v2629_v46  ;;  %v2633_v60 = vor.u32 %v2631_v58, %v2629_v46 }
 0x4bb   : > { %8749 = vmatmul.mubr.msk.bf16.gmra.mrb[156].mxu0 %vm2677_vm8, %v2630_v55 }
 0x4bc   : > { %2801 = vmatprep.mubr.bf16.mxu0 %v11000_v8  ;;  %v2638_v2 = vsel %vm872_vm3, %v2633_v60, %v2637_v47 }
 0x4c3   : > { %8750 = vmatmul.mubr.msk.bf16.gmra.mrb[160].mxu0 %vm2677_vm8, %v2638_v2 }
 0x4c4   : > { %2811 = vmatprep.mubr.bf16.mxu0 %v11000_v8 }
 0x4cb   : > { %8751 = vmatmul.mubr.msk.bf16.gmra.mrb[164].mxu0 %vm2677_vm8, %v2641_v39 }
 0x4cc   : > { %2911 = vmatprep.mubr.bf16.mxu0 %v11000_v8 }
 0x4d3   : > { %8761 = vmatmul.mubr.msk.bf16.vlgmr.msra.gmra.mrb[136].mxu0 %vm2677_vm8, %v12008_v13  ;;  %v3015_v13 = vrot.slane %v12054_v14, 1 }
 0x4d4   : > { %3089 = vmatpush1.bf16.msra.mxu0 %v10216_v28  ;;  %2921 = vmatprep.mubr.bf16.mxu0 %v11000_v8 }
 0x4d5   : > { %3090 = vmatprep.subr.bf16.mxu0 %v10221_v25  ;;  %v3016_v31 = vsel %vm1408_vm4, %v3013_v6, %v3015_v13 }
 0x4d8   : > { %3091 = vmatpush1.bf16.msra.mxu0 %v10219_v43 }
 0x4d9   : > { %3092 = vmatprep.subr.bf16.mxu0 %v10224_v16 }
 0x4db   : > { %8762 = vmatmul.mubr.msk.bf16.gmra.mrb[140].mxu0 %vm2677_vm8, %v12006_v21  ;;  %v3014_v21 = vsel %vm1408_vm4, %v3011_v1, %v3013_v6 }
 0x4dc   : > { %2931 = vmatprep.mubr.bf16.mxu0 %v11000_v8  ;;  %3093 = vmatpush1.bf16.msra.mxu0 %v10222_v20 }
 0x4dd   : > { %8784 = vmatprep.subr.msk.bf16.mxu0 %vm2702_vm7, %v8783_v57 }
 0x4e0   : > { %3095 = vmatpush1.bf16.msra.mxu0 %v3083_v3 }
 0x4e3   : > { %8763 = vmatmul.mubr.msk.bf16.gmra.mrb[144].mxu0 %vm2677_vm8, %v12036_v49  ;;  %v3017_v49 = vrot.slane %v12051_v12, 1 }
 0x4e4   : > { %2941 = vmatprep.mubr.bf16.mxu0 %v11000_v8 }
 0x4e5   : > { %v3018_v4 = vsel %vm1408_vm4, %v3015_v13, %v3017_v49 }
 0x4eb   : > { %8764 = vmatmul.mubr.msk.bf16.gmra.mrb[148].mxu0 %vm2677_vm8, %v12034_v59  ;;  %v3019_v59 = vrot.slane %v12068_v50, 1 }
 0x4ec   : > { %2951 = vmatprep.mubr.bf16.mxu0 %v11000_v8 }
 0x4ed   : > { %v3020_v48 = vsel %vm1408_vm4, %v3017_v49, %v3019_v59  ;;  %v3022_v11 = vsel %vm1408_vm4, %v3019_v59, %v3021_v9 }
 0x4f3   : > { %8765 = vmatmul.mubr.msk.bf16.gmra.mrb[152].mxu0 %vm2677_vm8, %v12054_v14 }
 0x4f4   : > { %2961 = vmatprep.mubr.bf16.mxu0 %v11000_v8 }
 0x4fb   : > { %8766 = vmatmul.mubr.msk.bf16.gmra.mrb[156].mxu0 %vm2677_vm8, %v12051_v12  ;;  %v3235_v12 = vlaneseq }
 0x4fc   : > { %2971 = vmatprep.mubr.bf16.mxu0 %v11000_v8 }
 0x4fd   : > { %v12159_v14 = vshrl.u32 %v3235_v12, 7 }
 0x4ff   : > { %v3237_v15 = vsub.s32 0, %v12159_v14  ;;  %v3241_v7 = vsub.s32 1, %v12159_v14 }
 0x501   : > { %v12168_v17 = vrot.slane %v3233_v38, %v3237_v15  ;;  %v12172_v19 = vrot.slane %v3233_v38, %v3241_v7 }
 0x503   : > { %8767 = vmatmul.mubr.msk.bf16.gmra.mrb[160].mxu0 %vm2677_vm8, %v12068_v50 }
 0x504   : > { %2981 = vmatprep.mubr.bf16.mxu0 %v11000_v8 }
 0x50b   : > { %8768 = vmatmul.mubr.msk.bf16.gmra.mrb[164].mxu0 %vm2677_vm8, %v12065_v40 }
 0x50c   : > { %3120 = vmatprep.mubr.bf16.mxu0 %v11000_v8 }
 0x513   : > { %8785 = vmatmul.mubr.msk.bf16.vlgmr.msra.gmra.mrb[136].mxu0 %vm2677_vm8, %v3010_v63 }
 0x514   : > { %3130 = vmatprep.mubr.bf16.mxu0 %v11000_v8 }
 0x51b   : > { %8786 = vmatmul.mubr.msk.bf16.gmra.mrb[140].mxu0 %vm2677_vm8, %v3012_v62 }
 0x51c   : > { %3140 = vmatprep.mubr.bf16.mxu0 %v11000_v8 }
 0x523   : > { %8787 = vmatmul.mubr.msk.bf16.gmra.mrb[144].mxu0 %vm2677_vm8, %v3014_v21 }
 0x524   : > { %3150 = vmatprep.mubr.bf16.mxu0 %v11000_v8 }
 0x52b   : > { %8788 = vmatmul.mubr.msk.bf16.gmra.mrb[148].mxu0 %vm2677_vm8, %v3016_v31 }
 0x52c   : > { %3160 = vmatprep.mubr.bf16.mxu0 %v11000_v8 }
 0x533   : > { %8789 = vmatmul.mubr.msk.bf16.gmra.mrb[152].mxu0 %vm2677_vm8, %v3018_v4 }
 0x534   : > { %3170 = vmatprep.mubr.bf16.mxu0 %v11000_v8 }
 0x53b   : > { %8790 = vmatmul.mubr.msk.bf16.gmra.mrb[156].mxu0 %vm2677_vm8, %v3020_v48 }
 0x53c   : > { %3180 = vmatprep.mubr.bf16.mxu0 %v11000_v8 }
 0x543   : > { %8791 = vmatmul.mubr.msk.bf16.gmra.mrb[160].mxu0 %vm2677_vm8, %v3022_v11 }
 0x544   : > { %3190 = vmatprep.mubr.bf16.mxu0 %v11000_v8 }
 0x54b   : > { %8792 = vmatmul.mubr.msk.bf16.gmra.mrb[164].mxu0 %vm2677_vm8, %v3021_v9 }
 0x54c   : > { %5809 = vmatprep.mubr.bf16.mxu0 %v11000_v8 }
 0x5e6   : > { %v3122_v42 = vpop.f32.mrb[136].mxu0 }
 0x5e7   : > { %v3245_v26 = vadd.f32 %v12168_v17, %v3122_v42  ;;  %v3124_v23 = vpop.f32.mrb[137].mxu0 }
 0x5e8   : > { %v3246_v29 = vadd.f32 %v12172_v19, %v3124_v23  ;;  %v3126_v30 = vpop.f32.mrb[138].mxu0 }
 0x5e9   : > { %v3247_v5 = vadd.f32 %v12168_v17, %v3126_v30  ;;  %v3128_v24 = vpop.f32.mrb[139].mxu0  ;;  %v3277_v53 = vmax.f32 %v3245_v26, 0.0 }
 0x5ea   : > { %v3248_v33 = vadd.f32 %v12172_v19, %v3128_v24  ;;  %v3278_v27 = vmax.f32 %v3246_v29, 0.0 }
 0x5eb   : > { %v3279_v32 = vmax.f32 %v3247_v5, 0.0 }
 0x5ec   : > { %v3280_v36 = vmax.f32 %v3248_v33, 0.0 }
 0x5ed   : > { %v3309_v37 = vpack.c.bf16 %v3279_v32, %v3277_v53 }
 0x5ee   : > { %v3310_v56 = vpack.c.bf16 %v3280_v36, %v3278_v27  ;;  %v3132_v35 = vpop.f32.mrb[140].mxu0 }
 0x5ef   : > { %v3249_v41 = vadd.f32 %v12168_v17, %v3132_v35  ;;  %v3134_v18 = vpop.f32.mrb[141].mxu0 }
 0x5f0   : > { %v3250_v40 = vadd.f32 %v12172_v19, %v3134_v18  ;;  %v3136_v50 = vpop.f32.mrb[142].mxu0  ;;  %3412 = vmatprep.subr.bf16.mxu1 %v3310_v56 }
 0x5f1   : > { %v3251_v51 = vadd.f32 %v12168_v17, %v3136_v50  ;;  %v3138_v54 = vpop.f32.mrb[143].mxu0  ;;  %3413 = vmatpush1.bf16.msra.mxu1 %v3309_v37  ;;  %v3281_v46 = vmax.f32 %v3249_v41, 0.0 }
 0x5f2   : > { %v3252_v45 = vadd.f32 %v12172_v19, %v3138_v54  ;;  %v3282_v58 = vmax.f32 %v3250_v40, 0.0 }
 0x5f3   : > { %v3283_v55 = vmax.f32 %v3251_v51, 0.0 }
 0x5f4   : > { %v3284_v52 = vmax.f32 %v3252_v45, 0.0 }
 0x5f5   : > { %v3311_v60 = vpack.c.bf16 %v3283_v55, %v3281_v46 }
 0x5f6   : > { %v3312_v47 = vpack.c.bf16 %v3284_v52, %v3282_v58  ;;  %v3142_v2 = vpop.f32.mrb[144].mxu0 }
 0x5f7   : > { %v3253_v61 = vadd.f32 %v12168_v17, %v3142_v2  ;;  %v3144_v39 = vpop.f32.mrb[145].mxu0 }
 0x5f8   : > { %v3254_v28 = vadd.f32 %v12172_v19, %v3144_v39  ;;  %v3146_v25 = vpop.f32.mrb[146].mxu0  ;;  %3414 = vmatprep.subr.bf16.mxu1 %v3312_v47 }
 0x5f9   : > { %v3255_v43 = vadd.f32 %v12168_v17, %v3146_v25  ;;  %v3148_v16 = vpop.f32.mrb[147].mxu0  ;;  %3415 = vmatpush1.bf16.msra.mxu1 %v3311_v60  ;;  %v3285_v20 = vmax.f32 %v3253_v61, 0.0 }
 0x5fa   : > { %v3256_v22 = vadd.f32 %v12172_v19, %v3148_v16  ;;  %v3286_v34 = vmax.f32 %v3254_v28, 0.0 }
 0x5fb   : > { %v3287_v57 = vmax.f32 %v3255_v43, 0.0 }
 0x5fc   : > { %v3288_v3 = vmax.f32 %v3256_v22, 0.0 }
 0x5fd   : > { %v3313_v10 = vpack.c.bf16 %v3287_v57, %v3285_v20 }
 0x5fe   : > { %v3314_v44 = vpack.c.bf16 %v3288_v3, %v3286_v34  ;;  %v3152_v63 = vpop.f32.mrb[148].mxu0 }
 0x5ff   : > { %v3257_v1 = vadd.f32 %v12168_v17, %v3152_v63  ;;  %v3154_v62 = vpop.f32.mrb[149].mxu0 }
 0x600   : > { %v3258_v6 = vadd.f32 %v12172_v19, %v3154_v62  ;;  %v3156_v21 = vpop.f32.mrb[150].mxu0  ;;  %3416 = vmatprep.subr.bf16.mxu1 %v3314_v44 }
 0x601   : > { %v3259_v13 = vadd.f32 %v12168_v17, %v3156_v21  ;;  %v3158_v31 = vpop.f32.mrb[151].mxu0  ;;  %3417 = vmatpush1.bf16.msra.mxu1 %v3313_v10  ;;  %v3289_v4 = vmax.f32 %v3257_v1, 0.0 }
 0x602   : > { %v3260_v49 = vadd.f32 %v12172_v19, %v3158_v31  ;;  %v3290_v48 = vmax.f32 %v3258_v6, 0.0 }
 0x603   : > { %v3291_v59 = vmax.f32 %v3259_v13, 0.0 }
 0x604   : > { %v3292_v9 = vmax.f32 %v3260_v49, 0.0 }
 0x605   : > { %v3315_v11 = vpack.c.bf16 %v3291_v59, %v3289_v4 }
 0x606   : > { %v3316_v12 = vpack.c.bf16 %v3292_v9, %v3290_v48  ;;  %v3162_v38 = vpop.f32.mrb[152].mxu0 }
 0x607   : > { %v3261_v42 = vadd.f32 %v12168_v17, %v3162_v38  ;;  %v3164_v26 = vpop.f32.mrb[153].mxu0 }
 0x608   : > { %v3262_v23 = vadd.f32 %v12172_v19, %v3164_v26  ;;  %v3166_v29 = vpop.f32.mrb[154].mxu0  ;;  %3418 = vmatprep.subr.bf16.mxu1 %v3316_v12  ;;  %v10237_v12 = vld [vmem:[%s14079_s10 + $0x1c4] ss:$16 sps:$4 sm:$0xff]   ;;  %v10238_v26 = vld [vmem:[%s14079_s10 + $0x1e0] ss:$16 sps:$4 sm:$0xff]  }
 0x609   : > { %v3263_v30 = vadd.f32 %v12168_v17, %v3166_v29  ;;  %v3168_v5 = vpop.f32.mrb[155].mxu0  ;;  %3419 = vmatpush1.bf16.msra.mxu1 %v3315_v11  ;;  %v3293_v33 = vmax.f32 %v3261_v42, 0.0  ;;  %v10240_v42 = vld [vmem:[%s14079_s10 + $0x1e4] ss:$16 sps:$4 sm:$0xff]   ;;  %v10228_v29 = vld [vmem:[%s14078_s9 + $0x8] sm:$0xff]  }
 0x60a   : > { %v3264_v24 = vadd.f32 %v12172_v19, %v3168_v5  ;;  %v3294_v32 = vmax.f32 %v3262_v23, 0.0  ;;  %v10243_v23 = vld [vmem:[%s14079_s10 + $0x204] ss:$16 sps:$4 sm:$0xff]  }
 0x60b   : > { %v3295_v53 = vmax.f32 %v3263_v30, 0.0  ;;  %v10241_v30 = vld [vmem:[%s14079_s10 + $0x200] ss:$16 sps:$4 sm:$0xff]   ;;  %v10246_v5 = vld [vmem:[%s14079_s10 + $0x224] ss:$16 sps:$4 sm:$0xff]  }
 0x60c   : > { %v3296_v27 = vmax.f32 %v3264_v24, 0.0  ;;  %v10244_v24 = vld [vmem:[%s14079_s10 + $0x220] ss:$16 sps:$4 sm:$0xff]  }
 0x60d   : > { %v3317_v36 = vpack.c.bf16 %v3295_v53, %v3293_v33  ;;  %v10249_v33 = vld [vmem:[%s14079_s10 + $0x244] ss:$16 sps:$4 sm:$0xff]  }
 0x60e   : > { %v3318_v37 = vpack.c.bf16 %v3296_v27, %v3294_v32  ;;  %v3172_v56 = vpop.f32.mrb[156].mxu0  ;;  %v10229_v53 = vld [vmem:[%s14078_s9 + $0x10] sm:$0xff]  }
 0x60f   : > { %v3265_v35 = vadd.f32 %v12168_v17, %v3172_v56  ;;  %v3174_v41 = vpop.f32.mrb[157].mxu0  ;;  %v10247_v32 = vld [vmem:[%s14079_s10 + $0x240] ss:$16 sps:$4 sm:$0xff]   ;;  %v10252_v27 = vld [vmem:[%s14079_s10 + $0x264] ss:$16 sps:$4 sm:$0xff]   ;;  %v10230_v56 = vld [vmem:[%s14078_s9 + $0x18] sm:$0xff]  }
 0x610   : > { %v3266_v18 = vadd.f32 %v12172_v19, %v3174_v41  ;;  %v3176_v40 = vpop.f32.mrb[158].mxu0  ;;  %3420 = vmatprep.subr.bf16.mxu1 %v3318_v37  ;;  %v10255_v37 = vld [vmem:[%s14079_s10 + $0x284] ss:$16 sps:$4 sm:$0xff]  }
 0x611   : > { %v3267_v50 = vadd.f32 %v12168_v17, %v3176_v40  ;;  %v3178_v51 = vpop.f32.mrb[159].mxu0  ;;  %3421 = vmatpush1.bf16.msra.mxu1 %v3317_v36  ;;  %v3297_v45 = vmax.f32 %v3265_v35, 0.0  ;;  %v10250_v36 = vld [vmem:[%s14079_s10 + $0x260] ss:$16 sps:$4 sm:$0xff]   ;;  %v10258_v41 = vld [vmem:[%s14079_s10 + $0x2a4] ss:$16 sps:$4 sm:$0xff]  }
 0x612   : > { %v3268_v54 = vadd.f32 %v12172_v19, %v3178_v51  ;;  %v3298_v55 = vmax.f32 %v3266_v18, 0.0  ;;  %v10253_v35 = vld [vmem:[%s14079_s10 + $0x280] ss:$16 sps:$4 sm:$0xff]   ;;  %v10261_v40 = vld [vmem:[%s14079_s10 + $0x2c4] ss:$16 sps:$4 sm:$0xff]  }
 0x613   : > { %v3299_v46 = vmax.f32 %v3267_v50, 0.0  ;;  %v10256_v18 = vld [vmem:[%s14079_s10 + $0x2a0] ss:$16 sps:$4 sm:$0xff]  }
 0x614   : > { %v3300_v58 = vmax.f32 %v3268_v54, 0.0  ;;  %v10231_v50 = vld [vmem:[%s14078_s9 + $0x20] sm:$0xff]   ;;  %v10232_v54 = vld [vmem:[%s14078_s9 + $0x28] sm:$0xff]  }
 0x615   : > { %v3319_v52 = vpack.c.bf16 %v3299_v46, %v3297_v45  ;;  %v10259_v51 = vld [vmem:[%s14079_s10 + $0x2c0] ss:$16 sps:$4 sm:$0xff]   ;;  %v10234_v46 = vld [vmem:[%s14078_s9 + $0x38] sm:$0xff]  }
 0x616   : > { %v3320_v60 = vpack.c.bf16 %v3300_v58, %v3298_v55  ;;  %v3182_v47 = vpop.f32.mrb[160].mxu0  ;;  %v10233_v45 = vld [vmem:[%s14078_s9 + $0x30] sm:$0xff]  }
 0x617   : > { %v3269_v2 = vadd.f32 %v12168_v17, %v3182_v47  ;;  %v3184_v61 = vpop.f32.mrb[161].mxu0  ;;  %v10264_v55 = vld [vmem:[%s14079_s10 + $0x2e4] ss:$16 sps:$4 sm:$0xff]   ;;  %v10262_v58 = vld [vmem:[%s14079_s10 + $0x2e0] ss:$16 sps:$4 sm:$0xff]  }
 0x618   : > { %v3270_v39 = vadd.f32 %v12172_v19, %v3184_v61  ;;  %v3186_v28 = vpop.f32.mrb[162].mxu0  ;;  %3422 = vmatprep.subr.bf16.mxu1 %v3320_v60  ;;  %v10265_v60 = vld [vmem:[%s14079_s10 + $0x300] ss:$16 sps:$4 sm:$0xff]   ;;  %v10270_v47 = vld [vmem:[%s14079_s10 + $0x324] ss:$16 sps:$4 sm:$0xff]  }
 0x619   : > { %v3271_v25 = vadd.f32 %v12168_v17, %v3186_v28  ;;  %v3188_v43 = vpop.f32.mrb[163].mxu0  ;;  %3423 = vmatpush1.bf16.msra.mxu1 %v3319_v52  ;;  %v3301_v22 = vmax.f32 %v3269_v2, 0.0  ;;  %v10267_v52 = vld [vmem:[%s14079_s10 + $0x304] ss:$16 sps:$4 sm:$0xff]   ;;  %v10268_v2 = vld [vmem:[%s14079_s10 + $0x320] ss:$16 sps:$4 sm:$0xff]  }
 0x61a   : > { %v3272_v16 = vadd.f32 %v12172_v19, %v3188_v43  ;;  %v3302_v57 = vmax.f32 %v3270_v39, 0.0  ;;  %v10273_v61 = vld [vmem:[%s14079_s10 + $0x344] ss:$16 sps:$4 sm:$0xff]   ;;  %v10271_v39 = vld [vmem:[%s14079_s10 + $0x340] ss:$16 sps:$4 sm:$0xff]  }
 0x61b   : > { %v3303_v20 = vmax.f32 %v3271_v25, 0.0  ;;  %v10276_v28 = vld [vmem:[%s14079_s10 + $0x364] ss:$16 sps:$4 sm:$0xff]   ;;  %v10274_v25 = vld [vmem:[%s14079_s10 + $0x360] ss:$16 sps:$4 sm:$0xff]  }
 0x61c   : > { %v3304_v34 = vmax.f32 %v3272_v16, 0.0  ;;  %v10279_v43 = vld [vmem:[%s14079_s10 + $0x1cc] ss:$16 sps:$4 sm:$0xff]  }
 0x61d   : > { %v3321_v3 = vpack.c.bf16 %v3303_v20, %v3301_v22 }
 0x61e   : > { %v3322_v10 = vpack.c.bf16 %v3304_v34, %v3302_v57  ;;  %v3192_v44 = vpop.f32.mrb[164].mxu0 }
 0x61f   : > { %v3273_v63 = vadd.f32 %v12168_v17, %v3192_v44  ;;  %v3194_v1 = vpop.f32.mrb[165].mxu0 }
 0x620   : > { %v3274_v62 = vadd.f32 %v12172_v19, %v3194_v1  ;;  %v3196_v6 = vpop.f32.mrb[166].mxu0  ;;  %3424 = vmatprep.subr.bf16.mxu1 %v3322_v10 }
 0x621   : > { %v3275_v21 = vadd.f32 %v12168_v17, %v3196_v6  ;;  %v3198_v13 = vpop.f32.mrb[167].mxu0  ;;  %3425 = vmatpush1.bf16.msra.mxu1 %v3321_v3  ;;  %v3305_v49 = vmax.f32 %v3273_v63, 0.0  ;;  %v10227_v17 = vld [vmem:[%s14078_s9] sm:$0xff]  }
 0x622   : > { %v3276_v31 = vadd.f32 %v12172_v19, %v3198_v13  ;;  %v3306_v59 = vmax.f32 %v3274_v62, 0.0  ;;  %v10235_v19 = vld [vmem:[%s14079_s10 + $0x1c0] ss:$16 sps:$4 sm:$0xff]  }
 0x623   : > { %v3307_v4 = vmax.f32 %v3275_v21, 0.0 }
 0x624   : > { %v3308_v48 = vmax.f32 %v3276_v31, 0.0 }
 0x625   : > { %v3323_v9 = vpack.c.bf16 %v3307_v4, %v3305_v49 }
 0x626   : > { %v3324_v11 = vpack.c.bf16 %v3308_v48, %v3306_v59 }
 0x627   : > { %v3407_v38 = vsel %vm1408_vm4, %v3323_v9, 0 }
 0x628   : > { %8801 = vmatprep.subr.msk.bf16.mxu1 %vm1408_vm4, %v3324_v11 }
 0x629   : > { %3427 = vmatpush1.bf16.msra.mxu1 %v3407_v38 }
 0x62a   : > { %4093 = vmatprep.subr.bf16.mxu1 %v10237_v12 }
 0x62c   : > { %8802 = vmatmul.mubr.msk.bf16.vlgmr.msra.gmra.mrb[140].mxu1 %vm3381_vm9, %v10227_v17 }
 0x62d   : > { %3454 = vmatprep.mubr.bf16.mxu1 %v11000_v8  ;;  %4094 = vmatpush1.bf16.msra.mxu1 %v10235_v19 }
 0x62e   : > { %4095 = vmatprep.subr.bf16.mxu1 %v10240_v42 }
 0x631   : > { %4096 = vmatpush1.bf16.msra.mxu1 %v10238_v26  ;;  %v10277_v26 = vld [vmem:[%s14079_s10 + $0x1c8] ss:$16 sps:$4 sm:$0xff]  }
 0x632   : > { %4097 = vmatprep.subr.bf16.mxu1 %v10243_v23 }
 0x634   : > { %8803 = vmatmul.mubr.msk.bf16.gmra.mrb[144].mxu1 %vm3381_vm9, %v10228_v29 }
 0x635   : > { %3464 = vmatprep.mubr.bf16.mxu1 %v11000_v8  ;;  %4098 = vmatpush1.bf16.msra.mxu1 %v10241_v30  ;;  %v10282_v30 = vld [vmem:[%s14079_s10 + $0x1ec] ss:$16 sps:$4 sm:$0xff]  }
 0x636   : > { %4099 = vmatprep.subr.bf16.mxu1 %v10246_v5 }
 0x639   : > { %4100 = vmatpush1.bf16.msra.mxu1 %v10244_v24 }
 0x63a   : > { %4101 = vmatprep.subr.bf16.mxu1 %v10249_v33 }
 0x63c   : > { %8804 = vmatmul.mubr.msk.bf16.gmra.mrb[148].mxu1 %vm3381_vm9, %v10229_v53 }
 0x63d   : > { %3474 = vmatprep.mubr.bf16.mxu1 %v11000_v8  ;;  %4102 = vmatpush1.bf16.msra.mxu1 %v10247_v32 }
 0x63e   : > { %4103 = vmatprep.subr.bf16.mxu1 %v10252_v27  ;;  %v10280_v27 = vld [vmem:[%s14079_s10 + $0x1e8] ss:$16 sps:$4 sm:$0xff]  }
 0x641   : > { %4104 = vmatpush1.bf16.msra.mxu1 %v10250_v36 }
 0x642   : > { %4105 = vmatprep.subr.bf16.mxu1 %v10255_v37 }
 0x644   : > { %8805 = vmatmul.mubr.msk.bf16.gmra.mrb[152].mxu1 %vm3381_vm9, %v10230_v56  ;;  %v10285_v56 = vld [vmem:[%s14079_s10 + $0x20c] ss:$16 sps:$4 sm:$0xff]  }
 0x645   : > { %3484 = vmatprep.mubr.bf16.mxu1 %v11000_v8  ;;  %4106 = vmatpush1.bf16.msra.mxu1 %v10253_v35 }
 0x646   : > { %4107 = vmatprep.subr.bf16.mxu1 %v10258_v41 }
 0x649   : > { %4108 = vmatpush1.bf16.msra.mxu1 %v10256_v18 }
 0x64a   : > { %4109 = vmatprep.subr.bf16.mxu1 %v10261_v40 }
 0x64c   : > { %8806 = vmatmul.mubr.msk.bf16.gmra.mrb[156].mxu1 %vm3381_vm9, %v10231_v50 }
 0x64d   : > { %3494 = vmatprep.mubr.bf16.mxu1 %v11000_v8  ;;  %4110 = vmatpush1.bf16.msra.mxu1 %v10259_v51 }
 0x64e   : > { %4111 = vmatprep.subr.bf16.mxu1 %v10264_v55 }
 0x651   : > { %4112 = vmatpush1.bf16.msra.mxu1 %v10262_v58  ;;  %v10288_v58 = vld [vmem:[%s14079_s10 + $0x22c] ss:$16 sps:$4 sm:$0xff]  }
 0x652   : > { %4113 = vmatprep.subr.bf16.mxu1 %v10267_v52 }
 0x654   : > { %8807 = vmatmul.mubr.msk.bf16.gmra.mrb[160].mxu1 %vm3381_vm9, %v10232_v54 }
 0x655   : > { %3504 = vmatprep.mubr.bf16.mxu1 %v11000_v8  ;;  %4114 = vmatpush1.bf16.msra.mxu1 %v10265_v60 }
 0x656   : > { %4115 = vmatprep.subr.bf16.mxu1 %v10270_v47 }
 0x659   : > { %4116 = vmatpush1.bf16.msra.mxu1 %v10268_v2 }
 0x65a   : > { %4117 = vmatprep.subr.bf16.mxu1 %v10273_v61 }
 0x65c   : > { %8808 = vmatmul.mubr.msk.bf16.gmra.mrb[164].mxu1 %vm3381_vm9, %v10233_v45  ;;  %v10283_v45 = vld [vmem:[%s14079_s10 + $0x208] ss:$16 sps:$4 sm:$0xff]  }
 0x65d   : > { %3514 = vmatprep.mubr.bf16.mxu1 %v11000_v8  ;;  %4118 = vmatpush1.bf16.msra.mxu1 %v10271_v39  ;;  %v10286_v39 = vld [vmem:[%s14079_s10 + $0x228] ss:$16 sps:$4 sm:$0xff]  }
 0x65e   : > { %4119 = vmatprep.subr.bf16.mxu1 %v10276_v28 }
 0x661   : > { %4120 = vmatpush1.bf16.msra.mxu1 %v10274_v25 }
 0x662   : > { %4206 = vmatprep.subr.bf16.mxu1 %v10279_v43  ;;  %v10291_v43 = vld [vmem:[%s14079_s10 + $0x24c] ss:$16 sps:$4 sm:$0xff]  }
 0x664   : > { %8809 = vmatmul.mubr.msk.bf16.gmra.mrb[168].mxu1 %vm3381_vm9, %v10234_v46 }
 0x6ff   : > { %v3446_v16 = vpop.f32.mrb[140].mxu1 }
 0x700   : > { %v3448_v22 = vpop.f32.mrb[141].mxu1 }
 0x701   : > { %v3450_v20 = vpop.f32.mrb[142].mxu1 }
 0x702   : > { %v12334_v57 = vpack.c.bf16 %v3450_v20, %v3446_v16  ;;  %v3452_v34 = vpop.f32.mrb[143].mxu1 }
 0x703   : > { %v12336_v3 = vpack.c.bf16 %v3452_v34, %v3448_v22 }
 0x704   : > { %v3657_v1 = vshll.u32 %v12334_v57, 16  ;;  %v3655_v9 = vshrl.u32 %v12334_v57, 16 }
 0x705   : > { %v3669_v44 = vshll.u32 %v12336_v3, 16  ;;  %v3667_v59 = vshrl.u32 %v12336_v3, 16 }
 0x706   : > { %v3659_v49 = vrot.slane %v3657_v1, 1  ;;  %v10289_v1 = vld [vmem:[%s14079_s10 + $0x248] ss:$16 sps:$4 sm:$0xff]  }
 0x707   : > { %v3456_v10 = vpop.f32.mrb[144].mxu1  ;;  %v3671_v31 = vrot.slane %v3669_v44, 1 }
 0x708   : > { %v3458_v63 = vpop.f32.mrb[145].mxu1  ;;  %v3660_v42 = vor.u32 %v3659_v49, %v3655_v9 }
 0x709   : > { %v3460_v62 = vpop.f32.mrb[146].mxu1  ;;  %v3672_v38 = vor.u32 %v3671_v31, %v3667_v59  ;;  %v10294_v31 = vld [vmem:[%s14079_s10 + $0x26c] ss:$16 sps:$4 sm:$0xff]  }
 0x70a   : > { %v12340_v6 = vpack.c.bf16 %v3460_v62, %v3456_v10  ;;  %v3462_v21 = vpop.f32.mrb[147].mxu1 }
 0x70b   : > { %v12342_v13 = vpack.c.bf16 %v3462_v21, %v3458_v63 }
 0x70c   : > { %v3662_v4 = vshll.u32 %v12340_v6, 16  ;;  %v3678_v35 = vshrl.u32 %v12340_v6, 16 }
 0x70d   : > { %v3674_v48 = vshll.u32 %v12342_v13, 16  ;;  %v3686_v36 = vshrl.u32 %v12342_v13, 16 }
 0x70e   : > { %v3664_v11 = vrot.slane %v3662_v4, 1 }
 0x70f   : > { %v3466_v12 = vpop.f32.mrb[148].mxu1  ;;  %v3676_v17 = vrot.slane %v3674_v48, 1 }
 0x710   : > { %v3468_v19 = vpop.f32.mrb[149].mxu1  ;;  %v12362_v33 = vsel %vm872_vm3, %v3660_v42, %v3664_v11  ;;  %v3680_v54 = vor.u32 %v3678_v35, %v3664_v11  ;;  %v10292_v11 = vld [vmem:[%s14079_s10 + $0x268] ss:$16 sps:$4 sm:$0xff]  }
 0x711   : > { %v3470_v23 = vpop.f32.mrb[150].mxu1  ;;  %v12352_v29 = vsel %vm872_vm3, %v3672_v38, %v3676_v17  ;;  %v3688_v40 = vor.u32 %v3686_v36, %v3676_v17  ;;  %v10297_v17 = vld [vmem:[%s14079_s10 + $0x28c] ss:$16 sps:$4 sm:$0xff]  }
 0x712   : > { %v12357_v5 = vpack.c.bf16 %v3470_v23, %v3466_v12  ;;  %v3472_v24 = vpop.f32.mrb[151].mxu1  ;;  %8922 = vmatprep.mubr.msk.bf16.mxu1 %vm4068_vm10, %v12352_v29 }
 0x713   : > { %v12364_v53 = vpack.c.bf16 %v3472_v24, %v3468_v19  ;;  %4126 = vmatmul.mubr.bf16.vlgmr.msra.gmra.mrb[172].mxu1 %v12362_v33 }
 0x714   : > { %4207 = vmatpush1.bf16.msra.mxu1 %v10277_v26  ;;  %v3682_v32 = vshll.u32 %v12357_v5, 16  ;;  %v3694_v16 = vshrl.u32 %v12357_v5, 16 }
 0x715   : > { %v3690_v37 = vshll.u32 %v12364_v53, 16  ;;  %4208 = vmatprep.subr.bf16.mxu1 %v10282_v30  ;;  %v3702_v28 = vshrl.u32 %v12364_v53, 16 }
 0x716   : > { %v3684_v41 = vrot.slane %v3682_v32, 1 }
 0x717   : > { %v3476_v18 = vpop.f32.mrb[152].mxu1  ;;  %v3692_v50 = vrot.slane %v3690_v37, 1 }
 0x718   : > { %v3478_v51 = vpop.f32.mrb[153].mxu1  ;;  %4209 = vmatpush1.bf16.msra.mxu1 %v10280_v27  ;;  %v12391_v47 = vsel %vm872_vm3, %v3680_v54, %v3684_v41  ;;  %v3696_v63 = vor.u32 %v3694_v16, %v3684_v41  ;;  %v10295_v27 = vld [vmem:[%s14079_s10 + $0x288] ss:$16 sps:$4 sm:$0xff]  }
 0x719   : > { %v3480_v46 = vpop.f32.mrb[154].mxu1  ;;  %v12381_v55 = vsel %vm872_vm3, %v3688_v40, %v3692_v50  ;;  %4210 = vmatprep.subr.bf16.mxu1 %v10285_v56  ;;  %v3704_v34 = vor.u32 %v3702_v28, %v3692_v50  ;;  %v10300_v56 = vld [vmem:[%s14079_s10 + $0x2ac] ss:$16 sps:$4 sm:$0xff]   ;;  %v10301_v16 = vld [vmem:[%s14079_s10 + $0x2c8] ss:$16 sps:$4 sm:$0xff]  }
 0x71a   : > { %v12386_v52 = vpack.c.bf16 %v3480_v46, %v3476_v18  ;;  %v3482_v60 = vpop.f32.mrb[155].mxu1  ;;  %8923 = vmatprep.mubr.msk.bf16.mxu1 %vm4068_vm10, %v12381_v55  ;;  %v10303_v46 = vld [vmem:[%s14079_s10 + $0x2cc] ss:$16 sps:$4 sm:$0xff]  }
 0x71b   : > { %v12393_v2 = vpack.c.bf16 %v3482_v60, %v3478_v51  ;;  %4136 = vmatmul.mubr.bf16.gmra.mrb[176].mxu1 %v12391_v47  ;;  %v10298_v51 = vld [vmem:[%s14079_s10 + $0x2a8] ss:$16 sps:$4 sm:$0xff]  }
 0x71c   : > { %4211 = vmatpush1.bf16.msra.mxu1 %v10283_v45  ;;  %v3698_v61 = vshll.u32 %v12386_v52, 16  ;;  %v3710_v19 = vshrl.u32 %v12386_v52, 16 }
 0x71d   : > { %v3706_v25 = vshll.u32 %v12393_v2, 16  ;;  %4212 = vmatprep.subr.bf16.mxu1 %v10288_v58  ;;  %v3718_v12 = vshrl.u32 %v12393_v2, 16 }
 0x71e   : > { %v3700_v22 = vrot.slane %v3698_v61, 1 }
 0x71f   : > { %v3486_v20 = vpop.f32.mrb[156].mxu1  ;;  %v3708_v10 = vrot.slane %v3706_v25, 1 }
 0x720   : > { %v3488_v44 = vpop.f32.mrb[157].mxu1  ;;  %4213 = vmatpush1.bf16.msra.mxu1 %v10286_v39  ;;  %v12420_v59 = vsel %vm872_vm3, %v3696_v63, %v3700_v22  ;;  %v3712_v32 = vor.u32 %v3710_v19, %v3700_v22 }
 0x721   : > { %v3490_v62 = vpop.f32.mrb[158].mxu1  ;;  %v12410_v21 = vsel %vm872_vm3, %v3704_v34, %v3708_v10  ;;  %4214 = vmatprep.subr.bf16.mxu1 %v10291_v43  ;;  %v3720_v23 = vor.u32 %v3718_v12, %v3708_v10  ;;  %v10306_v34 = vld [vmem:[%s14079_s10 + $0x2ec] ss:$16 sps:$4 sm:$0xff]  }
 0x722   : > { %v12415_v49 = vpack.c.bf16 %v3490_v62, %v3486_v20  ;;  %v3492_v4 = vpop.f32.mrb[159].mxu1  ;;  %8924 = vmatprep.mubr.msk.bf16.mxu1 %vm4068_vm10, %v12410_v21 }
 0x723   : > { %v12422_v48 = vpack.c.bf16 %v3492_v4, %v3488_v44  ;;  %4146 = vmatmul.mubr.bf16.gmra.mrb[180].mxu1 %v12420_v59 }
 0x724   : > { %v3714_v9 = vshll.u32 %v12415_v49, 16  ;;  %4215 = vmatpush1.bf16.msra.mxu1 %v10289_v1  ;;  %v3726_v58 = vshrl.u32 %v12415_v49, 16 }
 0x725   : > { %v3722_v38 = vshll.u32 %v12422_v48, 16  ;;  %4216 = vmatprep.subr.bf16.mxu1 %v10294_v31  ;;  %v3734_v54 = vshrl.u32 %v12422_v48, 16  ;;  %v10304_v31 = vld [vmem:[%s14079_s10 + $0x2e8] ss:$16 sps:$4 sm:$0xff]  }
 0x726   : > { %v3716_v42 = vrot.slane %v3714_v9, 1 }
 0x727   : > { %v3496_v26 = vpop.f32.mrb[160].mxu1  ;;  %v3724_v30 = vrot.slane %v3722_v38, 1 }
 0x728   : > { %v3498_v24 = vpop.f32.mrb[161].mxu1  ;;  %4217 = vmatpush1.bf16.msra.mxu1 %v10292_v11  ;;  %v12449_v18 = vsel %vm872_vm3, %v3712_v32, %v3716_v42  ;;  %v3728_v43 = vor.u32 %v3726_v58, %v3716_v42  ;;  %v10309_v11 = vld [vmem:[%s14079_s10 + $0x30c] ss:$16 sps:$4 sm:$0xff]  }
 0x729   : > { %v3500_v36 = vpop.f32.mrb[162].mxu1  ;;  %v12439_v37 = vsel %vm872_vm3, %v3720_v23, %v3724_v30  ;;  %4218 = vmatprep.subr.bf16.mxu1 %v10297_v17  ;;  %v3736_v39 = vor.u32 %v3734_v54, %v3724_v30  ;;  %v10307_v30 = vld [vmem:[%s14079_s10 + $0x308] ss:$16 sps:$4 sm:$0xff]   ;;  %v10315_v58 = vld [vmem:[%s14079_s10 + $0x34c] ss:$16 sps:$4 sm:$0xff]  }
 0x72a   : > { %v12444_v35 = vpack.c.bf16 %v3500_v36, %v3496_v26  ;;  %v3502_v41 = vpop.f32.mrb[163].mxu1  ;;  %8925 = vmatprep.mubr.msk.bf16.mxu1 %vm4068_vm10, %v12439_v37  ;;  %v10310_v54 = vld [vmem:[%s14079_s10 + $0x328] ss:$16 sps:$4 sm:$0xff]  }
 0x72b   : > { %v12451_v40 = vpack.c.bf16 %v3502_v41, %v3498_v24  ;;  %4156 = vmatmul.mubr.bf16.gmra.mrb[184].mxu1 %v12449_v18 }
 0x72c   : > { %v3730_v50 = vshll.u32 %v12444_v35, 16  ;;  %4219 = vmatpush1.bf16.msra.mxu1 %v10295_v27  ;;  %v3742_v12 = vshrl.u32 %v12444_v35, 16  ;;  %v10312_v27 = vld [vmem:[%s14079_s10 + $0x32c] ss:$16 sps:$4 sm:$0xff]  }
 0x72d   : > { %v3738_v45 = vshll.u32 %v12451_v40, 16  ;;  %4220 = vmatprep.subr.bf16.mxu1 %v10300_v56  ;;  %v3750_v4 = vshrl.u32 %v12451_v40, 16 }
 0x72e   : > { %v3732_v60 = vrot.slane %v3730_v50, 1 }
 0x72f   : > { %v3506_v61 = vpop.f32.mrb[164].mxu1  ;;  %v3740_v28 = vrot.slane %v3738_v45, 1 }
 0x730   : > { %v3508_v25 = vpop.f32.mrb[165].mxu1  ;;  %4221 = vmatpush1.bf16.msra.mxu1 %v10298_v51  ;;  %v12478_v63 = vsel %vm872_vm3, %v3728_v43, %v3732_v60  ;;  %v3744_v23 = vor.u32 %v3742_v12, %v3732_v60  ;;  %v10319_v12 = vld [vmem:[%s14079_s10] ss:$16 sps:$4 sm:$0xff]  }
 0x731   : > { %v3510_v22 = vpop.f32.mrb[166].mxu1  ;;  %v12468_v20 = vsel %vm872_vm3, %v3736_v39, %v3740_v28  ;;  %4222 = vmatprep.subr.bf16.mxu1 %v10303_v46  ;;  %v3752_v19 = vor.u32 %v3750_v4, %v3740_v28  ;;  %v10321_v4 = vld [vmem:[%s14079_s10 + $0x4] ss:$16 sps:$4 sm:$0xff]  }
 0x732   : > { %v12473_v10 = vpack.c.bf16 %v3510_v22, %v3506_v61  ;;  %v3512_v44 = vpop.f32.mrb[167].mxu1  ;;  %8926 = vmatprep.mubr.msk.bf16.mxu1 %vm4068_vm10, %v12468_v20 }
 0x733   : > { %v12480_v1 = vpack.c.bf16 %v3512_v44, %v3508_v25  ;;  %4166 = vmatmul.mubr.bf16.gmra.mrb[188].mxu1 %v12478_v63  ;;  %v10318_v44 = vld [vmem:[%s14079_s10 + $0x36c] ss:$16 sps:$4 sm:$0xff]  }
 0x734   : > { %v3746_v62 = vshll.u32 %v12473_v10, 16  ;;  %4223 = vmatpush1.bf16.msra.mxu1 %v10301_v16  ;;  %v3758_v60 = vshrl.u32 %v12473_v10, 16  ;;  %v10313_v16 = vld [vmem:[%s14079_s10 + $0x348] ss:$16 sps:$4 sm:$0xff]  }
 0x735   : > { %v3754_v9 = vshll.u32 %v12480_v1, 16  ;;  %4224 = vmatprep.subr.bf16.mxu1 %v10306_v34  ;;  %v3766_v45 = vshrl.u32 %v12480_v1, 16 }
 0x736   : > { %v3748_v38 = vrot.slane %v3746_v62, 1 }
 0x737   : > { %v3516_v17 = vpop.f32.mrb[168].mxu1  ;;  %v3756_v42 = vrot.slane %v3754_v9, 1 }
 0x738   : > { %v3518_v26 = vpop.f32.mrb[169].mxu1  ;;  %4225 = vmatpush1.bf16.msra.mxu1 %v10304_v31  ;;  %v12507_v41 = vsel %vm872_vm3, %v3744_v23, %v3748_v38  ;;  %v3760_v43 = vor.u32 %v3758_v60, %v3748_v38  ;;  %v10316_v31 = vld [vmem:[%s14079_s10 + $0x368] ss:$16 sps:$4 sm:$0xff]   ;;  %v10324_v38 = vld [vmem:[%s14079_s10 + $0x24] ss:$16 sps:$4 sm:$0xff]  }
 0x739   : > { %v3520_v24 = vpop.f32.mrb[170].mxu1  ;;  %v12497_v32 = vsel %vm872_vm3, %v3752_v19, %v3756_v42  ;;  %4226 = vmatprep.subr.bf16.mxu1 %v10309_v11  ;;  %v3768_v39 = vor.u32 %v3766_v45, %v3756_v42  ;;  %v10325_v19 = vld [vmem:[%s14079_s10 + $0x40] ss:$16 sps:$4 sm:$0xff]   ;;  %v10333_v42 = vld [vmem:[%s14079_s10 + $0x84] ss:$16 sps:$4 sm:$0xff]  }
 0x73a   : > { %v12502_v36 = vpack.c.bf16 %v3520_v24, %v3516_v17  ;;  %v3522_v56 = vpop.f32.mrb[171].mxu1  ;;  %8927 = vmatprep.mubr.msk.bf16.mxu1 %vm4068_vm10, %v12497_v32  ;;  %v10322_v17 = vld [vmem:[%s14079_s10 + $0x20] ss:$16 sps:$4 sm:$0xff]   ;;  %v10339_v23 = vld [vmem:[%s14079_s10 + $0xc4] ss:$16 sps:$4 sm:$0xff]  }
 0x73b   : > { %v12509_v50 = vpack.c.bf16 %v3522_v56, %v3518_v26  ;;  %4176 = vmatmul.mubr.bf16.gmra.mrb[192].mxu1 %v12507_v41  ;;  %v10331_v26 = vld [vmem:[%s14079_s10 + $0x80] ss:$16 sps:$4 sm:$0xff]   ;;  %v10345_v24 = vld [vmem:[%s14079_s10 + $0x104] ss:$16 sps:$4 sm:$0xff]   ;;  %v10361_v60 = vld [vmem:[%s14079_s10 + $0x8] ss:$16 sps:$4 sm:$0xff]  }
 0x73c   : > { %v3762_v51 = vshll.u32 %v12502_v36, 16  ;;  %4227 = vmatpush1.bf16.msra.mxu1 %v10307_v30  ;;  %v3774_v9 = vshrl.u32 %v12502_v36, 16  ;;  %v10337_v30 = vld [vmem:[%s14079_s10 + $0xc0] ss:$16 sps:$4 sm:$0xff]   ;;  %v10351_v56 = vld [vmem:[%s14079_s10 + $0x144] ss:$16 sps:$4 sm:$0xff]  }
 0x73d   : > { %v3770_v46 = vshll.u32 %v12509_v50, 16  ;;  %4228 = vmatprep.subr.bf16.mxu1 %v10312_v27  ;;  %v3777_v25 = vshrl.u32 %v12509_v50, 16  ;;  %v10343_v27 = vld [vmem:[%s14079_s10 + $0x100] ss:$16 sps:$4 sm:$0xff]  }
 0x73e   : > { %v3764_v61 = vrot.slane %v3762_v51, 1  ;;  %v10349_v51 = vld [vmem:[%s14079_s10 + $0x140] ss:$16 sps:$4 sm:$0xff]  }
 0x73f   : > { %v3772_v28 = vrot.slane %v3770_v46, 1  ;;  %v10355_v45 = vld [vmem:[%s14079_s10 + $0x180] ss:$16 sps:$4 sm:$0xff]  }
 0x740   : > { %4229 = vmatpush1.bf16.msra.mxu1 %v10310_v54  ;;  %v12537_v62 = vsel %vm872_vm3, %v3760_v43, %v3764_v61  ;;  %v12549_v11 = vor.u32 %v3774_v9, %v3764_v61  ;;  %v10357_v54 = vld [vmem:[%s14079_s10 + $0x184] ss:$16 sps:$4 sm:$0xff]   ;;  %v10358_v46 = vld [vmem:[%s14079_s10 + $0x1a0] ss:$16 sps:$4 sm:$0xff]   ;;  %v10366_v61 = vld [vmem:[%s14079_s10 + $0x2c] ss:$16 sps:$4 sm:$0xff]  }
 0x741   : > { %v12527_v22 = vsel %vm872_vm3, %v3768_v39, %v3772_v28  ;;  %v12529_v34 = vor.u32 %v3777_v25, %v3772_v28  ;;  %4230 = vmatprep.subr.bf16.mxu1 %v10315_v58  ;;  %v10363_v58 = vld [vmem:[%s14079_s10 + $0xc] ss:$16 sps:$4 sm:$0xff]   ;;  %v10364_v39 = vld [vmem:[%s14079_s10 + $0x28] ss:$16 sps:$4 sm:$0xff]  }
 0x742   : > { %8928 = vmatprep.mubr.msk.bf16.mxu1 %vm4068_vm10, %v12527_v22  ;;  %v10369_v28 = vld [vmem:[%s14079_s10 + $0x4c] ss:$16 sps:$4 sm:$0xff]   ;;  %v10367_v25 = vld [vmem:[%s14079_s10 + $0x48] ss:$16 sps:$4 sm:$0xff]  }
 0x743   : > { %4186 = vmatmul.mubr.bf16.gmra.mrb[196].mxu1 %v12537_v62  ;;  %v10372_v43 = vld [vmem:[%s14079_s10 + $0x6c] ss:$16 sps:$4 sm:$0xff]  }
 0x744   : > { %8929 = vmatprep.mubr.msk.bf16.mxu1 %vm4068_vm10, %v12529_v34  ;;  %4231 = vmatpush1.bf16.msra.mxu1 %v10313_v16  ;;  %v10370_v16 = vld [vmem:[%s14079_s10 + $0x68] ss:$16 sps:$4 sm:$0xff]   ;;  %v10384_v9 = vld [vmem:[%s14079_s10 + $0xec] ss:$16 sps:$4 sm:$0xff]  }
 0x745   : > { %4232 = vmatprep.subr.bf16.mxu1 %v10318_v44  ;;  %v10378_v44 = vld [vmem:[%s14079_s10 + $0xac] ss:$16 sps:$4 sm:$0xff]  }
 0x748   : > { %4233 = vmatpush1.bf16.msra.mxu1 %v10316_v31  ;;  %v10381_v31 = vld [vmem:[%s14079_s10 + $0xcc] ss:$16 sps:$4 sm:$0xff]  }
 0x749   : > { %4615 = vmatprep.subr.bf16.mxu1 %v10321_v4  ;;  %v10379_v4 = vld [vmem:[%s14079_s10 + $0xc8] ss:$16 sps:$4 sm:$0xff]  }
 0x74b   : > { %4196 = vmatmul.mubr.bf16.gmra.mrb[200].mxu1 %v12549_v11 }
 0x74c   : > { %8930 = vmatprep.mubr.msk.bf16.mxu1 %vm4068_vm10, %v12352_v29  ;;  %v10327_v29 = vld [vmem:[%s14079_s10 + $0x44] ss:$16 sps:$4 sm:$0xff]  }
 0x753   : > { %4239 = vmatmul.mubr.bf16.vlgmr.msra.gmra.mrb[204].mxu1 %v12362_v33  ;;  %v10330_v33 = vld [vmem:[%s14079_s10 + $0x64] ss:$16 sps:$4 sm:$0xff]  }
 0x754   : > { %8931 = vmatprep.mubr.msk.bf16.mxu1 %vm4068_vm10, %v12381_v55  ;;  %4616 = vmatpush1.bf16.msra.mxu1 %v10319_v12  ;;  %v10328_v55 = vld [vmem:[%s14079_s10 + $0x60] ss:$16 sps:$4 sm:$0xff]   ;;  %v10387_v12 = vld [vmem:[%s14079_s10 + $0x10c] ss:$16 sps:$4 sm:$0xff]  }
 0x755   : > { %4617 = vmatprep.subr.bf16.mxu1 %v10324_v38  ;;  %v10385_v38 = vld [vmem:[%s14079_s10 + $0x108] ss:$16 sps:$4 sm:$0xff]  }
 0x758   : > { %4618 = vmatpush1.bf16.msra.mxu1 %v10322_v17  ;;  %v10390_v17 = vld [vmem:[%s14079_s10 + $0x12c] ss:$16 sps:$4 sm:$0xff]  }
 0x759   : > { %4619 = vmatprep.subr.bf16.mxu1 %v10327_v29  ;;  %v10388_v29 = vld [vmem:[%s14079_s10 + $0x128] ss:$16 sps:$4 sm:$0xff]  }
 0x75b   : > { %4249 = vmatmul.mubr.bf16.gmra.mrb[208].mxu1 %v12391_v47  ;;  %v10336_v47 = vld [vmem:[%s14079_s10 + $0xa4] ss:$16 sps:$4 sm:$0xff]  }
 0x75c   : > { %8932 = vmatprep.mubr.msk.bf16.mxu1 %vm4068_vm10, %v12410_v21  ;;  %4620 = vmatpush1.bf16.msra.mxu1 %v10325_v19  ;;  %v10334_v21 = vld [vmem:[%s14079_s10 + $0xa0] ss:$16 sps:$4 sm:$0xff]   ;;  %v10393_v19 = vld [vmem:[%s14079_s10 + $0x14c] ss:$16 sps:$4 sm:$0xff]  }
 0x75d   : > { %4621 = vmatprep.subr.bf16.mxu1 %v10330_v33  ;;  %v10391_v33 = vld [vmem:[%s14079_s10 + $0x148] ss:$16 sps:$4 sm:$0xff]  }
 0x760   : > { %4622 = vmatpush1.bf16.msra.mxu1 %v10328_v55  ;;  %v10396_v55 = vld [vmem:[%s14079_s10 + $0x16c] ss:$16 sps:$4 sm:$0xff]  }
 0x761   : > { %4623 = vmatprep.subr.bf16.mxu1 %v10333_v42  ;;  %v10394_v42 = vld [vmem:[%s14079_s10 + $0x168] ss:$16 sps:$4 sm:$0xff]  }
 0x763   : > { %4259 = vmatmul.mubr.bf16.gmra.mrb[212].mxu1 %v12420_v59  ;;  %v10342_v59 = vld [vmem:[%s14079_s10 + $0xe4] ss:$16 sps:$4 sm:$0xff]  }
 0x764   : > { %8933 = vmatprep.mubr.msk.bf16.mxu1 %vm4068_vm10, %v12439_v37  ;;  %4624 = vmatpush1.bf16.msra.mxu1 %v10331_v26  ;;  %v10340_v37 = vld [vmem:[%s14079_s10 + $0xe0] ss:$16 sps:$4 sm:$0xff]   ;;  %v10399_v26 = vld [vmem:[%s14079_s10 + $0x18c] ss:$16 sps:$4 sm:$0xff]  }
 0x765   : > { %4625 = vmatprep.subr.bf16.mxu1 %v10336_v47  ;;  %v10397_v47 = vld [vmem:[%s14079_s10 + $0x188] ss:$16 sps:$4 sm:$0xff]  }
 0x768   : > { %4626 = vmatpush1.bf16.msra.mxu1 %v10334_v21  ;;  %v10402_v21 = vld [vmem:[%s14079_s10 + $0x1ac] ss:$16 sps:$4 sm:$0xff]  }
 0x769   : > { %4627 = vmatprep.subr.bf16.mxu1 %v10339_v23  ;;  %v10400_v23 = vld [vmem:[%s14079_s10 + $0x1a8] ss:$16 sps:$4 sm:$0xff]  }
 0x76b   : > { %4269 = vmatmul.mubr.bf16.gmra.mrb[216].mxu1 %v12449_v18  ;;  %v10348_v18 = vld [vmem:[%s14079_s10 + $0x124] ss:$16 sps:$4 sm:$0xff]  }
 0x76c   : > { %8934 = vmatprep.mubr.msk.bf16.mxu1 %vm4068_vm10, %v12468_v20  ;;  %4628 = vmatpush1.bf16.msra.mxu1 %v10337_v30  ;;  %v10346_v20 = vld [vmem:[%s14079_s10 + $0x120] ss:$16 sps:$4 sm:$0xff]   ;;  %v10405_v30 = vld [vmem:[%s14079_s10 + $0x384] ss:$16 sps:$4 sm:$0xff]  }
 0x76d   : > { %4629 = vmatprep.subr.bf16.mxu1 %v10342_v59  ;;  %v10403_v59 = vld [vmem:[%s14079_s10 + $0x380] ss:$16 sps:$4 sm:$0xff]  }
 0x770   : > { %4630 = vmatpush1.bf16.msra.mxu1 %v10340_v37  ;;  %v10408_v37 = vld [vmem:[%s14079_s10 + $0x3a4] ss:$16 sps:$4 sm:$0xff]  }
 0x771   : > { %4631 = vmatprep.subr.bf16.mxu1 %v10345_v24  ;;  %v10406_v24 = vld [vmem:[%s14079_s10 + $0x3a0] ss:$16 sps:$4 sm:$0xff]  }
 0x773   : > { %4279 = vmatmul.mubr.bf16.gmra.mrb[220].mxu1 %v12478_v63  ;;  %v10354_v63 = vld [vmem:[%s14079_s10 + $0x164] ss:$16 sps:$4 sm:$0xff]  }
 0x774   : > { %8935 = vmatprep.mubr.msk.bf16.mxu1 %vm4068_vm10, %v12497_v32  ;;  %4632 = vmatpush1.bf16.msra.mxu1 %v10343_v27  ;;  %v10352_v32 = vld [vmem:[%s14079_s10 + $0x160] ss:$16 sps:$4 sm:$0xff]   ;;  %v10411_v27 = vld [vmem:[%s14079_s10 + $0x3c4] ss:$16 sps:$4 sm:$0xff]  }
 0x775   : > { %4633 = vmatprep.subr.bf16.mxu1 %v10348_v18  ;;  %v10409_v18 = vld [vmem:[%s14079_s10 + $0x3c0] ss:$16 sps:$4 sm:$0xff]  }
 0x778   : > { %4634 = vmatpush1.bf16.msra.mxu1 %v10346_v20  ;;  %v10414_v20 = vld [vmem:[%s14079_s10 + $0x3e4] ss:$16 sps:$4 sm:$0xff]  }
 0x779   : > { %4635 = vmatprep.subr.bf16.mxu1 %v10351_v56  ;;  %v10412_v56 = vld [vmem:[%s14079_s10 + $0x3e0] ss:$16 sps:$4 sm:$0xff]  }
 0x77b   : > { %4289 = vmatmul.mubr.bf16.gmra.mrb[224].mxu1 %v12507_v41  ;;  %v10360_v41 = vld [vmem:[%s14079_s10 + $0x1a4] ss:$16 sps:$4 sm:$0xff]  }
 0x77c   : > { %8936 = vmatprep.mubr.msk.bf16.mxu1 %vm4068_vm10, %v12527_v22  ;;  %4636 = vmatpush1.bf16.msra.mxu1 %v10349_v51  ;;  %v10375_v22 = vld [vmem:[%s14079_s10 + $0x8c] ss:$16 sps:$4 sm:$0xff]   ;;  %v10417_v51 = vld [vmem:[%s14079_s10 + $0x404] ss:$16 sps:$4 sm:$0xff]  }
 0x77d   : > { %4637 = vmatprep.subr.bf16.mxu1 %v10354_v63  ;;  %v10415_v63 = vld [vmem:[%s14079_s10 + $0x400] ss:$16 sps:$4 sm:$0xff]  }
 0x780   : > { %4638 = vmatpush1.bf16.msra.mxu1 %v10352_v32  ;;  %v10420_v32 = vld [vmem:[%s14079_s10 + $0x424] ss:$16 sps:$4 sm:$0xff]  }
 0x781   : > { %4639 = vmatprep.subr.bf16.mxu1 %v10357_v54  ;;  %v10418_v54 = vld [vmem:[%s14079_s10 + $0x420] ss:$16 sps:$4 sm:$0xff]  }
 0x783   : > { %4299 = vmatmul.mubr.bf16.gmra.mrb[228].mxu1 %v12537_v62  ;;  %v10376_v62 = vld [vmem:[%s14079_s10 + $0xa8] ss:$16 sps:$4 sm:$0xff]  }
 0x784   : > { %8937 = vmatprep.mubr.msk.bf16.mxu1 %vm4068_vm10, %v12529_v34  ;;  %4640 = vmatpush1.bf16.msra.mxu1 %v10355_v45  ;;  %v10373_v34 = vld [vmem:[%s14079_s10 + $0x88] ss:$16 sps:$4 sm:$0xff]   ;;  %v10423_v45 = vld [vmem:[%s14079_s10 + $0x444] ss:$16 sps:$4 sm:$0xff]  }
 0x785   : > { %4641 = vmatprep.subr.bf16.mxu1 %v10360_v41  ;;  %v10421_v41 = vld [vmem:[%s14079_s10 + $0x440] ss:$16 sps:$4 sm:$0xff]  }
 0x788   : > { %4642 = vmatpush1.bf16.msra.mxu1 %v10358_v46  ;;  %v10426_v46 = vld [vmem:[%s14079_s10 + $0x464] ss:$16 sps:$4 sm:$0xff]  }
 0x789   : > { %4728 = vmatprep.subr.bf16.mxu1 %v10363_v58  ;;  %v10424_v58 = vld [vmem:[%s14079_s10 + $0x460] ss:$16 sps:$4 sm:$0xff]  }
 0x78b   : > { %4309 = vmatmul.mubr.bf16.gmra.mrb[232].mxu1 %v12549_v11  ;;  %v10382_v11 = vld [vmem:[%s14079_s10 + $0xe8] ss:$16 sps:$4 sm:$0xff]  }
 0x78c   : > { %8994 = vmatprep.mubr.msk.bf16.mxu1 %vm4068_vm10, %v12336_v3 }
 0x793   : > { %4648 = vmatmul.mubr.bf16.vlgmr.msra.gmra.mrb[172].mxu1 %v12334_v57 }
 0x794   : > { %8995 = vmatprep.mubr.msk.bf16.mxu1 %vm4068_vm10, %v12342_v13  ;;  %4729 = vmatpush1.bf16.msra.mxu1 %v10361_v60  ;;  %v10429_v60 = vld [vmem:[%s14079_s10 + $0x484] ss:$16 sps:$4 sm:$0xff]  }
 0x795   : > { %4730 = vmatprep.subr.bf16.mxu1 %v10366_v61  ;;  %v10427_v61 = vld [vmem:[%s14079_s10 + $0x480] ss:$16 sps:$4 sm:$0xff]  }
 0x798   : > { %4731 = vmatpush1.bf16.msra.mxu1 %v10364_v39  ;;  %v10432_v39 = vld [vmem:[%s14079_s10 + $0x4a4] ss:$16 sps:$4 sm:$0xff]  }
 0x799   : > { %4732 = vmatprep.subr.bf16.mxu1 %v10369_v28  ;;  %v10430_v28 = vld [vmem:[%s14079_s10 + $0x4a0] ss:$16 sps:$4 sm:$0xff]  }
 0x79b   : > { %4658 = vmatmul.mubr.bf16.gmra.mrb[176].mxu1 %v12340_v6 }
 0x79c   : > { %8996 = vmatprep.mubr.msk.bf16.mxu1 %vm4068_vm10, %v12364_v53  ;;  %4733 = vmatpush1.bf16.msra.mxu1 %v10367_v25  ;;  %v10435_v25 = vld [vmem:[%s14079_s10 + $0x4c4] ss:$16 sps:$4 sm:$0xff]  }
 0x79d   : > { %4734 = vmatprep.subr.bf16.mxu1 %v10372_v43  ;;  %v10433_v43 = vld [vmem:[%s14079_s10 + $0x4c0] ss:$16 sps:$4 sm:$0xff]  }
 0x7a0   : > { %4735 = vmatpush1.bf16.msra.mxu1 %v10370_v16  ;;  %v10438_v16 = vld [vmem:[%s14079_s10 + $0x4e4] ss:$16 sps:$4 sm:$0xff]  }
 0x7a1   : > { %4736 = vmatprep.subr.bf16.mxu1 %v10375_v22  ;;  %v10436_v22 = vld [vmem:[%s14079_s10 + $0x4e0] ss:$16 sps:$4 sm:$0xff]  }
 0x7a3   : > { %4668 = vmatmul.mubr.bf16.gmra.mrb[180].mxu1 %v12357_v5 }
 0x7a4   : > { %8997 = vmatprep.mubr.msk.bf16.mxu1 %vm4068_vm10, %v12393_v2  ;;  %4737 = vmatpush1.bf16.msra.mxu1 %v10373_v34  ;;  %v10441_v34 = vld [vmem:[%s14079_s10 + $0x504] ss:$16 sps:$4 sm:$0xff]  }
 0x7a5   : > { %4738 = vmatprep.subr.bf16.mxu1 %v10378_v44  ;;  %v10439_v44 = vld [vmem:[%s14079_s10 + $0x500] ss:$16 sps:$4 sm:$0xff]  }
 0x7a8   : > { %4739 = vmatpush1.bf16.msra.mxu1 %v10376_v62  ;;  %v10444_v62 = vld [vmem:[%s14079_s10 + $0x524] ss:$16 sps:$4 sm:$0xff]  }
 0x7a9   : > { %4740 = vmatprep.subr.bf16.mxu1 %v10381_v31  ;;  %v10442_v31 = vld [vmem:[%s14079_s10 + $0x520] ss:$16 sps:$4 sm:$0xff]  }
 0x7ab   : > { %4678 = vmatmul.mubr.bf16.gmra.mrb[184].mxu1 %v12386_v52 }
 0x7ac   : > { %8998 = vmatprep.mubr.msk.bf16.mxu1 %vm4068_vm10, %v12422_v48  ;;  %4741 = vmatpush1.bf16.msra.mxu1 %v10379_v4  ;;  %v10447_v4 = vld [vmem:[%s14079_s10 + $0x38c] ss:$16 sps:$4 sm:$0xff]  }
 0x7ad   : > { %4742 = vmatprep.subr.bf16.mxu1 %v10384_v9  ;;  %v4918_v9 = vrot.slane %v12342_v13, 1 }
 0x7b0   : > { %4743 = vmatpush1.bf16.msra.mxu1 %v10382_v11  ;;  %v4917_v11 = vrot.slane %v12336_v3, 1 }
 0x7b1   : > { %4744 = vmatprep.subr.bf16.mxu1 %v10387_v12 }
 0x7b2   : > { %v12879_v12 = vsel %vm1408_vm4, %v4917_v11, %v4918_v9 }
 0x7b3   : > { %4688 = vmatmul.mubr.bf16.gmra.mrb[188].mxu1 %v12415_v49 }
 0x7b4   : > { %8999 = vmatprep.mubr.msk.bf16.mxu1 %vm4068_vm10, %v12451_v40  ;;  %4745 = vmatpush1.bf16.msra.mxu1 %v10385_v38  ;;  %v4915_v38 = vrot.slane %v12340_v6, 1 }
 0x7b5   : > { %4746 = vmatprep.subr.bf16.mxu1 %v10390_v17  ;;  %v4922_v17 = vrot.slane %v12364_v53, 1 }
 0x7b8   : > { %4747 = vmatpush1.bf16.msra.mxu1 %v10388_v29  ;;  %v4914_v29 = vrot.slane %v12334_v57, 1 }
 0x7b9   : > { %4748 = vmatprep.subr.bf16.mxu1 %v10393_v19 }
 0x7ba   : > { %v12893_v19 = vsel %vm1408_vm4, %v4914_v29, %v4915_v38 }
 0x7bb   : > { %4698 = vmatmul.mubr.bf16.gmra.mrb[192].mxu1 %v12444_v35 }
 0x7bc   : > { %9000 = vmatprep.mubr.msk.bf16.mxu1 %vm4068_vm10, %v12480_v1  ;;  %4749 = vmatpush1.bf16.msra.mxu1 %v10391_v33  ;;  %v12897_v33 = vsel %vm1408_vm4, %v4918_v9, %v4922_v17 }
 0x7bd   : > { %4750 = vmatprep.subr.bf16.mxu1 %v10396_v55  ;;  %v4926_v55 = vrot.slane %v12393_v2, 1 }
 0x7c0   : > { %4751 = vmatpush1.bf16.msra.mxu1 %v10394_v42  ;;  %v10451_v42 = vld [vmem:[%s14079_s10 + $0x3c8] ss:$16 sps:$4 sm:$0xff]  }
 0x7c1   : > { %4752 = vmatprep.subr.bf16.mxu1 %v10399_v26  ;;  %v10456_v26 = vld [vmem:[%s14079_s10 + $0x3ec] ss:$16 sps:$4 sm:$0xff]  }
 0x7c3   : > { %4708 = vmatmul.mubr.bf16.gmra.mrb[196].mxu1 %v12473_v10 }
 0x7c4   : > { %9001 = vmatprep.mubr.msk.bf16.mxu1 %vm4068_vm10, %v12509_v50  ;;  %4753 = vmatpush1.bf16.msra.mxu1 %v10397_v47 }
 0x7c5   : > { %4754 = vmatprep.subr.bf16.mxu1 %v10402_v21  ;;  %v12920_v21 = vsel %vm1408_vm4, %v4922_v17, %v4926_v55 }
 0x7c8   : > { %4755 = vmatpush1.bf16.msra.mxu1 %v10400_v23  ;;  %v4924_v23 = vrot.slane %v12386_v52, 1 }
 0x7c9   : > { %5256 = vmatprep.subr.bf16.mxu1 %v10405_v30  ;;  %v4930_v30 = vrot.slane %v12422_v48, 1 }
 0x7cb   : > { %4718 = vmatmul.mubr.bf16.gmra.mrb[200].mxu1 %v12502_v36 }
 0x7cc   : > { %9002 = vmatprep.mubr.msk.bf16.mxu1 %vm4068_vm10, %v12336_v3  ;;  %v10450_v3 = vld [vmem:[%s14079_s10 + $0x3ac] ss:$16 sps:$4 sm:$0xff]  }
 0x7d3   : > { %4761 = vmatmul.mubr.bf16.vlgmr.msra.gmra.mrb[204].mxu1 %v12334_v57  ;;  %v10448_v57 = vld [vmem:[%s14079_s10 + $0x3a8] ss:$16 sps:$4 sm:$0xff]  }
 0x7d4   : > { %9003 = vmatprep.mubr.msk.bf16.mxu1 %vm4068_vm10, %v12342_v13  ;;  %5257 = vmatpush1.bf16.msra.mxu1 %v10403_v59  ;;  %v10445_v13 = vld [vmem:[%s14079_s10 + $0x388] ss:$16 sps:$4 sm:$0xff]  }
 0x7d5   : > { %5258 = vmatprep.subr.bf16.mxu1 %v10408_v37  ;;  %v10457_v59 = vld [vmem:[%s14079_s10 + $0x408] ss:$16 sps:$4 sm:$0xff]   ;;  %v10462_v37 = vld [vmem:[%s14079_s10 + $0x42c] ss:$16 sps:$4 sm:$0xff]  }
 0x7d8   : > { %5259 = vmatpush1.bf16.msra.mxu1 %v10406_v24 }
 0x7d9   : > { %5260 = vmatprep.subr.bf16.mxu1 %v10411_v27  ;;  %v12943_v27 = vsel %vm1408_vm4, %v4926_v55, %v4930_v30 }
 0x7db   : > { %4771 = vmatmul.mubr.bf16.gmra.mrb[208].mxu1 %v12340_v6  ;;  %v10453_v6 = vld [vmem:[%s14079_s10 + $0x3cc] ss:$16 sps:$4 sm:$0xff]  }
 0x7dc   : > { %9004 = vmatprep.mubr.msk.bf16.mxu1 %vm4068_vm10, %v12364_v53  ;;  %5261 = vmatpush1.bf16.msra.mxu1 %v10409_v18  ;;  %v4920_v53 = vrot.slane %v12357_v5, 1  ;;  %v4928_v18 = vrot.slane %v12415_v49, 1 }
 0x7dd   : > { %5262 = vmatprep.subr.bf16.mxu1 %v10414_v20  ;;  %v4934_v20 = vrot.slane %v12451_v40, 1 }
 0x7de   : > { %v12916_v47 = vsel %vm1408_vm4, %v4915_v38, %v4920_v53  ;;  %v12939_v24 = vsel %vm1408_vm4, %v4920_v53, %v4924_v23 }
 0x7e0   : > { %5263 = vmatpush1.bf16.msra.mxu1 %v10412_v56  ;;  %v10463_v56 = vld [vmem:[%s14079_s10 + $0x448] ss:$16 sps:$4 sm:$0xff]  }
 0x7e1   : > { %5264 = vmatprep.subr.bf16.mxu1 %v10417_v51  ;;  %v10468_v51 = vld [vmem:[%s14079_s10 + $0x46c] ss:$16 sps:$4 sm:$0xff]  }
 0x7e3   : > { %4781 = vmatmul.mubr.bf16.gmra.mrb[212].mxu1 %v12357_v5  ;;  %v10454_v5 = vld [vmem:[%s14079_s10 + $0x3e8] ss:$16 sps:$4 sm:$0xff]  }
 0x7e4   : > { %9005 = vmatprep.mubr.msk.bf16.mxu1 %vm4068_vm10, %v12393_v2  ;;  %5265 = vmatpush1.bf16.msra.mxu1 %v10415_v63  ;;  %v10459_v2 = vld [vmem:[%s14079_s10 + $0x40c] ss:$16 sps:$4 sm:$0xff]   ;;  %v4929_v63 = vsel %vm1408_vm4, %v4924_v23, %v4928_v18 }
 0x7e5   : > { %5266 = vmatprep.subr.bf16.mxu1 %v10420_v32  ;;  %v4935_v32 = vsel %vm1408_vm4, %v4930_v30, %v4934_v20 }
 0x7e8   : > { %5267 = vmatpush1.bf16.msra.mxu1 %v10418_v54  ;;  %v4932_v54 = vrot.slane %v12444_v35, 1 }
 0x7e9   : > { %5268 = vmatprep.subr.bf16.mxu1 %v10423_v45  ;;  %v4938_v45 = vrot.slane %v12480_v1, 1 }
 0x7eb   : > { %4791 = vmatmul.mubr.bf16.gmra.mrb[216].mxu1 %v12386_v52  ;;  %v10460_v52 = vld [vmem:[%s14079_s10 + $0x428] ss:$16 sps:$4 sm:$0xff]  }
 0x7ec   : > { %9006 = vmatprep.mubr.msk.bf16.mxu1 %vm4068_vm10, %v12422_v48  ;;  %5269 = vmatpush1.bf16.msra.mxu1 %v10421_v41  ;;  %v10465_v48 = vld [vmem:[%s14079_s10 + $0x44c] ss:$16 sps:$4 sm:$0xff]   ;;  %v10469_v41 = vld [vmem:[%s14079_s10 + $0x488] ss:$16 sps:$4 sm:$0xff]  }
 0x7ed   : > { %5270 = vmatprep.subr.bf16.mxu1 %v10426_v46  ;;  %v10474_v46 = vld [vmem:[%s14079_s10 + $0x4ac] ss:$16 sps:$4 sm:$0xff]  }
 0x7f0   : > { %5271 = vmatpush1.bf16.msra.mxu1 %v10424_v58  ;;  %v4933_v58 = vsel %vm1408_vm4, %v4928_v18, %v4932_v54 }
 0x7f1   : > { %5272 = vmatprep.subr.bf16.mxu1 %v10429_v60  ;;  %v4939_v60 = vsel %vm1408_vm4, %v4934_v20, %v4938_v45 }
 0x7f3   : > { %4801 = vmatmul.mubr.bf16.gmra.mrb[220].mxu1 %v12415_v49  ;;  %v10466_v49 = vld [vmem:[%s14079_s10 + $0x468] ss:$16 sps:$4 sm:$0xff]  }
 0x7f4   : > { %9007 = vmatprep.mubr.msk.bf16.mxu1 %vm4068_vm10, %v12451_v40  ;;  %5273 = vmatpush1.bf16.msra.mxu1 %v10427_v61  ;;  %v10471_v40 = vld [vmem:[%s14079_s10 + $0x48c] ss:$16 sps:$4 sm:$0xff]   ;;  %v4936_v61 = vrot.slane %v12473_v10, 1 }
 0x7f5   : > { %5274 = vmatprep.subr.bf16.mxu1 %v10432_v39  ;;  %v4942_v39 = vrot.slane %v12509_v50, 1 }
 0x7f8   : > { %5275 = vmatpush1.bf16.msra.mxu1 %v10430_v28  ;;  %v10475_v28 = vld [vmem:[%s14079_s10 + $0x4c8] ss:$16 sps:$4 sm:$0xff]  }
 0x7f9   : > { %5276 = vmatprep.subr.bf16.mxu1 %v10435_v25  ;;  %v10480_v25 = vld [vmem:[%s14079_s10 + $0x4ec] ss:$16 sps:$4 sm:$0xff]  }
 0x7fb   : > { %4811 = vmatmul.mubr.bf16.gmra.mrb[224].mxu1 %v12444_v35  ;;  %v10472_v35 = vld [vmem:[%s14079_s10 + $0x4a8] ss:$16 sps:$4 sm:$0xff]  }
 0x7fc   : > { %9008 = vmatprep.mubr.msk.bf16.mxu1 %vm4068_vm10, %v12480_v1  ;;  %5277 = vmatpush1.bf16.msra.mxu1 %v10433_v43  ;;  %v10477_v1 = vld [vmem:[%s14079_s10 + $0x4cc] ss:$16 sps:$4 sm:$0xff]   ;;  %v4937_v43 = vsel %vm1408_vm4, %v4932_v54, %v4936_v61 }
 0x7fd   : > { %5278 = vmatprep.subr.bf16.mxu1 %v10438_v16  ;;  %v4943_v16 = vsel %vm1408_vm4, %v4938_v45, %v4942_v39 }
 0x800   : > { %5279 = vmatpush1.bf16.msra.mxu1 %v10436_v22  ;;  %v4940_v22 = vrot.slane %v12502_v36, 1 }
 0x801   : > { %5280 = vmatprep.subr.bf16.mxu1 %v10441_v34  ;;  %v10481_v34 = vld [vmem:[%s14079_s10 + $0x508] ss:$16 sps:$4 sm:$0xff]  }
 0x803   : > { %4821 = vmatmul.mubr.bf16.gmra.mrb[228].mxu1 %v12473_v10  ;;  %v10478_v10 = vld [vmem:[%s14079_s10 + $0x4e8] ss:$16 sps:$4 sm:$0xff]  }
 0x804   : > { %9009 = vmatprep.mubr.msk.bf16.mxu1 %vm4068_vm10, %v12509_v50  ;;  %5281 = vmatpush1.bf16.msra.mxu1 %v10439_v44  ;;  %v10483_v50 = vld [vmem:[%s14079_s10 + $0x50c] ss:$16 sps:$4 sm:$0xff]  }
 0x805   : > { %5282 = vmatprep.subr.bf16.mxu1 %v10444_v62  ;;  %v10486_v44 = vld [vmem:[%s14079_s10 + $0x52c] ss:$16 sps:$4 sm:$0xff]   ;;  %v4941_v62 = vsel %vm1408_vm4, %v4936_v61, %v4940_v22 }
 0x808   : > { %5283 = vmatpush1.bf16.msra.mxu1 %v10442_v31  ;;  %v13034_v31 = vld [vmem:[%s14080_s11] sm:$0xf] }
 0x809   : > { %5369 = vmatprep.subr.bf16.mxu1 %v10447_v4  ;;  %v13039_v4 = vrot.slane %v13034_v31, %v3237_v15  ;;  %v13044_v9 = vrot.slane %v13034_v31, %v3241_v7 }
 0x80b   : > { %4831 = vmatmul.mubr.bf16.gmra.mrb[232].mxu1 %v12502_v36  ;;  %v10484_v36 = vld [vmem:[%s14079_s10 + $0x528] ss:$16 sps:$4 sm:$0xff]  }
 0x80c   : > { %9122 = vmatprep.mubr.msk.bf16.mxu1 %vm4068_vm10, %v12879_v12 }
 0x813   : > { %5289 = vmatmul.mubr.bf16.vlgmr.msra.gmra.mrb[172].mxu1 %v12893_v19 }
 0x814   : > { %9123 = vmatprep.mubr.msk.bf16.mxu1 %vm4068_vm10, %v12897_v33  ;;  %5370 = vmatpush1.bf16.msra.mxu1 %v10445_v13 }
 0x815   : > { %5371 = vmatprep.subr.bf16.mxu1 %v10450_v3 }
 0x818   : > { %5372 = vmatpush1.bf16.msra.mxu1 %v10448_v57 }
 0x819   : > { %5373 = vmatprep.subr.bf16.mxu1 %v10453_v6 }
 0x81b   : > { %5299 = vmatmul.mubr.bf16.gmra.mrb[176].mxu1 %v12916_v47 }
 0x81c   : > { %9124 = vmatprep.mubr.msk.bf16.mxu1 %vm4068_vm10, %v12920_v21  ;;  %5374 = vmatpush1.bf16.msra.mxu1 %v10451_v42 }
 0x81d   : > { %5375 = vmatprep.subr.bf16.mxu1 %v10456_v26 }
 0x820   : > { %5376 = vmatpush1.bf16.msra.mxu1 %v10454_v5 }
 0x821   : > { %5377 = vmatprep.subr.bf16.mxu1 %v10459_v2 }
 0x823   : > { %5309 = vmatmul.mubr.bf16.gmra.mrb[180].mxu1 %v12939_v24 }
 0x824   : > { %9125 = vmatprep.mubr.msk.bf16.mxu1 %vm4068_vm10, %v12943_v27  ;;  %5378 = vmatpush1.bf16.msra.mxu1 %v10457_v59 }
 0x825   : > { %5379 = vmatprep.subr.bf16.mxu1 %v10462_v37 }
 0x828   : > { %5380 = vmatpush1.bf16.msra.mxu1 %v10460_v52 }
 0x829   : > { %5381 = vmatprep.subr.bf16.mxu1 %v10465_v48 }
 0x82b   : > { %5319 = vmatmul.mubr.bf16.gmra.mrb[184].mxu1 %v4929_v63 }
 0x82c   : > { %9126 = vmatprep.mubr.msk.bf16.mxu1 %vm4068_vm10, %v4935_v32  ;;  %5382 = vmatpush1.bf16.msra.mxu1 %v10463_v56 }
 0x82d   : > { %5383 = vmatprep.subr.bf16.mxu1 %v10468_v51 }
 0x830   : > { %5384 = vmatpush1.bf16.msra.mxu1 %v10466_v49 }
 0x831   : > { %5385 = vmatprep.subr.bf16.mxu1 %v10471_v40 }
 0x833   : > { %5329 = vmatmul.mubr.bf16.gmra.mrb[188].mxu1 %v4933_v58 }
 0x834   : > { %9127 = vmatprep.mubr.msk.bf16.mxu1 %vm4068_vm10, %v4939_v60  ;;  %5386 = vmatpush1.bf16.msra.mxu1 %v10469_v41 }
 0x835   : > { %5387 = vmatprep.subr.bf16.mxu1 %v10474_v46 }
 0x838   : > { %5388 = vmatpush1.bf16.msra.mxu1 %v10472_v35 }
 0x839   : > { %5389 = vmatprep.subr.bf16.mxu1 %v10477_v1 }
 0x83b   : > { %5339 = vmatmul.mubr.bf16.gmra.mrb[192].mxu1 %v4937_v43 }
 0x83c   : > { %9128 = vmatprep.mubr.msk.bf16.mxu1 %vm4068_vm10, %v4943_v16  ;;  %5390 = vmatpush1.bf16.msra.mxu1 %v10475_v28 }
 0x83d   : > { %5391 = vmatprep.subr.bf16.mxu1 %v10480_v25 }
 0x840   : > { %5392 = vmatpush1.bf16.msra.mxu1 %v10478_v10 }
 0x841   : > { %5393 = vmatprep.subr.bf16.mxu1 %v10483_v50 }
 0x843   : > { %5349 = vmatmul.mubr.bf16.gmra.mrb[196].mxu1 %v4941_v62 }
 0x844   : > { %9129 = vmatprep.mubr.msk.bf16.mxu1 %vm4068_vm10, %v4942_v39  ;;  %5394 = vmatpush1.bf16.msra.mxu1 %v10481_v34 }
 0x845   : > { %5395 = vmatprep.subr.bf16.mxu1 %v10486_v44 }
 0x848   : > { %5396 = vmatpush1.bf16.msra.mxu1 %v10484_v36 }
 0x84b   : > { %5359 = vmatmul.mubr.bf16.gmra.mrb[200].mxu1 %v4940_v22 }
 0x84c   : > { %9130 = vmatprep.mubr.msk.bf16.mxu1 %vm4068_vm10, %v12879_v12 }
 0x853   : > { %5402 = vmatmul.mubr.bf16.vlgmr.msra.gmra.mrb[204].mxu1 %v12893_v19 }
 0x854   : > { %9131 = vmatprep.mubr.msk.bf16.mxu1 %vm4068_vm10, %v12897_v33 }
 0x85b   : > { %5412 = vmatmul.mubr.bf16.gmra.mrb[208].mxu1 %v12916_v47 }
 0x85c   : > { %9132 = vmatprep.mubr.msk.bf16.mxu1 %vm4068_vm10, %v12920_v21 }
 0x863   : > { %5422 = vmatmul.mubr.bf16.gmra.mrb[212].mxu1 %v12939_v24 }
 0x864   : > { %9133 = vmatprep.mubr.msk.bf16.mxu1 %vm4068_vm10, %v12943_v27 }
 0x86b   : > { %5432 = vmatmul.mubr.bf16.gmra.mrb[216].mxu1 %v4929_v63 }
 0x86c   : > { %9134 = vmatprep.mubr.msk.bf16.mxu1 %vm4068_vm10, %v4935_v32 }
 0x873   : > { %5442 = vmatmul.mubr.bf16.gmra.mrb[220].mxu1 %v4933_v58 }
 0x874   : > { %9135 = vmatprep.mubr.msk.bf16.mxu1 %vm4068_vm10, %v4939_v60 }
 0x87b   : > { %5452 = vmatmul.mubr.bf16.gmra.mrb[224].mxu1 %v4937_v43 }
 0x87c   : > { %9136 = vmatprep.mubr.msk.bf16.mxu1 %vm4068_vm10, %v4943_v16 }
 0x883   : > { %5462 = vmatmul.mubr.bf16.gmra.mrb[228].mxu1 %v4941_v62 }
 0x884   : > { %9137 = vmatprep.mubr.msk.bf16.mxu1 %vm4068_vm10, %v4942_v39 }
 0x88b   : > { %5472 = vmatmul.mubr.bf16.gmra.mrb[232].mxu1 %v4940_v22 }
 0x8e6   : > { %v5290_v11 = vpop.f32.mrb[172].mxu1 }
 0x8e7   : > { %v5568_v12 = vadd.f32 %v13039_v4, %v5290_v11  ;;  %v5292_v38 = vpop.f32.mrb[173].mxu1 }
 0x8e8   : > { %v5569_v17 = vadd.f32 %v13044_v9, %v5292_v38  ;;  %v5294_v29 = vpop.f32.mrb[174].mxu1 }
 0x8e9   : > { %v5572_v13 = vadd.f32 %v13039_v4, %v5294_v29  ;;  %v5296_v3 = vpop.f32.mrb[175].mxu1  ;;  %v5632_v33 = vmax.f32 %v5568_v12, 0.0 }
 0x8ea   : > { %v5573_v19 = vadd.f32 %v13044_v9, %v5296_v3  ;;  %v5633_v57 = vmax.f32 %v5569_v17, 0.0 }
 0x8eb   : > { %v5636_v15 = vmax.f32 %v5572_v13, 0.0 }
 0x8ec   : > { %v5637_v6 = vmax.f32 %v5573_v19, 0.0 }
 0x8ed   : > { %v13050_v53 = vpack.c.bf16 %v5636_v15, %v5632_v33 }
 0x8ee   : > { %v13052_v7 = vpack.c.bf16 %v5637_v6, %v5633_v57  ;;  %v5300_v55 = vpop.f32.mrb[176].mxu1 }
 0x8ef   : > { %v5576_v42 = vadd.f32 %v13039_v4, %v5300_v55  ;;  %v5302_v26 = vpop.f32.mrb[177].mxu1 }
 0x8f0   : > { %v5577_v47 = vadd.f32 %v13044_v9, %v5302_v26  ;;  %v5304_v21 = vpop.f32.mrb[178].mxu1  ;;  %5777 = vmatprep.subr.bf16.mxu0 %v13052_v7 }
 0x8f1   : > { %v5580_v5 = vadd.f32 %v13039_v4, %v5304_v21  ;;  %v5306_v2 = vpop.f32.mrb[179].mxu1  ;;  %5778 = vmatpush1.bf16.msra.mxu0 %v13050_v53  ;;  %v5640_v30 = vmax.f32 %v5576_v42, 0.0 }
 0x8f2   : > { %v5581_v23 = vadd.f32 %v13044_v9, %v5306_v2  ;;  %v5641_v37 = vmax.f32 %v5577_v47, 0.0 }
 0x8f3   : > { %v5644_v59 = vmax.f32 %v5580_v5, 0.0 }
 0x8f4   : > { %v5645_v24 = vmax.f32 %v5581_v23, 0.0 }
 0x8f5   : > { %v13060_v27 = vpack.c.bf16 %v5644_v59, %v5640_v30 }
 0x8f6   : > { %v13062_v52 = vpack.c.bf16 %v5645_v24, %v5641_v37  ;;  %v5310_v48 = vpop.f32.mrb[180].mxu1 }
 0x8f7   : > { %v5584_v18 = vadd.f32 %v13039_v4, %v5310_v48  ;;  %v5312_v20 = vpop.f32.mrb[181].mxu1 }
 0x8f8   : > { %v5585_v56 = vadd.f32 %v13044_v9, %v5312_v20  ;;  %v5314_v51 = vpop.f32.mrb[182].mxu1  ;;  %5779 = vmatprep.subr.bf16.mxu0 %v13062_v52 }
 0x8f9   : > { %v5588_v63 = vadd.f32 %v13039_v4, %v5314_v51  ;;  %v5316_v32 = vpop.f32.mrb[183].mxu1  ;;  %5780 = vmatpush1.bf16.msra.mxu0 %v13060_v27  ;;  %v5648_v40 = vmax.f32 %v5584_v18, 0.0 }
 0x8fa   : > { %v5589_v49 = vadd.f32 %v13044_v9, %v5316_v32  ;;  %v5649_v45 = vmax.f32 %v5585_v56, 0.0 }
 0x8fb   : > { %v5652_v54 = vmax.f32 %v5588_v63, 0.0 }
 0x8fc   : > { %v5653_v41 = vmax.f32 %v5589_v49, 0.0 }
 0x8fd   : > { %v13070_v46 = vpack.c.bf16 %v5652_v54, %v5648_v40 }
 0x8fe   : > { %v13072_v58 = vpack.c.bf16 %v5653_v41, %v5649_v45  ;;  %v5320_v60 = vpop.f32.mrb[184].mxu1 }
 0x8ff   : > { %v5592_v35 = vadd.f32 %v13039_v4, %v5320_v60  ;;  %v5322_v1 = vpop.f32.mrb[185].mxu1 }
 0x900   : > { %v5593_v61 = vadd.f32 %v13044_v9, %v5322_v1  ;;  %v5324_v39 = vpop.f32.mrb[186].mxu1  ;;  %5781 = vmatprep.subr.bf16.mxu0 %v13072_v58 }
 0x901   : > { %v5596_v28 = vadd.f32 %v13039_v4, %v5324_v39  ;;  %v5326_v25 = vpop.f32.mrb[187].mxu1  ;;  %5782 = vmatpush1.bf16.msra.mxu0 %v13070_v46  ;;  %v5656_v16 = vmax.f32 %v5592_v35, 0.0 }
 0x902   : > { %v5597_v43 = vadd.f32 %v13044_v9, %v5326_v25  ;;  %v5657_v50 = vmax.f32 %v5593_v61, 0.0 }
 0x903   : > { %v5660_v10 = vmax.f32 %v5596_v28, 0.0 }
 0x904   : > { %v5661_v22 = vmax.f32 %v5597_v43, 0.0  ;;  %v5558_v43 = vsub.s32 2, %v12159_v14 }
 0x905   : > { %v13080_v34 = vpack.c.bf16 %v5660_v10, %v5656_v16 }
 0x906   : > { %v13082_v44 = vpack.c.bf16 %v5661_v22, %v5657_v50  ;;  %v5330_v62 = vpop.f32.mrb[188].mxu1  ;;  %v5562_v50 = vsub.s32 3, %v12159_v14 }
 0x907   : > { %v5600_v36 = vadd.f32 %v13039_v4, %v5330_v62  ;;  %v5332_v11 = vpop.f32.mrb[189].mxu1 }
 0x908   : > { %v5601_v12 = vadd.f32 %v13044_v9, %v5332_v11  ;;  %v5334_v38 = vpop.f32.mrb[190].mxu1  ;;  %5783 = vmatprep.subr.bf16.mxu0 %v13082_v44 }
 0x909   : > { %v5604_v17 = vadd.f32 %v13039_v4, %v5334_v38  ;;  %v5336_v29 = vpop.f32.mrb[191].mxu1  ;;  %5784 = vmatpush1.bf16.msra.mxu0 %v13080_v34  ;;  %v5664_v3 = vmax.f32 %v5600_v36, 0.0  ;;  %v13123_v38 = vrot.slane %v13034_v31, %v5558_v43 }
 0x90a   : > { %v5605_v13 = vadd.f32 %v13044_v9, %v5336_v29  ;;  %v5665_v33 = vmax.f32 %v5601_v12, 0.0 }
 0x90b   : > { %v5668_v19 = vmax.f32 %v5604_v17, 0.0 }
 0x90c   : > { %v5669_v15 = vmax.f32 %v5605_v13, 0.0  ;;  %v13126_v13 = vrot.slane %v13034_v31, %v5562_v50  ;;  %v13167_v50 = vld [vmem:[#allocation5 + $0x10] sm:$0xff]  }
 0x90d   : > { %v13090_v57 = vpack.c.bf16 %v5668_v19, %v5664_v3 }
 0x90e   : > { %v13092_v6 = vpack.c.bf16 %v5669_v15, %v5665_v33  ;;  %v5340_v55 = vpop.f32.mrb[192].mxu1 }
 0x90f   : > { %v5608_v42 = vadd.f32 %v13039_v4, %v5340_v55  ;;  %v5342_v26 = vpop.f32.mrb[193].mxu1 }
 0x910   : > { %v5609_v47 = vadd.f32 %v13044_v9, %v5342_v26  ;;  %v5344_v21 = vpop.f32.mrb[194].mxu1  ;;  %5785 = vmatprep.subr.bf16.mxu0 %v13092_v6 }
 0x911   : > { %v5612_v5 = vadd.f32 %v13039_v4, %v5344_v21  ;;  %v5346_v2 = vpop.f32.mrb[195].mxu1  ;;  %5786 = vmatpush1.bf16.msra.mxu0 %v13090_v57  ;;  %v5672_v30 = vmax.f32 %v5608_v42, 0.0  ;;  %v13137_v42 = vld [vmem:[#allocation5] sm:$0xff]  }
 0x912   : > { %v5613_v23 = vadd.f32 %v13044_v9, %v5346_v2  ;;  %v5673_v37 = vmax.f32 %v5609_v47, 0.0 }
 0x913   : > { %v5676_v59 = vmax.f32 %v5612_v5, 0.0 }
 0x914   : > { %v5677_v24 = vmax.f32 %v5613_v23, 0.0 }
 0x915   : > { %v13100_v48 = vpack.c.bf16 %v5676_v59, %v5672_v30 }
 0x916   : > { %v13102_v18 = vpack.c.bf16 %v5677_v24, %v5673_v37  ;;  %v5350_v20 = vpop.f32.mrb[196].mxu1 }
 0x917   : > { %v5616_v56 = vadd.f32 %v13039_v4, %v5350_v20  ;;  %v5352_v51 = vpop.f32.mrb[197].mxu1 }
 0x918   : > { %v5617_v63 = vadd.f32 %v13044_v9, %v5352_v51  ;;  %v5354_v32 = vpop.f32.mrb[198].mxu1  ;;  %5787 = vmatprep.subr.bf16.mxu0 %v13102_v18 }
 0x919   : > { %v5620_v49 = vadd.f32 %v13039_v4, %v5354_v32  ;;  %v5356_v40 = vpop.f32.mrb[199].mxu1  ;;  %5788 = vmatpush1.bf16.msra.mxu0 %v13100_v48  ;;  %v5680_v45 = vmax.f32 %v5616_v56, 0.0 }
 0x91a   : > { %v5621_v54 = vadd.f32 %v13044_v9, %v5356_v40  ;;  %v5681_v60 = vmax.f32 %v5617_v63, 0.0  ;;  %v13152_v63 = vld [vmem:[#allocation5 + $0x8] sm:$0xff]  }
 0x91b   : > { %v5684_v41 = vmax.f32 %v5620_v49, 0.0 }
 0x91c   : > { %v5685_v35 = vmax.f32 %v5621_v54, 0.0 }
 0x91d   : > { %v13110_v1 = vpack.c.bf16 %v5684_v41, %v5680_v45 }
 0x91e   : > { %v13112_v61 = vpack.c.bf16 %v5685_v35, %v5681_v60  ;;  %v5360_v39 = vpop.f32.mrb[200].mxu1 }
 0x91f   : > { %v5624_v28 = vadd.f32 %v13039_v4, %v5360_v39  ;;  %v5362_v25 = vpop.f32.mrb[201].mxu1 }
 0x920   : > { %v5625_v16 = vadd.f32 %v13044_v9, %v5362_v25  ;;  %v5364_v10 = vpop.f32.mrb[202].mxu1  ;;  %5789 = vmatprep.subr.bf16.mxu0 %v13112_v61 }
 0x921   : > { %v5628_v22 = vadd.f32 %v13039_v4, %v5364_v10  ;;  %v5366_v62 = vpop.f32.mrb[203].mxu1  ;;  %5790 = vmatpush1.bf16.msra.mxu0 %v13110_v1  ;;  %v5688_v11 = vmax.f32 %v5624_v28, 0.0 }
 0x922   : > { %v5629_v36 = vadd.f32 %v13044_v9, %v5366_v62  ;;  %v5689_v17 = vmax.f32 %v5625_v16, 0.0 }
 0x923   : > { %v5692_v12 = vmax.f32 %v5628_v22, 0.0 }
 0x924   : > { %v5693_v29 = vmax.f32 %v5629_v36, 0.0 }
 0x925   : > { %v5724_v3 = vpack.c.bf16 %v5692_v12, %v5688_v11 }
 0x926   : > { %v13128_v19 = vpack.c.bf16 %v5693_v29, %v5689_v17  ;;  %v5403_v14 = vpop.f32.mrb[204].mxu1 }
 0x927   : > { %v5570_v4 = vadd.f32 %v13123_v38, %v5403_v14  ;;  %v5405_v33 = vpop.f32.mrb[205].mxu1  ;;  %v13132_v15 = vsel %vm1408_vm4, %v5724_v3, 0 }
 0x928   : > { %v5571_v9 = vadd.f32 %v13126_v13, %v5405_v33  ;;  %v5407_v55 = vpop.f32.mrb[206].mxu1  ;;  %9142 = vmatprep.subr.msk.bf16.mxu0 %vm1408_vm4, %v13128_v19 }
 0x929   : > { %v5574_v31 = vadd.f32 %v13123_v38, %v5407_v55  ;;  %v5409_v26 = vpop.f32.mrb[207].mxu1  ;;  %5792 = vmatpush1.bf16.msra.mxu0 %v13132_v15  ;;  %v5634_v21 = vmax.f32 %v5570_v4, 0.0 }
 0x92a   : > { %v5575_v47 = vadd.f32 %v13126_v13, %v5409_v26  ;;  %v5635_v2 = vmax.f32 %v5571_v9, 0.0  ;;  %v13182_v26 = vld [vmem:[#allocation5 + $0x18] ss:$0 sps:$4 sm:$0xff]  }
 0x92b   : > { %v5638_v5 = vmax.f32 %v5574_v31, 0.0 }
 0x92c   : > { %v5639_v23 = vmax.f32 %v5575_v47, 0.0  ;;  %9143 = vmatmul.mubr.msk.bf16.vlgmr.msra.gmra.mrb[168].mxu0 %vm3381_vm9, %v13137_v42 }
 0x92d   : > { %v13144_v30 = vpack.c.bf16 %v5638_v5, %v5634_v21  ;;  %5819 = vmatprep.mubr.bf16.mxu0 %v11000_v8 }
 0x92e   : > { %v13147_v59 = vpack.c.bf16 %v5639_v23, %v5635_v2  ;;  %v5413_v37 = vpop.f32.mrb[208].mxu1 }
 0x92f   : > { %v5578_v24 = vadd.f32 %v13123_v38, %v5413_v37  ;;  %v5415_v20 = vpop.f32.mrb[209].mxu1 }
 0x930   : > { %v5579_v56 = vadd.f32 %v13126_v13, %v5415_v20  ;;  %v5417_v51 = vpop.f32.mrb[210].mxu1  ;;  %5848 = vmatprep.subr.bf16.mxu0 %v13147_v59 }
 0x931   : > { %v5582_v32 = vadd.f32 %v13123_v38, %v5417_v51  ;;  %v5419_v49 = vpop.f32.mrb[211].mxu1  ;;  %5849 = vmatpush1.bf16.msra.mxu0 %v13144_v30  ;;  %v5642_v54 = vmax.f32 %v5578_v24, 0.0 }
 0x932   : > { %v5583_v40 = vadd.f32 %v13126_v13, %v5419_v49  ;;  %v5643_v41 = vmax.f32 %v5579_v56, 0.0 }
 0x933   : > { %v5646_v45 = vmax.f32 %v5582_v32, 0.0 }
 0x934   : > { %v5647_v60 = vmax.f32 %v5583_v40, 0.0  ;;  %9144 = vmatmul.mubr.msk.bf16.gmra.mrb[172].mxu0 %vm3381_vm9, %v13152_v63 }
 0x935   : > { %v13159_v35 = vpack.c.bf16 %v5646_v45, %v5642_v54  ;;  %5829 = vmatprep.mubr.bf16.mxu0 %v11000_v8 }
 0x936   : > { %v13162_v39 = vpack.c.bf16 %v5647_v60, %v5643_v41  ;;  %v5423_v28 = vpop.f32.mrb[212].mxu1 }
 0x937   : > { %v5586_v25 = vadd.f32 %v13123_v38, %v5423_v28  ;;  %v5425_v43 = vpop.f32.mrb[213].mxu1 }
 0x938   : > { %v5587_v16 = vadd.f32 %v13126_v13, %v5425_v43  ;;  %v5427_v10 = vpop.f32.mrb[214].mxu1  ;;  %5850 = vmatprep.subr.bf16.mxu0 %v13162_v39 }
 0x939   : > { %v5590_v22 = vadd.f32 %v13123_v38, %v5427_v10  ;;  %v5429_v62 = vpop.f32.mrb[215].mxu1  ;;  %5851 = vmatpush1.bf16.msra.mxu0 %v13159_v35  ;;  %v5650_v11 = vmax.f32 %v5586_v25, 0.0 }
 0x93a   : > { %v5591_v36 = vadd.f32 %v13126_v13, %v5429_v62  ;;  %v5651_v17 = vmax.f32 %v5587_v16, 0.0 }
 0x93b   : > { %v5654_v12 = vmax.f32 %v5590_v22, 0.0 }
 0x93c   : > { %v5655_v29 = vmax.f32 %v5591_v36, 0.0  ;;  %9145 = vmatmul.mubr.msk.bf16.gmra.mrb[176].mxu0 %vm3381_vm9, %v13167_v50 }
 0x93d   : > { %v13174_v3 = vpack.c.bf16 %v5654_v12, %v5650_v11  ;;  %5839 = vmatprep.mubr.bf16.mxu0 %v11000_v8 }
 0x93e   : > { %v13177_v14 = vpack.c.bf16 %v5655_v29, %v5651_v17  ;;  %v5433_v4 = vpop.f32.mrb[216].mxu1 }
 0x93f   : > { %v5594_v33 = vadd.f32 %v13123_v38, %v5433_v4  ;;  %v5435_v9 = vpop.f32.mrb[217].mxu1 }
 0x940   : > { %v5595_v55 = vadd.f32 %v13126_v13, %v5435_v9  ;;  %v5437_v31 = vpop.f32.mrb[218].mxu1  ;;  %5852 = vmatprep.subr.bf16.mxu0 %v13177_v14 }
 0x941   : > { %v5598_v47 = vadd.f32 %v13123_v38, %v5437_v31  ;;  %v5439_v21 = vpop.f32.mrb[219].mxu1  ;;  %5853 = vmatpush1.bf16.msra.mxu0 %v13174_v3  ;;  %v5658_v2 = vmax.f32 %v5594_v33, 0.0 }
 0x942   : > { %v5599_v5 = vadd.f32 %v13126_v13, %v5439_v21  ;;  %v5659_v37 = vmax.f32 %v5595_v55, 0.0 }
 0x943   : > { %v5662_v23 = vmax.f32 %v5598_v47, 0.0 }
 0x944   : > { %v5663_v24 = vmax.f32 %v5599_v5, 0.0  ;;  %9146 = vmatmul.mubr.msk.bf16.gmra.mrb[180].mxu0 %vm3381_vm9, %v13182_v26 }
 0x945   : > { %v13189_v20 = vpack.c.bf16 %v5662_v23, %v5658_v2  ;;  %5880 = vmatprep.mubr.bf16.mxu0 %v11000_v8 }
 0x946   : > { %v13192_v56 = vpack.c.bf16 %v5663_v24, %v5659_v37  ;;  %v5443_v51 = vpop.f32.mrb[220].mxu1 }
 0x947   : > { %v5602_v32 = vadd.f32 %v13123_v38, %v5443_v51  ;;  %v5445_v49 = vpop.f32.mrb[221].mxu1 }
 0x948   : > { %v5603_v40 = vadd.f32 %v13126_v13, %v5445_v49  ;;  %v5447_v54 = vpop.f32.mrb[222].mxu1  ;;  %5854 = vmatprep.subr.bf16.mxu0 %v13192_v56 }
 0x949   : > { %v5606_v45 = vadd.f32 %v13123_v38, %v5447_v54  ;;  %v5449_v41 = vpop.f32.mrb[223].mxu1  ;;  %5855 = vmatpush1.bf16.msra.mxu0 %v13189_v20  ;;  %v5666_v28 = vmax.f32 %v5602_v32, 0.0 }
 0x94a   : > { %v5607_v60 = vadd.f32 %v13126_v13, %v5449_v41  ;;  %v5667_v43 = vmax.f32 %v5603_v40, 0.0 }
 0x94b   : > { %v5670_v25 = vmax.f32 %v5606_v45, 0.0 }
 0x94c   : > { %v5671_v16 = vmax.f32 %v5607_v60, 0.0 }
 0x94d   : > { %v13200_v10 = vpack.c.bf16 %v5670_v25, %v5666_v28 }
 0x94e   : > { %v13202_v22 = vpack.c.bf16 %v5671_v16, %v5667_v43  ;;  %v5453_v62 = vpop.f32.mrb[224].mxu1 }
 0x94f   : > { %v5610_v36 = vadd.f32 %v13123_v38, %v5453_v62  ;;  %v5455_v11 = vpop.f32.mrb[225].mxu1 }
 0x950   : > { %v5611_v12 = vadd.f32 %v13126_v13, %v5455_v11  ;;  %v5457_v17 = vpop.f32.mrb[226].mxu1  ;;  %5856 = vmatprep.subr.bf16.mxu0 %v13202_v22 }
 0x951   : > { %v5614_v29 = vadd.f32 %v13123_v38, %v5457_v17  ;;  %v5459_v4 = vpop.f32.mrb[227].mxu1  ;;  %5857 = vmatpush1.bf16.msra.mxu0 %v13200_v10  ;;  %v5674_v9 = vmax.f32 %v5610_v36, 0.0 }
 0x952   : > { %v5615_v33 = vadd.f32 %v13126_v13, %v5459_v4  ;;  %v5675_v31 = vmax.f32 %v5611_v12, 0.0 }
 0x953   : > { %v5678_v55 = vmax.f32 %v5614_v29, 0.0 }
 0x954   : > { %v5679_v47 = vmax.f32 %v5615_v33, 0.0 }
 0x955   : > { %v13210_v21 = vpack.c.bf16 %v5678_v55, %v5674_v9 }
 0x956   : > { %v13212_v5 = vpack.c.bf16 %v5679_v47, %v5675_v31  ;;  %v5463_v2 = vpop.f32.mrb[228].mxu1 }
 0x957   : > { %v5618_v23 = vadd.f32 %v13123_v38, %v5463_v2  ;;  %v5465_v37 = vpop.f32.mrb[229].mxu1 }
 0x958   : > { %v5619_v24 = vadd.f32 %v13126_v13, %v5465_v37  ;;  %v5467_v51 = vpop.f32.mrb[230].mxu1  ;;  %5858 = vmatprep.subr.bf16.mxu0 %v13212_v5  ;;  %v10548_v37 = vld [vmem:[#allocation8 + $0x84] ss:$8 sps:$4 sm:$0xff]  }
 0x959   : > { %v5622_v32 = vadd.f32 %v13123_v38, %v5467_v51  ;;  %v5469_v49 = vpop.f32.mrb[231].mxu1  ;;  %5859 = vmatpush1.bf16.msra.mxu0 %v13210_v21  ;;  %v5682_v54 = vmax.f32 %v5618_v23, 0.0  ;;  %v10542_v23 = vld [vmem:[#allocation8 + $0x74] ss:$8 sps:$4 sm:$0xff]   ;;  %v10546_v51 = vld [vmem:[#allocation8 + $0x80] ss:$8 sps:$4 sm:$0xff]  }
 0x95a   : > { %v5623_v40 = vadd.f32 %v13126_v13, %v5469_v49  ;;  %v5683_v41 = vmax.f32 %v5619_v24, 0.0  ;;  %v10537_v24 = vld [vmem:[%s14083_s14 + $0x70] ss:$8 sps:$4 sm:$0xff]   ;;  %v10543_v49 = vld [vmem:[%s14083_s14 + $0x80] ss:$8 sps:$4 sm:$0xff]  }
 0x95b   : > { %v5686_v45 = vmax.f32 %v5622_v32, 0.0  ;;  %v10545_v32 = vld [vmem:[%s14083_s14 + $0x84] ss:$8 sps:$4 sm:$0xff]  }
 0x95c   : > { %v5687_v60 = vmax.f32 %v5623_v40, 0.0  ;;  %v10552_v40 = vld [vmem:[#allocation8 + $0x90] ss:$8 sps:$4 sm:$0xff]  }
 0x95d   : > { %v13220_v28 = vpack.c.bf16 %v5686_v45, %v5682_v54  ;;  %v10551_v54 = vld [vmem:[%s14083_s14 + $0x94] ss:$8 sps:$4 sm:$0xff]  }
 0x95e   : > { %v13222_v25 = vpack.c.bf16 %v5687_v60, %v5683_v41  ;;  %v5473_v43 = vpop.f32.mrb[232].mxu1  ;;  %v10554_v45 = vld [vmem:[#allocation8 + $0x94] ss:$8 sps:$4 sm:$0xff]   ;;  %v10560_v41 = vld [vmem:[#allocation8 + $0xa4] ss:$8 sps:$4 sm:$0xff]  }
 0x95f   : > { %v5626_v16 = vadd.f32 %v13123_v38, %v5473_v43  ;;  %v5475_v62 = vpop.f32.mrb[233].mxu1  ;;  %v10549_v60 = vld [vmem:[%s14083_s14 + $0x90] ss:$8 sps:$4 sm:$0xff]   ;;  %v10555_v43 = vld [vmem:[%s14083_s14 + $0xa0] ss:$8 sps:$4 sm:$0xff]  }
 0x960   : > { %v5627_v36 = vadd.f32 %v13126_v13, %v5475_v62  ;;  %v5477_v11 = vpop.f32.mrb[234].mxu1  ;;  %5860 = vmatprep.subr.bf16.mxu0 %v13222_v25  ;;  %v10563_v62 = vld [vmem:[%s14083_s14 + $0xb4] ss:$8 sps:$4 sm:$0xff]  }
 0x961   : > { %v5630_v12 = vadd.f32 %v13123_v38, %v5477_v11  ;;  %v5479_v17 = vpop.f32.mrb[235].mxu1  ;;  %5861 = vmatpush1.bf16.msra.mxu0 %v13220_v28  ;;  %v5690_v4 = vmax.f32 %v5626_v16, 0.0  ;;  %v10530_v38 = vld [vmem:[#allocation8 + $0x54] ss:$8 sps:$4 sm:$0xff]   ;;  %v10564_v16 = vld [vmem:[#allocation8 + $0xb0] ss:$8 sps:$4 sm:$0xff]  }
 0x962   : > { %v5631_v29 = vadd.f32 %v13126_v13, %v5479_v17  ;;  %v5691_v9 = vmax.f32 %v5627_v36, 0.0  ;;  %v10536_v13 = vld [vmem:[#allocation8 + $0x64] ss:$8 sps:$4 sm:$0xff]   ;;  %v10566_v36 = vld [vmem:[#allocation8 + $0xb4] ss:$8 sps:$4 sm:$0xff]  }
 0x963   : > { %v5694_v33 = vmax.f32 %v5630_v12, 0.0  ;;  %v10572_v11 = vld [vmem:[#allocation8 + $0xc4] ss:$8 sps:$4 sm:$0xff]   ;;  %v10561_v12 = vld [vmem:[%s14083_s14 + $0xb0] ss:$8 sps:$4 sm:$0xff]  }
 0x964   : > { %v5695_v55 = vmax.f32 %v5631_v29, 0.0  ;;  %v10570_v17 = vld [vmem:[#allocation8 + $0xc0] ss:$8 sps:$4 sm:$0xff]   ;;  %v10569_v29 = vld [vmem:[%s14083_s14 + $0xc4] ss:$8 sps:$4 sm:$0xff]  }
 0x965   : > { %v5726_v31 = vpack.c.bf16 %v5694_v33, %v5690_v4  ;;  %v10567_v4 = vld [vmem:[%s14083_s14 + $0xc0] ss:$8 sps:$4 sm:$0xff]  }
 0x966   : > { %v13230_v47 = vpack.c.bf16 %v5695_v55, %v5691_v9  ;;  %v10576_v33 = vld [vmem:[#allocation8 + $0xd0] ss:$8 sps:$4 sm:$0xff]   ;;  %v10575_v9 = vld [vmem:[%s14083_s14 + $0xd4] ss:$8 sps:$4 sm:$0xff]  }
 0x967   : > { %v13233_v2 = vsel %vm1408_vm4, %v5726_v31, 0  ;;  %v10578_v55 = vld [vmem:[#allocation8 + $0xd4] ss:$8 sps:$4 sm:$0xff]   ;;  %v10573_v31 = vld [vmem:[%s14083_s14 + $0xd0] ss:$8 sps:$4 sm:$0xff]  }
 0x968   : > { %9147 = vmatprep.subr.msk.bf16.mxu0 %vm1408_vm4, %v13230_v47 }
 0x969   : > { %5863 = vmatpush1.bf16.msra.mxu0 %v13233_v2 }
 0x96a   : > { %5956 = vmatprep.subr.bf16.mxu0 %v13052_v7  ;;  %v10500_v7 = vld [vmem:[#allocation8 + $0x4] ss:$8 sps:$4 sm:$0xff]  }
 0x96b   : > { %6969 = vmatprep.subr.bf16.mxu1 %v10500_v7  ;;  %v10579_v7 = vld [vmem:[%s14083_s14 + $0xe0] ss:$8 sps:$4 sm:$0xff]  }
 0x96c   : > { %9148 = vmatmul.mubr.msk.bf16.vlgmr.msra.gmra.mrb[184].mxu0 %vm3381_vm9, %v13137_v42  ;;  %v10497_v42 = vld [vmem:[%s14083_s14 + $0x4] ss:$8 sps:$4 sm:$0xff]  }
 0x96d   : > { %5957 = vmatpush1.bf16.msra.mxu0 %v13050_v53  ;;  %5890 = vmatprep.mubr.bf16.mxu0 %v11000_v8  ;;  %v10498_v53 = vld [vmem:[#allocation8] ss:$8 sps:$4 sm:$0xff]  }
 0x96e   : > { %5958 = vmatprep.subr.bf16.mxu0 %v13062_v52  ;;  %6970 = vmatpush1.bf16.msra.mxu1 %v10498_v53  ;;  %v10504_v52 = vld [vmem:[#allocation8 + $0x10] ss:$8 sps:$4 sm:$0xff]   ;;  %v10582_v53 = vld [vmem:[#allocation8 + $0xe0] ss:$8 sps:$4 sm:$0xff]  }
 0x971   : > { %5959 = vmatpush1.bf16.msra.mxu0 %v13060_v27  ;;  %v10491_v27 = vld [vmem:[#allocation7] sm:$0xff]  }
 0x972   : > { %5960 = vmatprep.subr.bf16.mxu0 %v13072_v58  ;;  %v10512_v58 = vld [vmem:[#allocation8 + $0x24] ss:$8 sps:$4 sm:$0xff]  }
 0x974   : > { %9149 = vmatmul.mubr.msk.bf16.gmra.mrb[188].mxu0 %vm3381_vm9, %v13152_v63  ;;  %v10501_v63 = vld [vmem:[%s14083_s14 + $0x10] ss:$8 sps:$4 sm:$0xff]  }
 0x975   : > { %5961 = vmatpush1.bf16.msra.mxu0 %v13070_v46  ;;  %5900 = vmatprep.mubr.bf16.mxu0 %v11000_v8  ;;  %v10506_v46 = vld [vmem:[#allocation8 + $0x14] ss:$8 sps:$4 sm:$0xff]  }
 0x976   : > { %5962 = vmatprep.subr.bf16.mxu0 %v13082_v44  ;;  %6971 = vmatprep.subr.bf16.mxu1 %v10506_v46  ;;  %v10492_v44 = vld [vmem:[#allocation7 + $0x8] sm:$0xff]  }
 0x977   : > { %6972 = vmatpush1.bf16.msra.mxu1 %v10504_v52  ;;  %v10590_v52 = vld [vmem:[#allocation8 + $0xf4] ss:$8 sps:$4 sm:$0xff]   ;;  %v10588_v46 = vld [vmem:[#allocation8 + $0xf0] ss:$8 sps:$4 sm:$0xff]  }
 0x978   : > { %6973 = vmatprep.subr.bf16.mxu1 %v10512_v58  ;;  %v10585_v58 = vld [vmem:[%s14083_s14 + $0xf0] ss:$8 sps:$4 sm:$0xff]  }
 0x979   : > { %5963 = vmatpush1.bf16.msra.mxu0 %v13080_v34  ;;  %v10510_v34 = vld [vmem:[#allocation8 + $0x20] ss:$8 sps:$4 sm:$0xff]  }
 0x97a   : > { %5964 = vmatprep.subr.bf16.mxu0 %v13092_v6  ;;  %v10518_v6 = vld [vmem:[#allocation8 + $0x34] ss:$8 sps:$4 sm:$0xff]  }
 0x97b   : > { %6974 = vmatpush1.bf16.msra.mxu1 %v10510_v34  ;;  %v10593_v34 = vld [vmem:[%s14083_s14 + $0x104] ss:$8 sps:$4 sm:$0xff]  }
 0x97c   : > { %9150 = vmatmul.mubr.msk.bf16.gmra.mrb[192].mxu0 %vm3381_vm9, %v13167_v50  ;;  %6975 = vmatprep.subr.bf16.mxu1 %v10518_v6  ;;  %v10515_v50 = vld [vmem:[%s14083_s14 + $0x34] ss:$8 sps:$4 sm:$0xff]  }
 0x97d   : > { %5965 = vmatpush1.bf16.msra.mxu0 %v13090_v57  ;;  %5910 = vmatprep.mubr.bf16.mxu0 %v11000_v8  ;;  %v10516_v57 = vld [vmem:[#allocation8 + $0x30] ss:$8 sps:$4 sm:$0xff]  }
 0x97e   : > { %5966 = vmatprep.subr.bf16.mxu0 %v13102_v18  ;;  %v10522_v18 = vld [vmem:[#allocation8 + $0x40] ss:$8 sps:$4 sm:$0xff]  }
 0x97f   : > { %6976 = vmatpush1.bf16.msra.mxu1 %v10516_v57 }
 0x981   : > { %5967 = vmatpush1.bf16.msra.mxu0 %v13100_v48  ;;  %v10524_v48 = vld [vmem:[#allocation8 + $0x44] ss:$8 sps:$4 sm:$0xff]  }
 0x982   : > { %5968 = vmatprep.subr.bf16.mxu0 %v13112_v61  ;;  %6977 = vmatprep.subr.bf16.mxu1 %v10524_v48  ;;  %v10528_v61 = vld [vmem:[#allocation8 + $0x50] ss:$8 sps:$4 sm:$0xff]  }
 0x983   : > { %6978 = vmatpush1.bf16.msra.mxu1 %v10522_v18 }
 0x984   : > { %9151 = vmatmul.mubr.msk.bf16.gmra.mrb[196].mxu0 %vm3381_vm9, %v13182_v26  ;;  %6979 = vmatprep.subr.bf16.mxu1 %v10530_v38  ;;  %v10519_v26 = vld [vmem:[%s14083_s14 + $0x40] ss:$8 sps:$4 sm:$0xff]  }
 0x985   : > { %5969 = vmatpush1.bf16.msra.mxu0 %v13110_v1  ;;  %5988 = vmatprep.mubr.bf16.mxu0 %v11000_v8  ;;  %v10493_v1 = vld [vmem:[#allocation7 + $0x10] sm:$0xff]  }
 0x986   : > { %9156 = vmatprep.subr.msk.bf16.mxu0 %vm1408_vm4, %v13128_v19  ;;  %v10534_v19 = vld [vmem:[#allocation8 + $0x60] ss:$8 sps:$4 sm:$0xff]  }
 0x987   : > { %6980 = vmatpush1.bf16.msra.mxu1 %v10528_v61 }
 0x988   : > { %6981 = vmatprep.subr.bf16.mxu1 %v10536_v13 }
 0x989   : > { %5971 = vmatpush1.bf16.msra.mxu0 %v13132_v15  ;;  %v10494_v15 = vld [vmem:[#allocation7 + $0x18] ss:$0 sps:$4 sm:$0xff]  }
 0x98a   : > { %6027 = vmatprep.subr.bf16.mxu0 %v13147_v59  ;;  %v10503_v59 = vld [vmem:[%s14083_s14 + $0x14] ss:$8 sps:$4 sm:$0xff]  }
 0x98b   : > { %6982 = vmatpush1.bf16.msra.mxu1 %v10534_v19 }
 0x98c   : > { %9157 = vmatmul.mubr.msk.bf16.vlgmr.msra.gmra.mrb[200].mxu0 %vm3381_vm9, %v10491_v27  ;;  %6983 = vmatprep.subr.bf16.mxu1 %v10542_v23 }
 0x98d   : > { %6028 = vmatpush1.bf16.msra.mxu0 %v13144_v30  ;;  %5998 = vmatprep.mubr.bf16.mxu0 %v11000_v8  ;;  %v10495_v30 = vld [vmem:[%s14083_s14] ss:$8 sps:$4 sm:$0xff]  }
 0x98e   : > { %6029 = vmatprep.subr.bf16.mxu0 %v13162_v39  ;;  %v10507_v39 = vld [vmem:[%s14083_s14 + $0x20] ss:$8 sps:$4 sm:$0xff]  }
 0x991   : > { %6030 = vmatpush1.bf16.msra.mxu0 %v13159_v35  ;;  %v10509_v35 = vld [vmem:[%s14083_s14 + $0x24] ss:$8 sps:$4 sm:$0xff]  }
 0x992   : > { %6031 = vmatprep.subr.bf16.mxu0 %v13177_v14  ;;  %v10521_v14 = vld [vmem:[%s14083_s14 + $0x44] ss:$8 sps:$4 sm:$0xff]  }
 0x994   : > { %9158 = vmatmul.mubr.msk.bf16.gmra.mrb[204].mxu0 %vm3381_vm9, %v10492_v44 }
 0x995   : > { %6032 = vmatpush1.bf16.msra.mxu0 %v13174_v3  ;;  %6008 = vmatprep.mubr.bf16.mxu0 %v11000_v8  ;;  %v10513_v3 = vld [vmem:[%s14083_s14 + $0x30] ss:$8 sps:$4 sm:$0xff]  }
 0x996   : > { %6033 = vmatprep.subr.bf16.mxu0 %v13192_v56  ;;  %v10525_v56 = vld [vmem:[%s14083_s14 + $0x50] ss:$8 sps:$4 sm:$0xff]  }
 0x999   : > { %6034 = vmatpush1.bf16.msra.mxu0 %v13189_v20  ;;  %v10527_v20 = vld [vmem:[%s14083_s14 + $0x54] ss:$8 sps:$4 sm:$0xff]  }
 0x99a   : > { %6035 = vmatprep.subr.bf16.mxu0 %v13202_v22  ;;  %v10531_v22 = vld [vmem:[%s14083_s14 + $0x60] ss:$8 sps:$4 sm:$0xff]  }
 0x99c   : > { %9159 = vmatmul.mubr.msk.bf16.gmra.mrb[208].mxu0 %vm3381_vm9, %v10493_v1 }
 0x99d   : > { %6036 = vmatpush1.bf16.msra.mxu0 %v13200_v10  ;;  %6018 = vmatprep.mubr.bf16.mxu0 %v11000_v8  ;;  %v10533_v10 = vld [vmem:[%s14083_s14 + $0x64] ss:$8 sps:$4 sm:$0xff]  }
 0x99e   : > { %6037 = vmatprep.subr.bf16.mxu0 %v13212_v5  ;;  %v10539_v5 = vld [vmem:[%s14083_s14 + $0x74] ss:$8 sps:$4 sm:$0xff]  }
 0x9a1   : > { %6038 = vmatpush1.bf16.msra.mxu0 %v13210_v21  ;;  %v10540_v21 = vld [vmem:[#allocation8 + $0x70] ss:$8 sps:$4 sm:$0xff]  }
 0x9a2   : > { %6039 = vmatprep.subr.bf16.mxu0 %v13222_v25  ;;  %6984 = vmatpush1.bf16.msra.mxu1 %v10540_v21  ;;  %v10557_v25 = vld [vmem:[%s14083_s14 + $0xa4] ss:$8 sps:$4 sm:$0xff]  }
 0x9a3   : > { %6985 = vmatprep.subr.bf16.mxu1 %v10548_v37 }
 0x9a4   : > { %9160 = vmatmul.mubr.msk.bf16.gmra.mrb[212].mxu0 %vm3381_vm9, %v10494_v15 }
 0x9a5   : > { %6040 = vmatpush1.bf16.msra.mxu0 %v13220_v28  ;;  %6059 = vmatprep.mubr.bf16.mxu0 %v11000_v8  ;;  %v10558_v28 = vld [vmem:[#allocation8 + $0xa0] ss:$8 sps:$4 sm:$0xff]  }
 0x9a6   : > { %9161 = vmatprep.subr.msk.bf16.mxu0 %vm1408_vm4, %v13230_v47  ;;  %6986 = vmatpush1.bf16.msra.mxu1 %v10546_v51  ;;  %v10581_v47 = vld [vmem:[%s14083_s14 + $0xe4] ss:$8 sps:$4 sm:$0xff]  }
 0x9a7   : > { %6987 = vmatprep.subr.bf16.mxu1 %v10554_v45 }
 0x9a9   : > { %6042 = vmatpush1.bf16.msra.mxu0 %v13233_v2  ;;  %v10584_v2 = vld [vmem:[#allocation8 + $0xe4] ss:$8 sps:$4 sm:$0xff]  }
 0x9aa   : > { %6491 = vmatprep.subr.bf16.mxu0 %v10497_v42  ;;  %6988 = vmatpush1.bf16.msra.mxu1 %v10552_v40 }
 0x9ab   : > { %6989 = vmatprep.subr.bf16.mxu1 %v10560_v41 }
 0x9ac   : > { %9162 = vmatmul.mubr.msk.bf16.vlgmr.msra.gmra.mrb[216].mxu0 %vm3381_vm9, %v10491_v27  ;;  %v10587_v27 = vld [vmem:[%s14083_s14 + $0xf4] ss:$8 sps:$4 sm:$0xff]  }
 0x9ad   : > { %6069 = vmatprep.mubr.bf16.mxu0 %v11000_v8  ;;  %6492 = vmatpush1.bf16.msra.mxu0 %v10495_v30 }
 0x9ae   : > { %6493 = vmatprep.subr.bf16.mxu0 %v10503_v59  ;;  %6990 = vmatpush1.bf16.msra.mxu1 %v10558_v28 }
 0x9af   : > { %6991 = vmatprep.subr.bf16.mxu1 %v10566_v36  ;;  %v10591_v36 = vld [vmem:[%s14083_s14 + $0x100] ss:$8 sps:$4 sm:$0xff]  }
 0x9b1   : > { %6494 = vmatpush1.bf16.msra.mxu0 %v10501_v63 }
 0x9b2   : > { %6495 = vmatprep.subr.bf16.mxu0 %v10509_v35  ;;  %6992 = vmatpush1.bf16.msra.mxu1 %v10564_v16 }
 0x9b3   : > { %6993 = vmatprep.subr.bf16.mxu1 %v10572_v11  ;;  %v10594_v11 = vld [vmem:[#allocation8 + $0x100] ss:$8 sps:$4 sm:$0xff]  }
 0x9b4   : > { %9163 = vmatmul.mubr.msk.bf16.gmra.mrb[220].mxu0 %vm3381_vm9, %v10492_v44  ;;  %v10596_v44 = vld [vmem:[#allocation8 + $0x104] ss:$8 sps:$4 sm:$0xff]  }
 0x9b5   : > { %6079 = vmatprep.mubr.bf16.mxu0 %v11000_v8  ;;  %6496 = vmatpush1.bf16.msra.mxu0 %v10507_v39 }
 0x9b6   : > { %6497 = vmatprep.subr.bf16.mxu0 %v10515_v50  ;;  %6994 = vmatpush1.bf16.msra.mxu1 %v10570_v17  ;;  %v10602_v17 = vld [vmem:[#allocation8 + $0x114] ss:$8 sps:$4 sm:$0xff]  }
 0x9b7   : > { %6995 = vmatprep.subr.bf16.mxu1 %v10578_v55 }
 0x9b9   : > { %6498 = vmatpush1.bf16.msra.mxu0 %v10513_v3 }
 0x9ba   : > { %6499 = vmatprep.subr.bf16.mxu0 %v10521_v14  ;;  %6996 = vmatpush1.bf16.msra.mxu1 %v10576_v33 }
 0x9bb   : > { %6997 = vmatprep.subr.bf16.mxu1 %v10584_v2 }
 0x9bc   : > { %9164 = vmatmul.mubr.msk.bf16.gmra.mrb[224].mxu0 %vm3381_vm9, %v10493_v1 }
 0x9bd   : > { %6089 = vmatprep.mubr.bf16.mxu0 %v11000_v8  ;;  %6500 = vmatpush1.bf16.msra.mxu0 %v10519_v26 }
 0x9be   : > { %6501 = vmatprep.subr.bf16.mxu0 %v10527_v20  ;;  %6998 = vmatpush1.bf16.msra.mxu1 %v10582_v53 }
 0x9bf   : > { %6999 = vmatprep.subr.bf16.mxu1 %v10590_v52 }
 0x9c1   : > { %6502 = vmatpush1.bf16.msra.mxu0 %v10525_v56 }
 0x9c2   : > { %6503 = vmatprep.subr.bf16.mxu0 %v10533_v10  ;;  %7000 = vmatpush1.bf16.msra.mxu1 %v10588_v46 }
 0x9c3   : > { %7040 = vmatprep.subr.bf16.mxu1 %v10596_v44  ;;  %v10606_v44 = vld [vmem:[#allocation8 + $0x120] ss:$8 sps:$4 sm:$0xff]  }
 0x9c4   : > { %9165 = vmatmul.mubr.msk.bf16.gmra.mrb[228].mxu0 %vm3381_vm9, %v10494_v15 }
 0x9c5   : > { %6504 = vmatpush1.bf16.msra.mxu0 %v10531_v22 }
 0x9c6   : > { %6505 = vmatprep.subr.bf16.mxu0 %v10539_v5 }
 0x9c9   : > { %6506 = vmatpush1.bf16.msra.mxu0 %v10537_v24 }
 0x9ca   : > { %6507 = vmatprep.subr.bf16.mxu0 %v10545_v32 }
 0x9cd   : > { %6508 = vmatpush1.bf16.msra.mxu0 %v10543_v49 }
 0x9ce   : > { %6509 = vmatprep.subr.bf16.mxu0 %v10551_v54 }
 0x9d1   : > { %6510 = vmatpush1.bf16.msra.mxu0 %v10549_v60 }
 0x9d2   : > { %6511 = vmatprep.subr.bf16.mxu0 %v10557_v25 }
 0x9d5   : > { %6512 = vmatpush1.bf16.msra.mxu0 %v10555_v43 }
 0x9d6   : > { %6513 = vmatprep.subr.bf16.mxu0 %v10563_v62 }
 0x9d9   : > { %6514 = vmatpush1.bf16.msra.mxu0 %v10561_v12  ;;  %v10599_v12 = vld [vmem:[%s14083_s14 + $0x114] ss:$8 sps:$4 sm:$0xff]  }
 0x9da   : > { %6515 = vmatprep.subr.bf16.mxu0 %v10569_v29 }
 0x9dd   : > { %6516 = vmatpush1.bf16.msra.mxu0 %v10567_v4 }
 0x9de   : > { %6517 = vmatprep.subr.bf16.mxu0 %v10575_v9 }
 0x9e1   : > { %6518 = vmatpush1.bf16.msra.mxu0 %v10573_v31  ;;  %v10597_v31 = vld [vmem:[%s14083_s14 + $0x110] ss:$8 sps:$4 sm:$0xff]  }
 0x9e2   : > { %6519 = vmatprep.subr.bf16.mxu0 %v10581_v47  ;;  %v10600_v47 = vld [vmem:[#allocation8 + $0x110] ss:$8 sps:$4 sm:$0xff]  }
 0x9e5   : > { %6520 = vmatpush1.bf16.msra.mxu0 %v10579_v7  ;;  %v10605_v7 = vld [vmem:[%s14083_s14 + $0x124] ss:$8 sps:$4 sm:$0xff]  }
 0x9e6   : > { %6521 = vmatprep.subr.bf16.mxu0 %v10587_v27  ;;  %v10608_v27 = vld [vmem:[#allocation8 + $0x124] ss:$8 sps:$4 sm:$0xff]  }
 0x9e9   : > { %6522 = vmatpush1.bf16.msra.mxu0 %v10585_v58 }
 0x9ea   : > { %6562 = vmatprep.subr.bf16.mxu0 %v10593_v34  ;;  %v10603_v34 = vld [vmem:[%s14083_s14 + $0x120] ss:$8 sps:$4 sm:$0xff]  }
 0x9ff   : > { %v5811_v57 = vpop.f32.mrb[168].mxu0 }
 0xa00   : > { %v5813_v6 = vpop.f32.mrb[169].mxu0 }
 0xa01   : > { %v5815_v48 = vpop.f32.mrb[170].mxu0 }
 0xa02   : > { %v5817_v18 = vpop.f32.mrb[171].mxu0 }
 0xa07   : > { %v13398_v1 = vpop.f32.mrb[172].mxu0 }
 0xa08   : > { %v13400_v61 = vpop.f32.mrb[173].mxu0 }
 0xa09   : > { %v5825_v38 = vpop.f32.mrb[174].mxu0 }
 0xa0a   : > { %v5827_v13 = vpop.f32.mrb[175].mxu0 }
 0xa0f   : > { %v13402_v19 = vpop.f32.mrb[176].mxu0 }
 0xa10   : > { %v13404_v15 = vpop.f32.mrb[177].mxu0 }
 0xa11   : > { %v13406_v42 = vpop.f32.mrb[178].mxu0 }
 0xa12   : > { %v13408_v30 = vpop.f32.mrb[179].mxu0 }
 0xa17   : > { %v13410_v59 = vpop.f32.mrb[180].mxu0 }
 0xa18   : > { %v13412_v63 = vpop.f32.mrb[181].mxu0 }
 0xa19   : > { %v5845_v35 = vpop.f32.mrb[182].mxu0 }
 0xa1a   : > { %v5846_v39 = vpop.f32.mrb[183].mxu0  ;;  %v10612_v35 = vld [vmem:[#allocation8 + $0x130] ss:$8 sps:$4 sm:$0xff]  }
 0xa3f   : > { %v13414_v50 = vpop.f32.mrb[184].mxu0 }
 0xa40   : > { %v13416_v3 = vpop.f32.mrb[185].mxu0 }
 0xa41   : > { %v13418_v14 = vpop.f32.mrb[186].mxu0 }
 0xa42   : > { %v13420_v26 = vpop.f32.mrb[187].mxu0 }
 0xa47   : > { %v13422_v20 = vpop.f32.mrb[188].mxu0 }
 0xa48   : > { %v13424_v56 = vpop.f32.mrb[189].mxu0 }
 0xa49   : > { %v13426_v10 = vpop.f32.mrb[190].mxu0 }
 0xa4a   : > { %v13428_v22 = vpop.f32.mrb[191].mxu0 }
 0xa4f   : > { %v13430_v21 = vpop.f32.mrb[192].mxu0 }
 0xa50   : > { %v13432_v5 = vpop.f32.mrb[193].mxu0 }
 0xa51   : > { %v13434_v23 = vpop.f32.mrb[194].mxu0 }
 0xa52   : > { %v13436_v37 = vpop.f32.mrb[195].mxu0 }
 0xa57   : > { %v13438_v24 = vpop.f32.mrb[196].mxu0 }
 0xa58   : > { %v13440_v51 = vpop.f32.mrb[197].mxu0 }
 0xa59   : > { %v5916_v32 = vpop.f32.mrb[198].mxu0 }
 0xa5a   : > { %v5917_v49 = vpop.f32.mrb[199].mxu0 }
 0xa5b   : > { %v10620_v49 = vld [vmem:[#allocation8 + $0x144] ss:$8 sps:$4 sm:$0xff]  }
 0xa5f   : > { %v5990_v40 = vpop.f32.mrb[200].mxu0 }
 0xa60   : > { %v6098_v54 = vmax.f32 %v5811_v57, %v5990_v40  ;;  %v5992_v45 = vpop.f32.mrb[201].mxu0  ;;  %v10611_v57 = vld [vmem:[%s14083_s14 + $0x134] ss:$8 sps:$4 sm:$0xff]  }
 0xa61   : > { %v6099_v41 = vmax.f32 %v5813_v6, %v5992_v45  ;;  %v5994_v60 = vpop.f32.mrb[202].mxu0  ;;  %v10614_v6 = vld [vmem:[#allocation8 + $0x134] ss:$8 sps:$4 sm:$0xff]   ;;  %v10615_v45 = vld [vmem:[%s14083_s14 + $0x140] ss:$8 sps:$4 sm:$0xff]  }
 0xa62   : > { %v6102_v28 = vmax.f32 %v5815_v48, %v5994_v60  ;;  %v5996_v25 = vpop.f32.mrb[203].mxu0  ;;  %v10626_v60 = vld [vmem:[#allocation8 + $0x154] ss:$8 sps:$4 sm:$0xff]  }
 0xa63   : > { %v6103_v43 = vmax.f32 %v5817_v18, %v5996_v25 }
 0xa64   : > { %v6126_v16 = vpack.c.bf16 %v6102_v28, %v6098_v54 }
 0xa65   : > { %v6127_v62 = vpack.c.bf16 %v6103_v43, %v6099_v41  ;;  %v10618_v41 = vld [vmem:[#allocation8 + $0x140] ss:$8 sps:$4 sm:$0xff]  }
 0xa67   : > { %v6000_v29 = vpop.f32.mrb[204].mxu0  ;;  %6523 = vmatprep.mubr.bf16.mxu0 %v6127_v62  ;;  %7001 = vmatprep.mubr.bf16.mxu1 %v6127_v62  ;;  %v10624_v62 = vld [vmem:[#allocation8 + $0x150] ss:$8 sps:$4 sm:$0xff]  }
 0xa68   : > { %v6106_v4 = vmax.f32 %v13398_v1, %v6000_v29  ;;  %v6002_v33 = vpop.f32.mrb[205].mxu0  ;;  %6524 = vmatmul.mubr.bf16.vlgmr.msra.gmra.mrb[232].mxu0 %v6126_v16  ;;  %7002 = vmatmul.mubr.bf16.vlgmr.msra.gmra.mrb[236].mxu1 %v6126_v16  ;;  %v10621_v16 = vld [vmem:[%s14083_s14 + $0x150] ss:$8 sps:$4 sm:$0xff]  }
 0xa69   : > { %v6107_v9 = vmax.f32 %v13400_v61, %v6002_v33  ;;  %6563 = vmatpush1.bf16.msra.mxu0 %v10591_v36  ;;  %7041 = vmatpush1.bf16.msra.mxu1 %v10594_v11  ;;  %v6004_v55 = vpop.f32.mrb[206].mxu0  ;;  %v10630_v29 = vld [vmem:[#allocation8 + $0x160] ss:$8 sps:$4 sm:$0xff]   ;;  %v10635_v33 = vld [vmem:[%s14083_s14 + $0x174] ss:$8 sps:$4 sm:$0xff]  }
 0xa6a   : > { %v6110_v2 = vmax.f32 %v5825_v38, %v6004_v55  ;;  %v6006_v53 = vpop.f32.mrb[207].mxu0  ;;  %6564 = vmatprep.subr.bf16.mxu0 %v10599_v12  ;;  %7042 = vmatprep.subr.bf16.mxu1 %v10602_v17  ;;  %v10632_v17 = vld [vmem:[#allocation8 + $0x164] ss:$8 sps:$4 sm:$0xff]  }
 0xa6b   : > { %v6111_v52 = vmax.f32 %v5827_v13, %v6006_v53  ;;  %v10609_v13 = vld [vmem:[%s14083_s14 + $0x130] ss:$8 sps:$4 sm:$0xff]  }
 0xa6c   : > { %v6130_v46 = vpack.c.bf16 %v6110_v2, %v6106_v4 }
 0xa6d   : > { %v6131_v58 = vpack.c.bf16 %v6111_v52, %v6107_v9  ;;  %6565 = vmatpush1.bf16.msra.mxu0 %v10597_v31  ;;  %7043 = vmatpush1.bf16.msra.mxu1 %v10600_v47  ;;  %v10638_v9 = vld [vmem:[#allocation8 + $0x174] ss:$8 sps:$4 sm:$0xff]  }
 0xa6e   : > { %6566 = vmatprep.subr.bf16.mxu0 %v10605_v7  ;;  %7044 = vmatprep.subr.bf16.mxu1 %v10608_v27  ;;  %v10633_v7 = vld [vmem:[%s14083_s14 + $0x170] ss:$8 sps:$4 sm:$0xff]  }
 0xa6f   : > { %v6010_v48 = vpop.f32.mrb[208].mxu0  ;;  %6533 = vmatprep.mubr.bf16.mxu0 %v6131_v58  ;;  %7011 = vmatprep.mubr.bf16.mxu1 %v6131_v58  ;;  %v10636_v27 = vld [vmem:[#allocation8 + $0x170] ss:$8 sps:$4 sm:$0xff]   ;;  %v10644_v58 = vld [vmem:[#allocation8 + $0x184] ss:$8 sps:$4 sm:$0xff]  }
 0xa70   : > { %v6114_v18 = vmax.f32 %v13402_v19, %v6010_v48  ;;  %v6012_v1 = vpop.f32.mrb[209].mxu0  ;;  %6534 = vmatmul.mubr.bf16.gmra.mrb[236].mxu0 %v6130_v46  ;;  %7012 = vmatmul.mubr.bf16.gmra.mrb[240].mxu1 %v6130_v46  ;;  %v10617_v19 = vld [vmem:[%s14083_s14 + $0x144] ss:$8 sps:$4 sm:$0xff]  }
 0xa71   : > { %v6115_v61 = vmax.f32 %v13404_v15, %v6012_v1  ;;  %6567 = vmatpush1.bf16.msra.mxu0 %v10603_v34  ;;  %7045 = vmatpush1.bf16.msra.mxu1 %v10606_v44  ;;  %v6014_v38 = vpop.f32.mrb[210].mxu0  ;;  %v10650_v48 = vld [vmem:[#allocation8 + $0x194] ss:$8 sps:$4 sm:$0xff]  }
 0xa72   : > { %v6118_v39 = vmax.f32 %v13406_v42, %v6014_v38  ;;  %v6016_v32 = vpop.f32.mrb[211].mxu0  ;;  %6568 = vmatprep.subr.bf16.mxu0 %v10611_v57  ;;  %7046 = vmatprep.subr.bf16.mxu1 %v10614_v6  ;;  %v10623_v42 = vld [vmem:[%s14083_s14 + $0x154] ss:$8 sps:$4 sm:$0xff]   ;;  %v10642_v57 = vld [vmem:[#allocation8 + $0x180] ss:$8 sps:$4 sm:$0xff]  }
 0xa73   : > { %v6119_v15 = vmax.f32 %v13408_v30, %v6016_v32  ;;  %v10647_v6 = vld [vmem:[%s14083_s14 + $0x194] ss:$8 sps:$4 sm:$0xff]  }
 0xa74   : > { %v6134_v40 = vpack.c.bf16 %v6118_v39, %v6114_v18 }
 0xa75   : > { %v6135_v54 = vpack.c.bf16 %v6119_v15, %v6115_v61  ;;  %6569 = vmatpush1.bf16.msra.mxu0 %v10609_v13  ;;  %7047 = vmatpush1.bf16.msra.mxu1 %v10612_v35  ;;  %v10645_v13 = vld [vmem:[%s14083_s14 + $0x190] ss:$8 sps:$4 sm:$0xff]  }
 0xa76   : > { %6570 = vmatprep.subr.bf16.mxu0 %v10617_v19  ;;  %7048 = vmatprep.subr.bf16.mxu1 %v10620_v49  ;;  %v10648_v35 = vld [vmem:[#allocation8 + $0x190] ss:$8 sps:$4 sm:$0xff]   ;;  %v10656_v19 = vld [vmem:[#allocation8 + $0x1a4] ss:$8 sps:$4 sm:$0xff]  }
 0xa77   : > { %v6020_v28 = vpop.f32.mrb[212].mxu0  ;;  %6543 = vmatprep.mubr.bf16.mxu0 %v6135_v54  ;;  %7021 = vmatprep.mubr.bf16.mxu1 %v6135_v54  ;;  %v10654_v54 = vld [vmem:[#allocation8 + $0x1a0] ss:$8 sps:$4 sm:$0xff]  }
 0xa78   : > { %v6122_v30 = vmax.f32 %v13410_v59, %v6020_v28  ;;  %v6022_v25 = vpop.f32.mrb[213].mxu0  ;;  %6544 = vmatmul.mubr.bf16.gmra.mrb[240].mxu0 %v6134_v40  ;;  %7022 = vmatmul.mubr.bf16.gmra.mrb[244].mxu1 %v6134_v40  ;;  %v10629_v59 = vld [vmem:[%s14083_s14 + $0x164] ss:$8 sps:$4 sm:$0xff]   ;;  %v10651_v40 = vld [vmem:[%s14083_s14 + $0x1a0] ss:$8 sps:$4 sm:$0xff]  }
 0xa79   : > { %v6123_v43 = vmax.f32 %v13412_v63, %v6022_v25  ;;  %6571 = vmatpush1.bf16.msra.mxu0 %v10615_v45  ;;  %7049 = vmatpush1.bf16.msra.mxu1 %v10618_v41  ;;  %v6024_v36 = vpop.f32.mrb[214].mxu0  ;;  %v10627_v63 = vld [vmem:[%s14083_s14 + $0x160] ss:$8 sps:$4 sm:$0xff]   ;;  %v10662_v45 = vld [vmem:[#allocation8 + $0x1b4] ss:$8 sps:$4 sm:$0xff]  }
 0xa7a   : > { %6572 = vmatprep.subr.bf16.mxu0 %v10623_v42  ;;  %7050 = vmatprep.subr.bf16.mxu1 %v10626_v60  ;;  %v6025_v11 = vpop.f32.mrb[215].mxu0  ;;  %v6138_v4 = vpack.c.bf16 %v6122_v30, %v6122_v30  ;;  %v10657_v30 = vld [vmem:[%s14083_s14 + $0x1b0] ss:$8 sps:$4 sm:$0xff]  }
 0xa7b   : > { %v6139_v12 = vpack.c.bf16 %v6123_v43, %v6123_v43  ;;  %v10660_v25 = vld [vmem:[#allocation8 + $0x1b0] ss:$8 sps:$4 sm:$0xff]  }
 0xa7d   : > { %6573 = vmatpush1.bf16.msra.mxu0 %v10621_v16  ;;  %7051 = vmatpush1.bf16.msra.mxu1 %v10624_v62 }
 0xa7e   : > { %6553 = vmatprep.mubr.bf16.mxu0 %v6139_v12  ;;  %7031 = vmatprep.mubr.bf16.mxu1 %v6139_v12 }
 0xa7f   : > { %v6061_v55 = vpop.f32.mrb[216].mxu0  ;;  %6574 = vmatprep.subr.bf16.mxu0 %v10629_v59  ;;  %7052 = vmatprep.subr.bf16.mxu1 %v10632_v17 }
 0xa80   : > { %v6100_v31 = vmax.f32 %v13414_v50, %v6061_v55  ;;  %v6063_v47 = vpop.f32.mrb[217].mxu0  ;;  %6554 = vmatmul.mubr.bf16.gmra.mrb[244].mxu0 %v6138_v4  ;;  %7032 = vmatmul.mubr.bf16.gmra.mrb[248].mxu1 %v6138_v4  ;;  %v10641_v50 = vld [vmem:[%s14083_s14 + $0x184] ss:$8 sps:$4 sm:$0xff]   ;;  %v10669_v4 = vld [vmem:[%s14085_s16 + $0xf0] sm:$0xff]  }
 0xa81   : > { %v6101_v2 = vmax.f32 %v13416_v3, %v6063_v47  ;;  %6575 = vmatpush1.bf16.msra.mxu0 %v10627_v63  ;;  %7053 = vmatpush1.bf16.msra.mxu1 %v10630_v29  ;;  %v6065_v53 = vpop.f32.mrb[218].mxu0  ;;  %v10664_v29 = vld [vmem:[%s14085_s16 + $0x78] sm:$0xff]   ;;  %v10670_v55 = vld [vmem:[%s14085_s16 + $0x90] sm:$0xff]  }
 0xa82   : > { %v6104_v52 = vmax.f32 %v13418_v14, %v6065_v53  ;;  %v6067_v46 = vpop.f32.mrb[219].mxu0  ;;  %6576 = vmatprep.subr.bf16.mxu0 %v10635_v33  ;;  %7054 = vmatprep.subr.bf16.mxu1 %v10638_v9  ;;  %v10639_v14 = vld [vmem:[%s14083_s14 + $0x180] ss:$8 sps:$4 sm:$0xff]   ;;  %v10671_v9 = vld [vmem:[%s14085_s16 + $0xf8] sm:$0xff]  }
 0xa83   : > { %v6105_v3 = vmax.f32 %v13420_v26, %v6067_v46  ;;  %v10668_v33 = vld [vmem:[%s14085_s16 + $0x88] sm:$0xff]  }
 0xa84   : > { %v13502_v34 = vpack.c.bf16 %v6104_v52, %v6100_v31  ;;  %v10673_v31 = vld [vmem:[%s14085_s16 + $0x100] sm:$0xff]   ;;  %v10675_v53 = vld [vmem:[%s14085_s16 + $0x108] sm:$0xff]   ;;  %v10677_v52 = vld [vmem:[%s14085_s16 + $0x110] sm:$0xff]  }
 0xa85   : > { %v6129_v44 = vpack.c.bf16 %v6105_v3, %v6101_v2  ;;  %6577 = vmatpush1.bf16.msra.mxu0 %v10633_v7  ;;  %7055 = vmatpush1.bf16.msra.mxu1 %v10636_v27  ;;  %v10672_v2 = vld [vmem:[%s14085_s16 + $0x98] sm:$0xff]   ;;  %v10674_v27 = vld [vmem:[%s14085_s16 + $0xa0] sm:$0xff]   ;;  %v10676_v46 = vld [vmem:[%s14085_s16 + $0xa8] sm:$0xff]  }
 0xa86   : > { %6578 = vmatprep.subr.bf16.mxu0 %v10641_v50  ;;  %7056 = vmatprep.subr.bf16.mxu1 %v10644_v58  ;;  %v10679_v50 = vld [vmem:[%s14085_s16 + $0x118] sm:$0xff]   ;;  %v10678_v58 = vld [vmem:[%s14085_s16 + $0xb0] sm:$0xff]   ;;  %v10681_v3 = vld [vmem:[%s14085_s16 + $0x120] sm:$0xff]  }
 0xa87   : > { %v6071_v18 = vpop.f32.mrb[220].mxu0  ;;  %9222 = vmatprep.mubr.msk.bf16.mxu0 %vm6478_vm11, %v6129_v44  ;;  %9282 = vmatprep.mubr.msk.bf16.mxu1 %vm6478_vm11, %v6129_v44  ;;  %v10683_v44 = vld [vmem:[%s14085_s16 + $0x128] sm:$0xff]  }
 0xa88   : > { %v6108_v26 = vmax.f32 %v13422_v20, %v6071_v18  ;;  %v6073_v1 = vpop.f32.mrb[221].mxu0  ;;  %v10653_v20 = vld [vmem:[%s14083_s14 + $0x1a4] ss:$8 sps:$4 sm:$0xff]   ;;  %v10687_v18 = vld [vmem:[%s14085_s16 + $0x138] sm:$0xff]  }
 0xa89   : > { %v6109_v61 = vmax.f32 %v13424_v56, %v6073_v1  ;;  %6579 = vmatpush1.bf16.msra.mxu0 %v10639_v14  ;;  %7057 = vmatpush1.bf16.msra.mxu1 %v10642_v57  ;;  %v6075_v38 = vpop.f32.mrb[222].mxu0  ;;  %v10682_v14 = vld [vmem:[%s14085_s16 + $0xc0] sm:$0xff]   ;;  %v10684_v57 = vld [vmem:[%s14085_s16 + $0xc8] sm:$0xff]  }
 0xa8a   : > { %v6112_v39 = vmax.f32 %v13426_v10, %v6075_v38  ;;  %v6077_v32 = vpop.f32.mrb[223].mxu0  ;;  %6580 = vmatprep.subr.bf16.mxu0 %v10647_v6  ;;  %7058 = vmatprep.subr.bf16.mxu1 %v10650_v48  ;;  %v10659_v10 = vld [vmem:[%s14083_s14 + $0x1b4] ss:$8 sps:$4 sm:$0xff]   ;;  %v10689_v1 = vld [vmem:[%s14085_s16 + $0x140] sm:$0xff]  }
 0xa8b   : > { %v6113_v56 = vmax.f32 %v13428_v22, %v6077_v32  ;;  %v10685_v6 = vld [vmem:[%s14085_s16 + $0x130] sm:$0xff]  }
 0xa8c   : > { %v6132_v49 = vpack.c.bf16 %v6112_v39, %v6108_v26  ;;  %v10686_v48 = vld [vmem:[%s14085_s16 + $0xd0] sm:$0xff]   ;;  %v10688_v26 = vld [vmem:[%s14085_s16 + $0xd8] sm:$0xff]  }
 0xa8d   : > { %v6133_v15 = vpack.c.bf16 %v6113_v56, %v6109_v61  ;;  %6581 = vmatpush1.bf16.msra.mxu0 %v10645_v13  ;;  %7059 = vmatpush1.bf16.msra.mxu1 %v10648_v35  ;;  %v10691_v61 = vld [vmem:[%s14085_s16 + $0x148] sm:$0xff]  }
 0xa8e   : > { %6582 = vmatprep.subr.bf16.mxu0 %v10653_v20  ;;  %7060 = vmatprep.subr.bf16.mxu1 %v10656_v19 }
 0xa8f   : > { %v6081_v41 = vpop.f32.mrb[224].mxu0 }
 0xa90   : > { %v6116_v42 = vmax.f32 %v13430_v21, %v6081_v41  ;;  %v6083_v22 = vpop.f32.mrb[225].mxu0 }
 0xa91   : > { %v6117_v60 = vmax.f32 %v13432_v5, %v6083_v22  ;;  %6583 = vmatpush1.bf16.msra.mxu0 %v10651_v40  ;;  %7061 = vmatpush1.bf16.msra.mxu1 %v10654_v54  ;;  %v6085_v28 = vpop.f32.mrb[226].mxu0  ;;  %v10663_v5 = vld [vmem:[%s14085_s16 + $0x70] sm:$0xff]  }
 0xa92   : > { %v6120_v43 = vmax.f32 %v13434_v23, %v6085_v28  ;;  %v6087_v16 = vpop.f32.mrb[227].mxu0  ;;  %6584 = vmatprep.subr.bf16.mxu0 %v10659_v10  ;;  %7062 = vmatprep.subr.bf16.mxu1 %v10662_v45  ;;  %v10665_v23 = vld [vmem:[%s14085_s16 + $0xe0] sm:$0xff]  }
 0xa93   : > { %v6121_v62 = vmax.f32 %v13436_v37, %v6087_v16 }
 0xa94   : > { %v6136_v36 = vpack.c.bf16 %v6120_v43, %v6116_v42 }
 0xa95   : > { %v6137_v21 = vpack.c.bf16 %v6121_v62, %v6117_v60  ;;  %6585 = vmatpush1.bf16.msra.mxu0 %v10657_v30  ;;  %7063 = vmatpush1.bf16.msra.mxu1 %v10660_v25  ;;  %v10690_v60 = vld [vmem:[%s14085_s16] sm:$0xff]  }
 0xa96   : > { %7281 = vmatprep.subr.bf16.mxu0 %v11000_v8  ;;  %7563 = vmatprep.subr.bf16.mxu1 %v11000_v8 }
 0xa97   : > { %v6091_v11 = vpop.f32.mrb[228].mxu0 }
 0xa98   : > { %v6124_v12 = vmax.f32 %v13438_v24, %v6091_v11  ;;  %6595 = vmatmul.mubr.bf16.vlgmr.msra.gmra.mrb[232].mxu0 %v13502_v34  ;;  %7073 = vmatmul.mubr.bf16.vlgmr.msra.gmra.mrb[236].mxu1 %v13502_v34  ;;  %v6093_v37 = vpop.f32.mrb[229].mxu0  ;;  %v10667_v24 = vld [vmem:[%s14085_s16 + $0xe8] sm:$0xff]   ;;  %v10680_v34 = vld [vmem:[%s14085_s16 + $0xb8] sm:$0xff]  }
 0xa99   : > { %v6125_v59 = vmax.f32 %v13440_v51, %v6093_v37  ;;  %9223 = vmatprep.mubr.msk.bf16.mxu0 %vm6478_vm11, %v6133_v15  ;;  %9283 = vmatprep.mubr.msk.bf16.mxu1 %vm6478_vm11, %v6133_v15  ;;  %v6095_v17 = vpop.f32.mrb[230].mxu0  ;;  %v10666_v51 = vld [vmem:[%s14085_s16 + $0x80] sm:$0xff]  }
 0xa9a   : > { %v6096_v63 = vpop.f32.mrb[231].mxu0  ;;  %7282 = vmatpush1.bf16.msra.mxu0 %v10663_v5  ;;  %7564 = vmatpush1.bf16.msra.mxu1 %v10665_v23  ;;  %v6140_v7 = vpack.c.bf16 %v6124_v12, %v6124_v12  ;;  %v10692_v12 = vld [vmem:[%s14085_s16 + $0x8] sm:$0xff]   ;;  %v10693_v17 = vld [vmem:[%s14085_s16 + $0x1c0] sm:$0xff]  }
 0xa9b   : > { %7283 = vmatprep.subr.bf16.mxu0 %v11000_v8  ;;  %7565 = vmatprep.subr.bf16.mxu1 %v11000_v8  ;;  %v6141_v47 = vpack.c.bf16 %v6125_v59, %v6125_v59 }
 0xa9e   : > { %7284 = vmatpush1.bf16.msra.mxu0 %v10664_v29  ;;  %7566 = vmatpush1.bf16.msra.mxu1 %v10667_v24  ;;  %v10694_v24 = vld [vmem:[%s14085_s16 + $0x10] sm:$0xff]  }
 0xa9f   : > { %7285 = vmatprep.subr.bf16.mxu0 %v11000_v8  ;;  %7567 = vmatprep.subr.bf16.mxu1 %v11000_v8 }
 0xaa0   : > { %6605 = vmatmul.mubr.bf16.gmra.mrb[236].mxu0 %v6132_v49  ;;  %7083 = vmatmul.mubr.bf16.gmra.mrb[240].mxu1 %v6132_v49 }
 0xaa1   : > { %9224 = vmatprep.mubr.msk.bf16.mxu0 %vm6478_vm11, %v6137_v21  ;;  %9284 = vmatprep.mubr.msk.bf16.mxu1 %vm6478_vm11, %v6137_v21 }
 0xaa2   : > { %7286 = vmatpush1.bf16.msra.mxu0 %v10666_v51  ;;  %7568 = vmatpush1.bf16.msra.mxu1 %v10669_v4 }
 0xaa3   : > { %7287 = vmatprep.subr.bf16.mxu0 %v11000_v8  ;;  %7569 = vmatprep.subr.bf16.mxu1 %v11000_v8 }
 0xaa6   : > { %7288 = vmatpush1.bf16.msra.mxu0 %v10668_v33  ;;  %7570 = vmatpush1.bf16.msra.mxu1 %v10671_v9 }
 0xaa7   : > { %7289 = vmatprep.subr.bf16.mxu0 %v11000_v8  ;;  %7571 = vmatprep.subr.bf16.mxu1 %v11000_v8 }
 0xaa8   : > { %6615 = vmatmul.mubr.bf16.gmra.mrb[240].mxu0 %v6136_v36  ;;  %7093 = vmatmul.mubr.bf16.gmra.mrb[244].mxu1 %v6136_v36 }
 0xaa9   : > { %9225 = vmatprep.mubr.msk.bf16.mxu0 %vm6478_vm11, %v6141_v47  ;;  %9285 = vmatprep.mubr.msk.bf16.mxu1 %vm6478_vm11, %v6141_v47  ;;  %v10695_v47 = vld [vmem:[%s14085_s16 + $0x1c8] sm:$0xff]  }
 0xaaa   : > { %7290 = vmatpush1.bf16.msra.mxu0 %v10670_v55  ;;  %7572 = vmatpush1.bf16.msra.mxu1 %v10673_v31 }
 0xaab   : > { %7291 = vmatprep.subr.bf16.mxu0 %v11000_v8  ;;  %7573 = vmatprep.subr.bf16.mxu1 %v11000_v8 }
 0xaae   : > { %7292 = vmatpush1.bf16.msra.mxu0 %v10672_v2  ;;  %7574 = vmatpush1.bf16.msra.mxu1 %v10675_v53 }
 0xaaf   : > { %7293 = vmatprep.subr.bf16.mxu0 %v11000_v8  ;;  %7575 = vmatprep.subr.bf16.mxu1 %v11000_v8 }
 0xab0   : > { %6625 = vmatmul.mubr.bf16.gmra.mrb[244].mxu0 %v6140_v7  ;;  %7103 = vmatmul.mubr.bf16.gmra.mrb[248].mxu1 %v6140_v7 }
 0xab2   : > { %7294 = vmatpush1.bf16.msra.mxu0 %v10674_v27  ;;  %7576 = vmatpush1.bf16.msra.mxu1 %v10677_v52  ;;  %v10696_v52 = vld [vmem:[%s14085_s16 + $0x18] sm:$0xff]  }
 0xab3   : > { %7295 = vmatprep.subr.bf16.mxu0 %v11000_v8  ;;  %7577 = vmatprep.subr.bf16.mxu1 %v11000_v8 }
 0xab6   : > { %7296 = vmatpush1.bf16.msra.mxu0 %v10676_v46  ;;  %7578 = vmatpush1.bf16.msra.mxu1 %v10679_v50 }
 0xab7   : > { %7297 = vmatprep.subr.bf16.mxu0 %v11000_v8  ;;  %7579 = vmatprep.subr.bf16.mxu1 %v11000_v8 }
 0xaba   : > { %7298 = vmatpush1.bf16.msra.mxu0 %v10678_v58  ;;  %7580 = vmatpush1.bf16.msra.mxu1 %v10681_v3  ;;  %v10697_v58 = vld [vmem:[%s14085_s16 + $0x1d0] sm:$0xff]  }
 0xabb   : > { %7299 = vmatprep.subr.bf16.mxu0 %v11000_v8  ;;  %7581 = vmatprep.subr.bf16.mxu1 %v11000_v8 }
 0xabe   : > { %7300 = vmatpush1.bf16.msra.mxu0 %v10680_v34  ;;  %7582 = vmatpush1.bf16.msra.mxu1 %v10683_v44  ;;  %v10698_v44 = vld [vmem:[%s14085_s16 + $0x20] sm:$0xff]  }
 0xabf   : > { %7301 = vmatprep.subr.bf16.mxu0 %v11000_v8  ;;  %7583 = vmatprep.subr.bf16.mxu1 %v11000_v8 }
 0xac2   : > { %7302 = vmatpush1.bf16.msra.mxu0 %v10682_v14  ;;  %7584 = vmatpush1.bf16.msra.mxu1 %v10685_v6 }
 0xac3   : > { %7303 = vmatprep.subr.bf16.mxu0 %v11000_v8  ;;  %7585 = vmatprep.subr.bf16.mxu1 %v11000_v8 }
 0xac6   : > { %7304 = vmatpush1.bf16.msra.mxu0 %v10684_v57  ;;  %7586 = vmatpush1.bf16.msra.mxu1 %v10687_v18 }
 0xac7   : > { %7305 = vmatprep.subr.bf16.mxu0 %v11000_v8  ;;  %7587 = vmatprep.subr.bf16.mxu1 %v11000_v8 }
 0xaca   : > { %7306 = vmatpush1.bf16.msra.mxu0 %v10686_v48  ;;  %7588 = vmatpush1.bf16.msra.mxu1 %v10689_v1  ;;  %v10699_v1 = vld [vmem:[%s14085_s16 + $0x1d8] sm:$0xff]  }
 0xacb   : > { %7307 = vmatprep.subr.bf16.mxu0 %v11000_v8  ;;  %7589 = vmatprep.subr.bf16.mxu1 %v11000_v8 }
 0xace   : > { %7308 = vmatpush1.bf16.msra.mxu0 %v10688_v26  ;;  %7590 = vmatpush1.bf16.msra.mxu1 %v10691_v61 }
 0xacf   : > { %7408 = vmatprep.subr.bf16.mxu0 %v11000_v8  ;;  %7880 = vmatprep.subr.bf16.mxu1 %v11000_v8 }
 0xb6b   : > { %v6596_v38 = vpop.f32.mrb[232].mxu0  ;;  %v7074_v13 = vpop.f32.mrb[236].mxu1 }
 0xb6c   : > { %v7111_v35 = vmax.f32 %v6596_v38, %v7074_v13  ;;  %v6598_v39 = vpop.f32.mrb[233].mxu0  ;;  %v7076_v32 = vpop.f32.mrb[237].mxu1  ;;  %v10700_v13 = vld [vmem:[%s14085_s16 + $0x28] sm:$0xff]  }
 0xb6d   : > { %v7112_v20 = vmax.f32 %v6598_v39, %v7076_v32  ;;  %v6600_v19 = vpop.f32.mrb[234].mxu0  ;;  %v7078_v56 = vpop.f32.mrb[238].mxu1  ;;  %v10702_v39 = vld [vmem:[%s14085_s16 + $0x30] sm:$0xff]   ;;  %v10703_v32 = vld [vmem:[%s14085_s16 + $0x1e8] sm:$0xff]  }
 0xb6e   : > { %v7113_v49 = vmax.f32 %v6600_v19, %v7078_v56  ;;  %v6602_v15 = vpop.f32.mrb[235].mxu0  ;;  %v7080_v40 = vpop.f32.mrb[239].mxu1  ;;  %v10705_v19 = vld [vmem:[%s14085_s16 + $0x1f0] sm:$0xff]   ;;  %v10706_v56 = vld [vmem:[%s14085_s16 + $0x40] sm:$0xff]  }
 0xb6f   : > { %v7114_v54 = vmax.f32 %v6602_v15, %v7080_v40  ;;  %v10708_v15 = vld [vmem:[%s14085_s16 + $0x48] sm:$0xff]   ;;  %v10709_v40 = vld [vmem:[%s14085_s16 + $0x200] sm:$0xff]  }
 0xb70   : > { %v13659_v10 = vpack.c.bf16 %v7113_v49, %v7111_v35  ;;  %v10701_v35 = vld [vmem:[%s14085_s16 + $0x1e0] sm:$0xff]   ;;  %v10707_v49 = vld [vmem:[%s14085_s16 + $0x1f8] sm:$0xff]  }
 0xb71   : > { %v7126_v45 = vpack.c.bf16 %v7114_v54, %v7112_v20  ;;  %v10704_v20 = vld [vmem:[%s14085_s16 + $0x38] sm:$0xff]   ;;  %v10710_v54 = vld [vmem:[%s14085_s16 + $0x50] sm:$0xff]  }
 0xb72   : > { %v7191_v28 = vrot.slane %v13659_v10, 4 }
 0xb73   : > { %v7192_v41 = vrot.slane %v7126_v45, 4  ;;  %v6606_v42 = vpop.f32.mrb[236].mxu0  ;;  %v7084_v22 = vpop.f32.mrb[240].mxu1 }
 0xb74   : > { %v7115_v30 = vmax.f32 %v6606_v42, %v7084_v22  ;;  %v6608_v25 = vpop.f32.mrb[237].mxu0  ;;  %v7086_v43 = vpop.f32.mrb[241].mxu1  ;;  %v10713_v42 = vld [vmem:[%s14085_s16 + $0x210] sm:$0xff]   ;;  %v10714_v22 = vld [vmem:[%s14085_s16 + $0x60] sm:$0xff]  }
 0xb75   : > { %v7116_v16 = vmax.f32 %v6608_v25, %v7086_v43  ;;  %v6610_v62 = vpop.f32.mrb[238].mxu0  ;;  %v7088_v36 = vpop.f32.mrb[242].mxu1  ;;  %9300 = vmatprep.mubr.msk.bf16.mxu0 %vm4068_vm10, %v7192_v41  ;;  %v10712_v41 = vld [vmem:[%s14085_s16 + $0x58] sm:$0xff]   ;;  %v10718_v25 = vld [vmem:[%s14085_s16 + $0x150] sm:$0xff]  }
 0xb76   : > { %v7117_v21 = vmax.f32 %v6610_v62, %v7088_v36  ;;  %v6612_v5 = vpop.f32.mrb[239].mxu0  ;;  %v7090_v23 = vpop.f32.mrb[243].mxu1  ;;  %7314 = vmatmul.mubr.bf16.vlgmr.msra.gmra.mrb[248].mxu0 %v7191_v28  ;;  %v10716_v28 = vld [vmem:[%s14085_s16 + $0x68] sm:$0xff]   ;;  %v10720_v62 = vld [vmem:[%s14085_s16 + $0x158] sm:$0xff]   ;;  %v10721_v36 = vld [vmem:[%s14085_s16 + $0x2a0] sm:$0xff]  }
 0xb77   : > { %v7118_v11 = vmax.f32 %v6612_v5, %v7090_v23  ;;  %7409 = vmatpush1.bf16.msra.mxu0 %v10690_v60  ;;  %9315 = vmatprep.mubr.msk.bf16.mxu0 %vm4068_vm10, %v7126_v45  ;;  %v10711_v45 = vld [vmem:[%s14085_s16 + $0x208] sm:$0xff]   ;;  %v10715_v60 = vld [vmem:[%s14085_s16 + $0x218] sm:$0xff]  }
 0xb78   : > { %v13670_v37 = vpack.c.bf16 %v7117_v21, %v7115_v30  ;;  %7410 = vmatprep.subr.bf16.mxu0 %v11000_v8  ;;  %v10717_v30 = vld [vmem:[%s14085_s16 + $0x220] sm:$0xff]   ;;  %v10723_v5 = vld [vmem:[%s14085_s16 + $0x2a8] sm:$0xff]  }
 0xb79   : > { %v13673_v59 = vpack.c.bf16 %v7118_v11, %v7116_v16  ;;  %v10719_v16 = vld [vmem:[%s14085_s16 + $0x228] sm:$0xff]   ;;  %v10722_v21 = vld [vmem:[%s14085_s16 + $0x160] sm:$0xff]   ;;  %v10725_v11 = vld [vmem:[%s14085_s16 + $0x2b0] sm:$0xff]  }
 0xb7a   : > { %v10724_v23 = vld [vmem:[%s14085_s16 + $0x168] sm:$0xff]  }
 0xb7b   : > { %7411 = vmatpush1.bf16.msra.mxu0 %v10692_v12  ;;  %v6616_v63 = vpop.f32.mrb[240].mxu0  ;;  %v7094_v29 = vpop.f32.mrb[244].mxu1  ;;  %9330 = vmatprep.mubr.msk.bf16.mxu1 %vm4068_vm10, %v13673_v59  ;;  %v7635_v43 = vrot.slane %v13673_v59, 4  ;;  %v10726_v12 = vld [vmem:[%s14085_s16 + $0x170] sm:$0xff]   ;;  %v10727_v59 = vld [vmem:[%s14085_s16 + $0x2b8] sm:$0xff]  }
 0xb7c   : > { %v7119_v51 = vmax.f32 %v6616_v63, %v7094_v29  ;;  %v6618_v4 = vpop.f32.mrb[241].mxu0  ;;  %v7096_v33 = vpop.f32.mrb[245].mxu1  ;;  %7596 = vmatmul.mubr.bf16.vlgmr.msra.gmra.mrb[252].mxu1 %v13670_v37  ;;  %7412 = vmatprep.subr.bf16.mxu0 %v11000_v8  ;;  %v10729_v63 = vld [vmem:[%s14085_s16 + $0x2c0] sm:$0xff]  }
 0xb7d   : > { %v7120_v9 = vmax.f32 %v6618_v4, %v7096_v33  ;;  %7881 = vmatpush1.bf16.msra.mxu1 %v10693_v17  ;;  %v6620_v55 = vpop.f32.mrb[242].mxu0  ;;  %v7098_v31 = vpop.f32.mrb[246].mxu1  ;;  %v10728_v17 = vld [vmem:[%s14085_s16 + $0x178] sm:$0xff]   ;;  %v10730_v29 = vld [vmem:[%s14085_s16 + $0x180] sm:$0xff]   ;;  %v10733_v4 = vld [vmem:[%s14085_s16 + $0x2d0] sm:$0xff]  }
 0xb7e   : > { %v7121_v2 = vmax.f32 %v6620_v55, %v7098_v31  ;;  %v6622_v53 = vpop.f32.mrb[243].mxu0  ;;  %v7100_v7 = vpop.f32.mrb[247].mxu1  ;;  %7882 = vmatprep.subr.bf16.mxu1 %v11000_v8  ;;  %v10734_v33 = vld [vmem:[%s14085_s16 + $0x190] sm:$0xff]   ;;  %v10736_v55 = vld [vmem:[%s14085_s16 + $0x198] sm:$0xff]   ;;  %v10737_v31 = vld [vmem:[%s14085_s16 + $0x2e0] sm:$0xff]  }
 0xb7f   : > { %v7122_v27 = vmax.f32 %v6622_v53, %v7100_v7  ;;  %7413 = vmatpush1.bf16.msra.mxu0 %v10694_v24  ;;  %v10731_v24 = vld [vmem:[%s14085_s16 + $0x2c8] sm:$0xff]   ;;  %v10741_v7 = vld [vmem:[%s14085_s16 + $0x2f0] sm:$0xff]  }
 0xb80   : > { %v13692_v46 = vpack.c.bf16 %v7121_v2, %v7119_v51  ;;  %7414 = vmatprep.subr.bf16.mxu0 %v11000_v8  ;;  %v10732_v51 = vld [vmem:[%s14085_s16 + $0x188] sm:$0xff]  }
 0xb81   : > { %v13695_v50 = vpack.c.bf16 %v7122_v27, %v7120_v9  ;;  %7883 = vmatpush1.bf16.msra.mxu1 %v10695_v47  ;;  %v10735_v9 = vld [vmem:[%s14085_s16 + $0x2d8] sm:$0xff]   ;;  %v10738_v47 = vld [vmem:[%s14085_s16 + $0x1a0] sm:$0xff]   ;;  %v10739_v2 = vld [vmem:[%s14085_s16 + $0x2e8] sm:$0xff]  }
 0xb82   : > { %7884 = vmatprep.subr.bf16.mxu1 %v11000_v8  ;;  %v10740_v53 = vld [vmem:[%s14085_s16 + $0x1a8] sm:$0xff]   ;;  %v10742_v27 = vld [vmem:[%s14085_s16 + $0x1b0] sm:$0xff]  }
 0xb83   : > { %7415 = vmatpush1.bf16.msra.mxu0 %v10696_v52  ;;  %v6626_v3 = vpop.f32.mrb[244].mxu0  ;;  %v7104_v34 = vpop.f32.mrb[248].mxu1  ;;  %9360 = vmatprep.mubr.msk.bf16.mxu1 %vm4068_vm10, %v13695_v50  ;;  %v10743_v52 = vld [vmem:[%s14085_s16 + $0x2f8] sm:$0xff]  }
 0xb84   : > { %v13706_v14 = vmax.f32 %v6626_v3, %v7104_v34  ;;  %v6628_v57 = vpop.f32.mrb[245].mxu0  ;;  %v7106_v6 = vpop.f32.mrb[249].mxu1  ;;  %7416 = vmatprep.subr.bf16.mxu0 %v11000_v8  ;;  %v10745_v3 = vld [vmem:[%s14085_s16 + $0x300] sm:$0xff]   ;;  %v10746_v34 = vld [vmem:[%s14085_s16 + $0x230] sm:$0xff]  }
 0xb85   : > { %v13709_v48 = vmax.f32 %v6628_v57, %v7106_v6  ;;  %7885 = vmatpush1.bf16.msra.mxu1 %v10697_v58  ;;  %v6630_v18 = vpop.f32.mrb[246].mxu0  ;;  %v7108_v26 = vpop.f32.mrb[250].mxu1  ;;  %v10744_v58 = vld [vmem:[%s14085_s16 + $0x1b8] sm:$0xff]   ;;  %v7952_v57 = vrot.slane %v13695_v50, 4  ;;  %v10747_v6 = vld [vmem:[%s14085_s16 + $0x308] sm:$0xff]   ;;  %v10749_v50 = vld [vmem:[%s14085_s16 + $0x240] sm:$0xff]  }
 0xb86   : > { %v6631_v61 = vpop.f32.mrb[247].mxu0  ;;  %v7109_v38 = vpop.f32.mrb[251].mxu1  ;;  %7886 = vmatprep.subr.bf16.mxu1 %v11000_v8  ;;  %v10750_v18 = vld [vmem:[%s14085_s16 + $0x248] sm:$0xff]   ;;  %v10752_v26 = vld [vmem:[%s14085_s16 + $0x258] sm:$0xff]  }
 0xb87   : > { %7417 = vmatpush1.bf16.msra.mxu0 %v10698_v44  ;;  %v7634_v44 = vrot.slane %v13670_v37, 4  ;;  %v7131_v37 = vpack.c.bf16 %v13706_v14, %v13706_v14  ;;  %v10751_v14 = vld [vmem:[%s14085_s16 + $0x250] sm:$0xff]   ;;  %v10754_v61 = vld [vmem:[%s14085_s16 + $0x268] sm:$0xff]  }
 0xb88   : > { %7418 = vmatprep.subr.bf16.mxu0 %v11000_v8  ;;  %v10755_v38 = vld [vmem:[%s14085_s16 + $0x270] sm:$0xff]  }
 0xb89   : > { %7887 = vmatpush1.bf16.msra.mxu1 %v10699_v1  ;;  %v10753_v1 = vld [vmem:[%s14085_s16 + $0x260] sm:$0xff]  }
 0xb8a   : > { %7888 = vmatprep.subr.bf16.mxu1 %v11000_v8 }
 0xb8b   : > { %7419 = vmatpush1.bf16.msra.mxu0 %v10700_v13  ;;  %v10756_v13 = vld [vmem:[%s14085_s16 + $0x278] sm:$0xff]  }
 0xb8c   : > { %7420 = vmatprep.subr.bf16.mxu0 %v11000_v8 }
 0xb8d   : > { %7889 = vmatpush1.bf16.msra.mxu1 %v10701_v35  ;;  %v10757_v35 = vld [vmem:[%s14085_s16 + $0x280] sm:$0xff]  }
 0xb8e   : > { %7890 = vmatprep.subr.bf16.mxu1 %v11000_v8 }
 0xb8f   : > { %7421 = vmatpush1.bf16.msra.mxu0 %v10702_v39  ;;  %v10758_v39 = vld [vmem:[%s14085_s16 + $0x288] sm:$0xff]  }
 0xb90   : > { %7422 = vmatprep.subr.bf16.mxu0 %v11000_v8 }
 0xb91   : > { %7891 = vmatpush1.bf16.msra.mxu1 %v10703_v32  ;;  %v10759_v32 = vld [vmem:[%s14085_s16 + $0x290] sm:$0xff]  }
 0xb92   : > { %7892 = vmatprep.subr.bf16.mxu1 %v11000_v8 }
 0xb93   : > { %7423 = vmatpush1.bf16.msra.mxu0 %v10704_v20  ;;  %v10760_v20 = vld [vmem:[%s14085_s16 + $0x298] sm:$0xff]  }
 0xb94   : > { %7424 = vmatprep.subr.bf16.mxu0 %v11000_v8 }
 0xb95   : > { %7893 = vmatpush1.bf16.msra.mxu1 %v10705_v19  ;;  %v7951_v19 = vrot.slane %v13692_v46, 4 }
 0xb96   : > { %7894 = vmatprep.subr.bf16.mxu1 %v11000_v8 }
 0xb97   : > { %7425 = vmatpush1.bf16.msra.mxu0 %v10706_v56  ;;  %v10761_v56 = vld [vmem:[%s14087_s18] sm:$0xff]  }
 0xb98   : > { %7426 = vmatprep.subr.bf16.mxu0 %v11000_v8 }
 0xb99   : > { %7895 = vmatpush1.bf16.msra.mxu1 %v10707_v49  ;;  %v10762_v49 = vld [vmem:[%s14087_s18 + $0x8] sm:$0xff]  }
 0xb9a   : > { %7896 = vmatprep.subr.bf16.mxu1 %v11000_v8 }
 0xb9b   : > { %7427 = vmatpush1.bf16.msra.mxu0 %v10708_v15 }
 0xb9c   : > { %7428 = vmatprep.subr.bf16.mxu0 %v11000_v8 }
 0xb9d   : > { %7897 = vmatpush1.bf16.msra.mxu1 %v10709_v40 }
 0xb9e   : > { %7898 = vmatprep.subr.bf16.mxu1 %v11000_v8 }
 0xb9f   : > { %7429 = vmatpush1.bf16.msra.mxu0 %v10710_v54 }
 0xba0   : > { %7430 = vmatprep.subr.bf16.mxu0 %v11000_v8 }
 0xba1   : > { %7899 = vmatpush1.bf16.msra.mxu1 %v10711_v45  ;;  %v10764_v45 = vld [vmem:[%s14087_s18 + $0x18] sm:$0xff]  }
 0xba2   : > { %7900 = vmatprep.subr.bf16.mxu1 %v11000_v8 }
 0xba3   : > { %7431 = vmatpush1.bf16.msra.mxu0 %v10712_v41 }
 0xba4   : > { %7432 = vmatprep.subr.bf16.mxu0 %v11000_v8 }
 0xba5   : > { %7901 = vmatpush1.bf16.msra.mxu1 %v10713_v42 }
 0xba6   : > { %7902 = vmatprep.subr.bf16.mxu1 %v11000_v8 }
 0xba7   : > { %7433 = vmatpush1.bf16.msra.mxu0 %v10714_v22  ;;  %v10765_v22 = vld [vmem:[%s14087_s18 + $0x20] sm:$0xff]  }
 0xba8   : > { %7434 = vmatprep.subr.bf16.mxu0 %v11000_v8 }
 0xba9   : > { %7903 = vmatpush1.bf16.msra.mxu1 %v10715_v60 }
 0xbaa   : > { %7904 = vmatprep.subr.bf16.mxu1 %v11000_v8 }
 0xbab   : > { %7435 = vmatpush1.bf16.msra.mxu0 %v10716_v28 }
 0xbac   : > { %7724 = vmatprep.subr.bf16.mxu0 %v11000_v8 }
 0xbad   : > { %7905 = vmatpush1.bf16.msra.mxu1 %v10717_v30  ;;  %v10766_v30 = vld [vmem:[%s14087_s18 + $0x28] sm:$0xff]  }
 0xbae   : > { %7441 = vmatmul.mubr.bf16.vlgmr.msra.gmra.mrb[252].mxu0 %v13659_v10  ;;  %7906 = vmatprep.subr.bf16.mxu1 %v11000_v8  ;;  %v7132_v10 = vpack.c.bf16 %v13709_v48, %v13709_v48  ;;  %v10748_v48 = vld [vmem:[%s14085_s16 + $0x238] sm:$0xff]  }
 0xbaf   : > { %7725 = vmatpush1.bf16.msra.mxu0 %v10718_v25  ;;  %9345 = vmatprep.mubr.msk.bf16.mxu0 %vm4068_vm10, %v7635_v43  ;;  %v10767_v25 = vld [vmem:[%s14087_s18 + $0x30] sm:$0xff]   ;;  %v10768_v43 = vld [vmem:[%s14087_s18 + $0x38] sm:$0xff]  }
 0xbb0   : > { %7726 = vmatprep.subr.bf16.mxu0 %v11000_v8 }
 0xbb1   : > { %7907 = vmatpush1.bf16.msra.mxu1 %v10719_v16 }
 0xbb2   : > { %8197 = vmatprep.subr.bf16.mxu1 %v11000_v8 }
 0xbb3   : > { %7727 = vmatpush1.bf16.msra.mxu0 %v10720_v62 }
 0xbb4   : > { %7913 = vmatmul.mubr.bf16.vlgmr.msra.gmra.mrb[0].mxu1 %v13692_v46  ;;  %7728 = vmatprep.subr.bf16.mxu0 %v11000_v8 }
 0xbb5   : > { %8198 = vmatpush1.bf16.msra.mxu1 %v10721_v36  ;;  %9390 = vmatprep.mubr.msk.bf16.mxu1 %vm4068_vm10, %v7132_v10 }
 0xbb6   : > { %8199 = vmatprep.subr.bf16.mxu1 %v11000_v8 }
 0xbb7   : > { %7729 = vmatpush1.bf16.msra.mxu0 %v10722_v21 }
 0xbb8   : > { %7730 = vmatprep.subr.bf16.mxu0 %v11000_v8 }
 0xbb9   : > { %8200 = vmatpush1.bf16.msra.mxu1 %v10723_v5 }
 0xbba   : > { %8201 = vmatprep.subr.bf16.mxu1 %v11000_v8 }
 0xbbb   : > { %7731 = vmatpush1.bf16.msra.mxu0 %v10724_v23 }
 0xbbc   : > { %7732 = vmatprep.subr.bf16.mxu0 %v11000_v8 }
 0xbbd   : > { %8202 = vmatpush1.bf16.msra.mxu1 %v10725_v11 }
 0xbbe   : > { %8203 = vmatprep.subr.bf16.mxu1 %v11000_v8 }
 0xbbf   : > { %7733 = vmatpush1.bf16.msra.mxu0 %v10726_v12 }
 0xbc0   : > { %7734 = vmatprep.subr.bf16.mxu0 %v11000_v8 }
 0xbc1   : > { %8204 = vmatpush1.bf16.msra.mxu1 %v10727_v59 }
 0xbc2   : > { %8205 = vmatprep.subr.bf16.mxu1 %v11000_v8 }
 0xbc3   : > { %7735 = vmatpush1.bf16.msra.mxu0 %v10728_v17 }
 0xbc4   : > { %7736 = vmatprep.subr.bf16.mxu0 %v11000_v8 }
 0xbc5   : > { %8206 = vmatpush1.bf16.msra.mxu1 %v10729_v63 }
 0xbc6   : > { %8207 = vmatprep.subr.bf16.mxu1 %v11000_v8 }
 0xbc7   : > { %7737 = vmatpush1.bf16.msra.mxu0 %v10730_v29 }
 0xbc8   : > { %7738 = vmatprep.subr.bf16.mxu0 %v11000_v8 }
 0xbc9   : > { %8208 = vmatpush1.bf16.msra.mxu1 %v10731_v24 }
 0xbca   : > { %8209 = vmatprep.subr.bf16.mxu1 %v11000_v8 }
 0xbcb   : > { %7739 = vmatpush1.bf16.msra.mxu0 %v10732_v51 }
 0xbcc   : > { %7740 = vmatprep.subr.bf16.mxu0 %v11000_v8 }
 0xbcd   : > { %8210 = vmatpush1.bf16.msra.mxu1 %v10733_v4 }
 0xbce   : > { %8211 = vmatprep.subr.bf16.mxu1 %v11000_v8 }
 0xbcf   : > { %7741 = vmatpush1.bf16.msra.mxu0 %v10734_v33 }
 0xbd0   : > { %7742 = vmatprep.subr.bf16.mxu0 %v11000_v8 }
 0xbd1   : > { %8212 = vmatpush1.bf16.msra.mxu1 %v10735_v9 }
 0xbd2   : > { %8213 = vmatprep.subr.bf16.mxu1 %v11000_v8 }
 0xbd3   : > { %7743 = vmatpush1.bf16.msra.mxu0 %v10736_v55 }
 0xbd4   : > { %7744 = vmatprep.subr.bf16.mxu0 %v11000_v8 }
 0xbd5   : > { %8214 = vmatpush1.bf16.msra.mxu1 %v10737_v31 }
 0xbd6   : > { %8215 = vmatprep.subr.bf16.mxu1 %v11000_v8 }
 0xbd7   : > { %7745 = vmatpush1.bf16.msra.mxu0 %v10738_v47 }
 0xbd8   : > { %7746 = vmatprep.subr.bf16.mxu0 %v11000_v8 }
 0xbd9   : > { %8216 = vmatpush1.bf16.msra.mxu1 %v10739_v2 }
 0xbda   : > { %8217 = vmatprep.subr.bf16.mxu1 %v11000_v8 }
 0xbdb   : > { %7747 = vmatpush1.bf16.msra.mxu0 %v10740_v53 }
 0xbdc   : > { %7748 = vmatprep.subr.bf16.mxu0 %v11000_v8 }
 0xbdd   : > { %8218 = vmatpush1.bf16.msra.mxu1 %v10741_v7  ;;  %v9391_v7 = vld [vmem:[%s14157_s12] ss:$0 sm:$0xff] }
 0xbde   : > { %8219 = vmatprep.subr.bf16.mxu1 %v11000_v8 }
 0xbdf   : > { %7749 = vmatpush1.bf16.msra.mxu0 %v10742_v27 }
 0xbe0   : > { %7750 = vmatprep.subr.bf16.mxu0 %v11000_v8 }
 0xbe1   : > { %8220 = vmatpush1.bf16.msra.mxu1 %v10743_v52 }
 0xbe2   : > { %8221 = vmatprep.subr.bf16.mxu1 %v11000_v8 }
 0xbe3   : > { %7751 = vmatpush1.bf16.msra.mxu0 %v10744_v58 }
 0xbe4   : > { %8041 = vmatprep.subr.bf16.mxu0 %v11000_v8 }
 0xbe5   : > { %8222 = vmatpush1.bf16.msra.mxu1 %v10745_v3 }
 0xbe6   : > { %7757 = vmatmul.mubr.bf16.vlgmr.msra.gmra.mrb[0].mxu0 %v7634_v44  ;;  %8223 = vmatprep.subr.bf16.mxu1 %v11000_v8  ;;  %v10769_v44 = vld [vmem:[#allocation10] sm:$0xff]  }
 0xbe7   : > { %8042 = vmatpush1.bf16.msra.mxu0 %v10746_v34  ;;  %9375 = vmatprep.mubr.msk.bf16.mxu0 %vm4068_vm10, %v7952_v57 }
 0xbe8   : > { %8043 = vmatprep.subr.bf16.mxu0 %v11000_v8 }
 0xbe9   : > { %8224 = vmatpush1.bf16.msra.mxu1 %v10747_v6  ;;  %v10770_v6 = vld [vmem:[#allocation10 + $0x8] sm:$0xff]  }
 0xbeb   : > { %8044 = vmatpush1.bf16.msra.mxu0 %v10748_v48  ;;  %v10771_v48 = vld [vmem:[#allocation10 + $0x10] sm:$0xff]  }
 0xbec   : > { %8230 = vmatmul.mubr.bf16.vlgmr.msra.gmra.mrb[4].mxu1 %v7131_v37  ;;  %8045 = vmatprep.subr.bf16.mxu0 %v11000_v8  ;;  %v10772_v37 = vld [vmem:[#allocation10 + $0x18] sm:$0xff]  }
 0xbef   : > { %8046 = vmatpush1.bf16.msra.mxu0 %v10749_v50  ;;  %v9392_v50 = vld [vmem:[%s14159_s29] ss:$0 sm:$0xff]  ;;  %s14027_s29 = scalar_lea.hbm %s14162_s25, %s9408_s28 }
 0xbf0   : > { %8047 = vmatprep.subr.bf16.mxu0 %v11000_v8 }
 0xbf3   : > { %8048 = vmatpush1.bf16.msra.mxu0 %v10750_v18 }
 0xbf4   : > { %8049 = vmatprep.subr.bf16.mxu0 %v11000_v8 }
 0xbf7   : > { %8050 = vmatpush1.bf16.msra.mxu0 %v10751_v14 }
 0xbf8   : > { %8051 = vmatprep.subr.bf16.mxu0 %v11000_v8 }
 0xbfb   : > { %8052 = vmatpush1.bf16.msra.mxu0 %v10752_v26 }
 0xbfc   : > { %8053 = vmatprep.subr.bf16.mxu0 %v11000_v8 }
 0xbff   : > { %8054 = vmatpush1.bf16.msra.mxu0 %v10753_v1 }
 0xc00   : > { %8055 = vmatprep.subr.bf16.mxu0 %v11000_v8 }
 0xc03   : > { %8056 = vmatpush1.bf16.msra.mxu0 %v10754_v61 }
 0xc04   : > { %8057 = vmatprep.subr.bf16.mxu0 %v11000_v8 }
 0xc07   : > { %8058 = vmatpush1.bf16.msra.mxu0 %v10755_v38 }
 0xc08   : > { %8059 = vmatprep.subr.bf16.mxu0 %v11000_v8 }
 0xc0b   : > { %8060 = vmatpush1.bf16.msra.mxu0 %v10756_v13 }
 0xc0c   : > { %8061 = vmatprep.subr.bf16.mxu0 %v11000_v8 }
 0xc0f   : > { %8062 = vmatpush1.bf16.msra.mxu0 %v10757_v35 }
 0xc10   : > { %8063 = vmatprep.subr.bf16.mxu0 %v11000_v8 }
 0xc13   : > { %8064 = vmatpush1.bf16.msra.mxu0 %v10758_v39 }
 0xc14   : > { %8065 = vmatprep.subr.bf16.mxu0 %v11000_v8 }
 0xc17   : > { %8066 = vmatpush1.bf16.msra.mxu0 %v10759_v32 }
 0xc18   : > { %8067 = vmatprep.subr.bf16.mxu0 %v11000_v8  ;;  %v10763_v8 = vld [vmem:[%s14087_s18 + $0x10] sm:$0xff]  }
 0xc1b   : > { %8068 = vmatpush1.bf16.msra.mxu0 %v10760_v20 }
 0xc1c   : > { %9758 = vmatprep.subr.bf16.mxu0 %v10998_v0 }
 0xc1e   : > { %8074 = vmatmul.mubr.bf16.vlgmr.msra.gmra.mrb[4].mxu0 %v7951_v19 }
 0xc1f   : > { %9774 = vmatprep.mubr.msk.bf16.mxu0 %vm10999_vm0, %v10998_v0  ;;  %9759 = vmatpush3.bf16.msra.mxu0 %v10761_v56 }
 0xc20   : > { %9760 = vmatprep.subr.bf16.mxu0 %v10998_v0 }
 0xc23   : > { %9761 = vmatpush3.bf16.msra.mxu0 %v10762_v49 }
 0xc24   : > { %9762 = vmatprep.subr.bf16.mxu0 %v10998_v0 }
 0xc27   : > { %9763 = vmatpush3.bf16.msra.mxu0 %v10763_v8 }
 0xc28   : > { %9764 = vmatprep.subr.bf16.mxu0 %v10998_v0 }
 0xc2b   : > { %9765 = vmatpush3.bf16.msra.mxu0 %v10764_v45 }
 0xc2c   : > { %9766 = vmatprep.subr.bf16.mxu0 %v10998_v0 }
 0xc2f   : > { %9767 = vmatpush3.bf16.msra.mxu0 %v10765_v22 }
 0xc30   : > { %9768 = vmatprep.subr.bf16.mxu0 %v10998_v0 }
 0xc33   : > { %9769 = vmatpush3.bf16.msra.mxu0 %v10766_v30 }
 0xc34   : > { %9770 = vmatprep.subr.bf16.mxu0 %v10998_v0 }
 0xc37   : > { %9771 = vmatpush3.bf16.msra.mxu0 %v10767_v25 }
 0xc38   : > { %9772 = vmatprep.subr.bf16.mxu0 %v10998_v0 }
 0xc3b   : > { %9773 = vmatpush3.bf16.msra.mxu0 %v10768_v43 }
 0xc3c   : > { %9778 = vmatprep.subr.bf16.mxu0 %v10998_v0 }
 0xc49   : > { %v7315_v46 = vpop.f32.mrb[248].mxu0 }
 0xc4a   : > { %v7317_v15 = vpop.f32.mrb[249].mxu0 }
 0xc4b   : > { %v7318_v40 = vpop.f32.mrb[250].mxu0 }
 0xc4c   : > { %v7319_v54 = vpop.f32.mrb[251].mxu0 }
 0xc4f   : > { %v7597_v41 = vpop.f32.mrb[252].mxu1 }
 0xc50   : > { %v7599_v42 = vpop.f32.mrb[253].mxu1 }
 0xc51   : > { %v7600_v60 = vpop.f32.mrb[254].mxu1 }
 0xc52   : > { %v7601_v28 = vpop.f32.mrb[255].mxu1 }
 0xc81   : > { %v7442_v16 = vpop.f32.mrb[252].mxu0 }
 0xc82   : > { %v7443_v62 = vadd.f32 %v7442_v16, %v7315_v46  ;;  %v7444_v36 = vpop.f32.mrb[253].mxu0 }
 0xc83   : > { %v7445_v10 = vpop.f32.mrb[254].mxu0 }
 0xc84   : > { %v7446_v21 = vpop.f32.mrb[255].mxu0  ;;  %v7603_v5 = vadd.f32 %v7597_v41, %v7443_v62 }
 0xc87   : > { %v7914_v23 = vpop.f32.mrb[0].mxu1 }
 0xc88   : > { %v7916_v11 = vpop.f32.mrb[1].mxu1 }
 0xc89   : > { %v7917_v12 = vpop.f32.mrb[2].mxu1 }
 0xc8a   : > { %v7918_v59 = vpop.f32.mrb[3].mxu1 }
 0xcb9   : > { %v7758_v17 = vpop.f32.mrb[0].mxu0 }
 0xcba   : > { %v7764_v63 = vadd.f32 %v7758_v17, %v7603_v5  ;;  %v7760_v29 = vpop.f32.mrb[1].mxu0 }
 0xcbb   : > { %v7761_v24 = vpop.f32.mrb[2].mxu0 }
 0xcbc   : > { %v7762_v51 = vpop.f32.mrb[3].mxu0  ;;  %v7920_v4 = vadd.f32 %v7914_v23, %v7764_v63 }
 0xcbf   : > { %v8231_v33 = vpop.f32.mrb[4].mxu1 }
 0xcc0   : > { %v8233_v9 = vpop.f32.mrb[5].mxu1 }
 0xcc1   : > { %v8234_v55 = vpop.f32.mrb[6].mxu1 }
 0xcc2   : > { %v8235_v31 = vpop.f32.mrb[7].mxu1 }
 0xcf1   : > { %v8075_v47 = vpop.f32.mrb[4].mxu0 }
 0xcf2   : > { %v8081_v2 = vadd.f32 %v8075_v47, %v7920_v4  ;;  %v8077_v53 = vpop.f32.mrb[5].mxu0 }
 0xcf3   : > { %v8078_v27 = vpop.f32.mrb[6].mxu0 }
 0xcf4   : > { %v8237_v52 = vadd.f32 %v8231_v33, %v8081_v2  ;;  %v8079_v58 = vpop.f32.mrb[7].mxu0 }
 0xcf6   : > { %v8245_v3 = vadd.f32 %v9391_v7, %v8237_v52 }
 0xcf8   : > { %v8246_v34 = vmax.f32 %v8245_v3, 0.0 }
 0xcfa   : > { %v8247_v57 = vpack.c.bf16 %v8246_v34, %v8246_v34 }
 0xcfc   : > { %9775 = vmatmul.mubr.bf16.vlgmr.msra.gmra.mrb[8].mxu0 %v8247_v57 }
 0xcfd   : > { %9779 = vmatpush3.bf16.msra.mxu0 %v10769_v44  ;;  %9786 = vmatprep.mubr.msk.bf16.mxu0 %vm10999_vm0, %v10998_v0 }
 0xcfe   : > { %9780 = vmatprep.subr.bf16.mxu0 %v10998_v0 }
 0xd01   : > { %9781 = vmatpush3.bf16.msra.mxu0 %v10770_v6 }
 0xd02   : > { %9782 = vmatprep.subr.bf16.mxu0 %v10998_v0 }
 0xd05   : > { %9783 = vmatpush3.bf16.msra.mxu0 %v10771_v48 }
 0xd06   : > { %9784 = vmatprep.subr.bf16.mxu0 %v10998_v0  ;;  %v9401_v0 = vld [vmem:[%s14160_s2] ss:$0 sm:$0xff] }
 0xd09   : > { %9785 = vmatpush3.bf16.msra.mxu0 %v10772_v37 }
 0xdcf   : > { %v8353_v18 = vpop.f32.mrb[8].mxu0 }
 0xdd0   : > { %v8354_v14 = vadd.f32 %v9392_v50, %v8353_v18  ;;  %v9776_v26 = vpop.f32.mrb[9].mxu0 }
 0xdd1   : > { %v8356_v1 = vpop.f32.mrb[10].mxu0 }
 0xdd2   : > { %v8359_v61 = vmax.f32 %v8354_v14, 0.0  ;;  %v9777_v38 = vpop.f32.mrb[11].mxu0 }
 0xdd4   : > { %v8360_v13 = vpack.c.bf16 %v8359_v61, %v8359_v61 }
 0xdd6   : > { %9787 = vmatmul.mubr.msk.bf16.vlgmr.msra.gmra.mrb[12].mxu0 %vm6478_vm11, %v8360_v13 }
 0xea9   : > { %v8437_v35 = vpop.f32.mrb[12].mxu0 }
 0xeaa   : > { %v8438_v39 = vadd.f32 %v9401_v0, %v8437_v35  ;;  %v9788_v32 = vpop.f32.mrb[13].mxu0 }
 0xeab   : > { %v8440_v20 = vpop.f32.mrb[14].mxu0 }
 0xeac   : > { %8443 = vst [vmem:[%s750_s6] sm:$0xff] %v8438_v39  ;;  %v9789_v19 = vpop.f32.mrb[15].mxu0 }
 0xead   : > { %10926 = shalt.err (!%p10923_p0)
}
 0xeae   : > { %s10927_s27 = scalar_lea.hbm %s14027_s29, 128  ;;  %s10931_s6 = scalar_lea.hbm %s14162_s25, 256 }
 0xeaf   : > { %p10928_p6 = scmp.ne.s32.totalorder %s14027_s29, %s10927_s27  ;;  %p10932_p13 = scmp.lt.u32.totalorder %s14027_s29, %s14162_s25 }
 0xeb0   : > { %p10933_p12 = scmp.lt.u32.totalorder %s10931_s6, %s10927_s27  ;;  %p10935_p2 = scmp.lt.u32.totalorder %s10927_s27, %s14027_s29 }
 0xeb1   : > { %p10929_p9 = pnand %p10928_p6, %p14163_p3 }
 0xeb2   : > { %p10934_p1 = por %p10933_p12, %p10932_p13 }
 0xeb3   : > { %p10930_p10 = pneg %p10929_p9 }
 0xeb4   : > { %p10936_p4 = por %p10935_p2, %p10934_p1 }
 0xeb6   : > { %p10937_p7 = pnand %p10936_p4, %p10930_p10 }
 0xeb8   : > { %10940 = shalt.err (!%p10937_p7)
}
 0xeb9   : > { %10034 = dma.vmem_to_hbm [thread:$0]  (%p14163_p3), %s14029_s3, 128, %s14027_s29, %s8445_s22  }
 0xeba PF: > { %s14164_s4 = sld [smem:[#allocation19_spill]]  ;;  %s14165_s1 = sld [smem:[#allocation16_spill]] }
 0xebb   : > { %s14166_s23 = sld [smem:[#allocation23_spill]] }
 0xec0   : > { %p10066_p8 = scmp.ge.s32.totalorder %s14164_s4, 2  ;;  %s8470_s0 = sand.u32 1, %s14165_s1  }
 0xec1   : > { %p14167_p11 = scmp.ne.s32.totalorder %s14166_s23, 0  ;;  %s8471_s2 = scalar_lea.sflag [#allocation4], %s8470_s0 }
 0xec3   : > { %p10053_p5 = pnand %p10066_p8, %p14167_p11 }
 0xec5   : > { %10970 = dma.done.wait (!%p10053_p5), %s8471_s2, 128  }
 0xec6   : > { %10972 = vsyncadd (!%p10053_p5), %s8471_s2, 4294967168  ;;  %s14168_s30 = sld [smem:[#allocation20_spill]]  ;;  %s14169_s3 = sld [smem:[#allocation17_spill]] }
 0xec7   : > { %s14170_s28 = sld [smem:[#allocation18_spill]]  ;;  %s14171_s29 = sld [smem:[#allocation21_spill]] }
 0xecc   : > { %p35_p0 = scmp.ge.s32.totalorder %s14168_s30, 4  }
 0xece   :  { %37 = sbr.rel (!%p35_p0) target bundleno = 19 (0x13), region = 170 }
 0xed5   :  { %8476 = vsyncpa [#allocation3], 1 }
 0xed6   :  { %8478 = vsyncpa [#allocation3 + $0x1], 1 }
 0xed7   :  { %8479 = vsyncpa [#allocation6], 1 }
 0xed8   :  { %8480 = vsyncpa [#allocation9], 1 }
 0xed9   :  { %8481 = vsyncpa [#allocation4], 1 }
 0xeda   :  { %8483 = vsyncpa [#allocation4 + $0x1], 1 }

</bundles_post_ra>
